<compile_context>
chip_gen: v7x
topology: tpu7x:2x2x1
jax: 0.10.0
libtpu: 0.0.40
codegen_flags: <defaults>
</compile_context>

<pallas_src>
import functools

import jax
import jax.numpy as jnp
from jax.experimental import pallas as pl
from jax.experimental.pallas import tpu as pltpu

BN_EPS = 1e-5


def _round_up(x, m):
    return ((x + m - 1) // m) * m


def _fold_conv_bn(w, gamma, beta, mean, var, eps=BN_EPS):
    """Fold 3x3 conv weight (HWIO: (3,3,Cin,Cout)) with eval-mode BatchNorm2d.

    Returns (w_eff, b_eff) with BN(conv(x)) == conv(x; w_eff) + b_eff.
    """
    a = gamma / jnp.sqrt(var + eps)                       # (Cout,)
    return (w * a).astype(jnp.float32), (beta - mean * a).astype(jnp.float32)


def prepare_block_params(params):
    """One-time parameter prep: fold BN, tap-pack, zero-pad, cast to bf16.

    Hoisted out of the per-call path (cache the result across forward calls).
    """
    w1, b1 = _fold_conv_bn(params["w1"], *params["bn1"])  # (3,3,C,C), (C,)
    w2, b2 = _fold_conv_bn(params["w2"], *params["bn2"])
    cin, cout = w1.shape[2], w1.shape[3]
    assert cin == cout, "identity-residual BasicBlock only (no downsample)"
    C = cout
    Cop = _round_up(C, 128)          # padded output-channel width (lane dense)
    Kp = _round_up(3 * C, 128)       # conv1 packed contraction: (kx taps x C)

    # conv1 weight packed over (kx, cin) -> Kp contraction rows.
    w1p = jnp.zeros((3, Kp, Cop), jnp.float32)
    # conv2 weight packed over (kx, padded cin) -> 3*Cop contraction rows.
    w2p = jnp.zeros((3, 3 * Cop, Cop), jnp.float32)
    for kx in range(3):
        w1p = w1p.at[:, kx * C:(kx + 1) * C, :C].set(w1[:, kx])
        w2p = w2p.at[:, kx * Cop:kx * Cop + C, :C].set(w2[:, kx])
    b1p = jnp.zeros((1, Cop), jnp.float32).at[0, :C].set(b1)
    b2p = jnp.zeros((1, Cop), jnp.float32).at[0, :C].set(b2)
    return {"w1p": w1p.astype(jnp.bfloat16), "b1p": b1p,
            "w2p": w2p.astype(jnp.bfloat16), "b2p": b2p}


def basic_block_kernel(H, W, TH, WP,
                       x_ref, res_ref, w1_ref, b1_ref, w2_ref, b2_ref, out_ref):
    f32 = jnp.float32
    Cop = out_ref.shape[-1]
    Kp = x_ref.shape[-1]
    h = pl.program_id(1)
    r0 = pl.multiple_of(h * TH, TH)          # first output row of this tile

    # kx-packed input window: rows [r0, r0+TH+4) of the 2-row-padded image.
    # Lane dim already holds (kx, cin), so conv1 needs no column shifts.
    win = x_ref[0, pl.ds(r0, TH + 4), :, :]  # (TH+4, WP, Kp) bf16

    # ---- conv1 + BN + ReLU over the (TH+2, WP) halo tile -------------------
    acc1 = jnp.zeros(((TH + 2) * WP, Cop), f32)
    for ky in range(3):                      # leading-axis slices: no relayout
        patch = win[ky:ky + TH + 2].reshape((TH + 2) * WP, Kp)
        acc1 = acc1 + jnp.dot(patch, w1_ref[ky], preferred_element_type=f32)
    z1 = (acc1 + b1_ref[...]).reshape(TH + 2, WP, Cop)

    # Halo positions outside the real image must look like conv2's zero padding
    # (not ReLU(BN bias)), so mask them to exactly zero.
    ri = r0 - 1 + jax.lax.broadcasted_iota(jnp.int32, (TH + 2, WP, 1), 0)
    ci = jax.lax.broadcasted_iota(jnp.int32, (TH + 2, WP, 1), 1) - 1
    valid = (ri >= 0) & (ri < H) & (ci >= 0) & (ci < W)
    y1 = jnp.where(valid, jnp.maximum(z1, 0.0), 0.0).astype(jnp.bfloat16)

    # ---- conv2 + BN ---------------------------------------------------------
    # Hoisted kx shifts: one shifted copy per kx, packed into the contraction
    # dim (K = 3*Cop) and reused across the three ky taps.
    y1pk = jnp.concatenate(
        [y1[:, 0:W, :], y1[:, 1:W + 1, :], y1[:, 2:W + 2, :]], axis=-1)
    acc2 = jnp.zeros((TH * W, Cop), f32)
    for ky in range(3):
        patch = y1pk[ky:ky + TH].reshape(TH * W, 3 * Cop)
        acc2 = acc2 + jnp.dot(patch, w2_ref[ky], preferred_element_type=f32)
    out = acc2.reshape(TH, W, Cop) + b2_ref[...]

    # ---- residual add (exact f32, lane-dense input) + final ReLU -----------
    out_ref[0] = jnp.maximum(out + res_ref[0], 0.0).astype(out_ref.dtype)


def _vmem_limit_bytes():
    try:
        cap = pltpu.get_tpu_info().vmem_capacity_bytes
    except Exception:
        cap = 64 * 1024 * 1024            # conservative fallback (v7x-sized)
    return min(cap // 2, 48 * 1024 * 1024)


def basic_block_forward_nhwc(x_nhwc, packed):
    """x_nhwc: (N, H, W, C) float32 -> (N, H, W, C) float32."""
    N, H, W, C = x_nhwc.shape
    Cop = packed["b1p"].shape[-1]
    Kp = packed["w1p"].shape[1]
    assert Kp == _round_up(3 * C, 128) and Cop == _round_up(C, 128)

    TH = H if H <= 32 else 16             # whole image per step for small H
    nh = pl.cdiv(H, TH)                   # ragged H handled by the row mask
    Hp = nh * TH
    WP = _round_up(W + 2, 8)              # conv1 halo-tile width (8-aligned)

    # 2-pixel zero border, then pack the 3 kx column taps into the lane dim:
    # xpk[n, r, c, kx*C + ch] = xpad[n, r, c + kx, ch].
    x_bf16 = x_nhwc.astype(jnp.bfloat16)
    xpad = jnp.zeros((N, Hp + 4, WP + 2, C), jnp.bfloat16)
    xpad = xpad.at[:, 2:H + 2, 2:W + 2, :].set(x_bf16)
    xpk = jnp.concatenate([xpad[:, :, kx:kx + WP, :] for kx in range(3)],
                          axis=-1)
    if Kp > 3 * C:
        xpk = jnp.pad(xpk, ((0, 0), (0, 0), (0, 0), (0, Kp - 3 * C)))

    # Residual as a separate lane-dense f32 input (exact f32 skip path).
    res = jnp.zeros((N, Hp, W, Cop), jnp.float32)
    res = res.at[:, :H, :, :C].set(x_nhwc)

    kernel = functools.partial(basic_block_kernel, H, W, TH, WP)
    out = pl.pallas_call(
        kernel,
        out_shape=jax.ShapeDtypeStruct((N, Hp, W, Cop), jnp.float32),
        grid=(N, nh),
        in_specs=[
            # kx-packed padded image, resident per batch (index ignores h).
            pl.BlockSpec((1, Hp + 4, WP, Kp), lambda n, h: (n, 0, 0, 0)),
            # residual tile, lane-dense f32.
            pl.BlockSpec((1, TH, W, Cop), lambda n, h: (n, h, 0, 0)),
            # folded+packed conv+BN weights / biases, resident across the grid.
            pl.BlockSpec((3, Kp, Cop), lambda n, h: (0, 0, 0)),
            pl.BlockSpec((1, Cop), lambda n, h: (0, 0)),
            pl.BlockSpec((3, 3 * Cop, Cop), lambda n, h: (0, 0, 0)),
            pl.BlockSpec((1, Cop), lambda n, h: (0, 0)),
        ],
        out_specs=pl.BlockSpec((1, TH, W, Cop), lambda n, h: (n, h, 0, 0)),
        compiler_params=pltpu.CompilerParams(
            dimension_semantics=("parallel", "parallel"),
            vmem_limit_bytes=_vmem_limit_bytes()),
    )(xpk, res, packed["w1p"], packed["b1p"], packed["w2p"], packed["b2p"])

    return out[:, :H, :, :C]


def basic_block_forward(x_nchw, packed):
    """NCHW wrapper around the NHWC kernel entry point."""
    x_nhwc = jnp.transpose(x_nchw, (0, 2, 3, 1))
    out = basic_block_forward_nhwc(x_nhwc, packed)
    return jnp.transpose(out, (0, 3, 1, 2))


def make_params(key, planes):
    """Deterministic synthetic raw weights for conv1/bn1 and conv2/bn2."""
    k1, k2 = jax.random.split(key)

    def conv_bn(k, cin, cout):
        kw, kg, kb, km, kv = jax.random.split(k, 5)
        w = jax.random.normal(kw, (3, 3, cin, cout), jnp.float32) / jnp.sqrt(9.0 * cin)
        gamma = jax.random.uniform(kg, (cout,), jnp.float32, minval=0.5, maxval=1.5)
        beta = 0.1 * jax.random.normal(kb, (cout,), jnp.float32)
        mean = 0.1 * jax.random.normal(km, (cout,), jnp.float32)
        var = jax.random.uniform(kv, (cout,), jnp.float32, minval=0.5, maxval=1.5)
        return w, (gamma, beta, mean, var)

    p = {}
    p["w1"], p["bn1"] = conv_bn(k1, planes, planes)
    p["w2"], p["bn2"] = conv_bn(k2, planes, planes)
    return p


def reference_forward(x, params):
    """Pure-JAX reference of BasicBlock (eval-mode BN). Mirrors the kernel's
    bf16 operand quantization (f32 accumulation, f32 residual)."""
    f32 = jnp.float32

    def q(a):  # round-trip through bf16, like the kernel's matmul operands
        return a.astype(jnp.bfloat16).astype(f32)

    w1, b1 = _fold_conv_bn(params["w1"], *params["bn1"])
    w2, b2 = _fold_conv_bn(params["w2"], *params["bn2"])
    xh = jnp.transpose(x, (0, 2, 3, 1))                   # NHWC, f32

    def conv(inp, w, b):
        y = jax.lax.conv_general_dilated(
            inp, q(w), window_strides=(1, 1), padding="SAME",
            dimension_numbers=("NHWC", "HWIO", "NHWC"),
            precision=jax.lax.Precision.HIGHEST)
        return y + b

    y = jnp.maximum(conv(q(xh), w1, b1), 0.0)
    y = conv(q(y), w2, b2)
    out = jnp.maximum(y + xh, 0.0)                        # residual in f32
    return jnp.transpose(out, (0, 3, 1, 2))


if __name__ == "__main__":
    key = jax.random.PRNGKey(0)
    k_x, k_p = jax.random.split(key)

    # BasicBlock(inplanes=32, planes=32), stride=1, no downsample.
    N, C, H, W = 2, 32, 16, 16
    x = jax.random.normal(k_x, (N, C, H, W), jnp.float32)
    params = make_params(k_p, C)
    packed = prepare_block_params(params)    # one-time fold/pack/cast

    fwd = jax.jit(basic_block_forward)
    out = fwd(x, packed)
    jax.block_until_ready(out)

    ref = reference_forward(x, params)
    assert out.shape == (N, C, H, W)
    max_err = float(jnp.max(jnp.abs(out - ref)))
    assert jnp.allclose(out, ref, atol=2e-3, rtol=2e-3), (
        f"mismatch vs reference, max abs err = {max_err}")

    print("KERNEL_OK")
</pallas_src>

<mosaic_0001>
module attributes {stable_mosaic.version = 11 : i64} {
  func.func @basic_block_kernel(%arg0: i32, %arg1: i32, %arg2: memref<1x20x24x128xbf16, #tpu.memory_space<vmem>>, %arg3: memref<1x16x16x128xf32, #tpu.memory_space<vmem>>, %arg4: memref<3x128x128xbf16, #tpu.memory_space<vmem>>, %arg5: memref<1x128xf32, #tpu.memory_space<vmem>>, %arg6: memref<3x384x128xbf16, #tpu.memory_space<vmem>>, %arg7: memref<1x128xf32, #tpu.memory_space<vmem>>, %arg8: memref<1x16x16x128xf32, #tpu.memory_space<vmem>>) attributes {dimension_semantics = [#tpu.dimension_semantics<parallel>, #tpu.dimension_semantics<parallel>], iteration_bounds = array<i64: 2, 1>, scalar_prefetch = 0 : i64, scratch_operands = 0 : i64, tpu.core_type = #tpu.core_type<tc>, window_params = [{transform_indices = @transform_0, window_bounds = array<i64: 1, 20, 24, 128>}, {transform_indices = @transform_1, window_bounds = array<i64: 1, 16, 16, 128>}, {pipeline_mode = #tpu.pipeline_mode<synchronous>, transform_indices = @transform_2, window_bounds = array<i64: 3, 128, 128>}, {pipeline_mode = #tpu.pipeline_mode<synchronous>, transform_indices = @transform_3, window_bounds = array<i64: 1, 128>}, {pipeline_mode = #tpu.pipeline_mode<synchronous>, transform_indices = @transform_4, window_bounds = array<i64: 3, 384, 128>}, {pipeline_mode = #tpu.pipeline_mode<synchronous>, transform_indices = @transform_5, window_bounds = array<i64: 1, 128>}, {transform_indices = @transform_6, window_bounds = array<i64: 1, 16, 16, 128>}]} {
    %c16_i32 = arith.constant 16 : i32
    %0 = arith.muli %arg1, %c16_i32 : i32
    %1 = tpu.assume_multiple %0, 16 : i32
    %c0 = arith.constant 0 : index
    %2 = arith.index_cast %1 : i32 to index
    %c0_0 = arith.constant 0 : index
    %c0_1 = arith.constant 0 : index
    %3 = vector.load %arg2[%c0, %2, %c0_0, %c0_1] : memref<1x20x24x128xbf16, #tpu.memory_space<vmem>>, vector<1x20x24x128xbf16>
    %4 = vector.shape_cast %3 : vector<1x20x24x128xbf16> to vector<20x24x128xbf16>
    %cst = arith.constant 0.000000e+00 : f32
    %5 = vector.broadcast %cst : f32 to vector<432x128xf32>
    %6 = vector.extract_strided_slice %4 {offsets = [0, 0, 0], sizes = [18, 24, 128], strides = [1, 1, 1]} : vector<20x24x128xbf16> to vector<18x24x128xbf16>
    %7 = vector.shape_cast %6 : vector<18x24x128xbf16> to vector<432x128xbf16>
    %c0_2 = arith.constant 0 : index
    %c0_3 = arith.constant 0 : index
    %c0_4 = arith.constant 0 : index
    %8 = vector.load %arg4[%c0_2, %c0_3, %c0_4] : memref<3x128x128xbf16, #tpu.memory_space<vmem>>, vector<1x128x128xbf16>
    %9 = vector.shape_cast %8 : vector<1x128x128xbf16> to vector<128x128xbf16>
    %cst_5 = arith.constant dense<0.000000e+00> : vector<432x128xf32>
    %10 = tpu.matmul %7, %9, %cst_5 {dimension_numbers = #tpu.dot_dimension_numbers<[1], [0], [0], [1], [0, 0, 1, 1], [], []>} : vector<432x128xbf16>, vector<128x128xbf16>, vector<432x128xf32> -> vector<432x128xf32>
    %11 = arith.addf %5, %10 : vector<432x128xf32>
    %12 = vector.extract_strided_slice %4 {offsets = [1, 0, 0], sizes = [18, 24, 128], strides = [1, 1, 1]} : vector<20x24x128xbf16> to vector<18x24x128xbf16>
    %13 = vector.shape_cast %12 : vector<18x24x128xbf16> to vector<432x128xbf16>
    %c1 = arith.constant 1 : index
    %c0_6 = arith.constant 0 : index
    %c0_7 = arith.constant 0 : index
    %14 = vector.load %arg4[%c1, %c0_6, %c0_7] : memref<3x128x128xbf16, #tpu.memory_space<vmem>>, vector<1x128x128xbf16>
    %15 = vector.shape_cast %14 : vector<1x128x128xbf16> to vector<128x128xbf16>
    %cst_8 = arith.constant dense<0.000000e+00> : vector<432x128xf32>
    %16 = tpu.matmul %13, %15, %cst_8 {dimension_numbers = #tpu.dot_dimension_numbers<[1], [0], [0], [1], [0, 0, 1, 1], [], []>} : vector<432x128xbf16>, vector<128x128xbf16>, vector<432x128xf32> -> vector<432x128xf32>
    %17 = arith.addf %11, %16 : vector<432x128xf32>
    %18 = vector.extract_strided_slice %4 {offsets = [2, 0, 0], sizes = [18, 24, 128], strides = [1, 1, 1]} : vector<20x24x128xbf16> to vector<18x24x128xbf16>
    %19 = vector.shape_cast %18 : vector<18x24x128xbf16> to vector<432x128xbf16>
    %c2 = arith.constant 2 : index
    %c0_9 = arith.constant 0 : index
    %c0_10 = arith.constant 0 : index
    %20 = vector.load %arg4[%c2, %c0_9, %c0_10] : memref<3x128x128xbf16, #tpu.memory_space<vmem>>, vector<1x128x128xbf16>
    %21 = vector.shape_cast %20 : vector<1x128x128xbf16> to vector<128x128xbf16>
    %cst_11 = arith.constant dense<0.000000e+00> : vector<432x128xf32>
    %22 = tpu.matmul %19, %21, %cst_11 {dimension_numbers = #tpu.dot_dimension_numbers<[1], [0], [0], [1], [0, 0, 1, 1], [], []>} : vector<432x128xbf16>, vector<128x128xbf16>, vector<432x128xf32> -> vector<432x128xf32>
    %23 = arith.addf %17, %22 : vector<432x128xf32>
    %c0_12 = arith.constant 0 : index
    %c0_13 = arith.constant 0 : index
    %24 = vector.load %arg5[%c0_12, %c0_13] : memref<1x128xf32, #tpu.memory_space<vmem>>, vector<1x128xf32>
    %25 = vector.broadcast %24 : vector<1x128xf32> to vector<432x128xf32>
    %26 = arith.addf %23, %25 : vector<432x128xf32>
    %27 = vector.shape_cast %26 : vector<432x128xf32> to vector<18x24x128xf32>
    %c1_i32 = arith.constant 1 : i32
    %28 = arith.subi %1, %c1_i32 : i32
    %29 = tpu.iota {dimensions = array<i32: 0>} : vector<18x24x1xi32>
    %30 = vector.broadcast %28 : i32 to vector<18x24x1xi32>
    %31 = arith.addi %30, %29 : vector<18x24x1xi32>
    %32 = tpu.iota {dimensions = array<i32: 1>} : vector<18x24x1xi32>
    %c1_i32_14 = arith.constant 1 : i32
    %33 = vector.broadcast %c1_i32_14 : i32 to vector<18x24x1xi32>
    %34 = arith.subi %32, %33 : vector<18x24x1xi32>
    %c0_i32 = arith.constant 0 : i32
    %35 = vector.broadcast %c0_i32 : i32 to vector<18x24x1xi32>
    %36 = arith.cmpi sge, %31, %35 : vector<18x24x1xi32>
    %c16_i32_15 = arith.constant 16 : i32
    %37 = vector.broadcast %c16_i32_15 : i32 to vector<18x24x1xi32>
    %38 = arith.cmpi slt, %31, %37 : vector<18x24x1xi32>
    %39 = arith.andi %36, %38 : vector<18x24x1xi1>
    %c0_i32_16 = arith.constant 0 : i32
    %40 = vector.broadcast %c0_i32_16 : i32 to vector<18x24x1xi32>
    %41 = arith.cmpi sge, %34, %40 : vector<18x24x1xi32>
    %42 = arith.andi %39, %41 : vector<18x24x1xi1>
    %c16_i32_17 = arith.constant 16 : i32
    %43 = vector.broadcast %c16_i32_17 : i32 to vector<18x24x1xi32>
    %44 = arith.cmpi slt, %34, %43 : vector<18x24x1xi32>
    %45 = arith.andi %42, %44 : vector<18x24x1xi1>
    %cst_18 = arith.constant 0.000000e+00 : f32
    %46 = vector.broadcast %cst_18 : f32 to vector<18x24x128xf32>
    %47 = arith.maximumf %27, %46 : vector<18x24x128xf32>
    %cst_19 = arith.constant 0.000000e+00 : f32
    %48 = vector.shape_cast %45 : vector<18x24x1xi1> to vector<18x24x1xi1>
    %49 = vector.broadcast %48 : vector<18x24x1xi1> to vector<18x24x128xi1>
    %50 = vector.broadcast %cst_19 : f32 to vector<18x24x128xf32>
    %51 = arith.select %49, %47, %50 : vector<18x24x128xi1>, vector<18x24x128xf32>
    %52 = arith.truncf %51 : vector<18x24x128xf32> to vector<18x24x128xbf16>
    %53 = vector.extract_strided_slice %52 {offsets = [0, 0, 0], sizes = [18, 16, 128], strides = [1, 1, 1]} : vector<18x24x128xbf16> to vector<18x16x128xbf16>
    %54 = vector.extract_strided_slice %52 {offsets = [0, 1, 0], sizes = [18, 16, 128], strides = [1, 1, 1]} : vector<18x24x128xbf16> to vector<18x16x128xbf16>
    %55 = vector.extract_strided_slice %52 {offsets = [0, 2, 0], sizes = [18, 16, 128], strides = [1, 1, 1]} : vector<18x24x128xbf16> to vector<18x16x128xbf16>
    %56 = tpu.concatenate %53, %54, %55 in 2 : vector<18x16x128xbf16>, vector<18x16x128xbf16>, vector<18x16x128xbf16> -> vector<18x16x384xbf16>
    %cst_20 = arith.constant 0.000000e+00 : f32
    %57 = vector.broadcast %cst_20 : f32 to vector<256x128xf32>
    %58 = vector.extract_strided_slice %56 {offsets = [0, 0, 0], sizes = [16, 16, 384], strides = [1, 1, 1]} : vector<18x16x384xbf16> to vector<16x16x384xbf16>
    %59 = vector.shape_cast %58 : vector<16x16x384xbf16> to vector<256x384xbf16>
    %c0_21 = arith.constant 0 : index
    %c0_22 = arith.constant 0 : index
    %c0_23 = arith.constant 0 : index
    %60 = vector.load %arg6[%c0_21, %c0_22, %c0_23] : memref<3x384x128xbf16, #tpu.memory_space<vmem>>, vector<1x384x128xbf16>
    %61 = vector.shape_cast %60 : vector<1x384x128xbf16> to vector<384x128xbf16>
    %cst_24 = arith.constant dense<0.000000e+00> : vector<256x128xf32>
    %62 = tpu.matmul %59, %61, %cst_24 {dimension_numbers = #tpu.dot_dimension_numbers<[1], [0], [0], [1], [0, 0, 1, 1], [], []>} : vector<256x384xbf16>, vector<384x128xbf16>, vector<256x128xf32> -> vector<256x128xf32>
    %63 = arith.addf %57, %62 : vector<256x128xf32>
    %64 = vector.extract_strided_slice %56 {offsets = [1, 0, 0], sizes = [16, 16, 384], strides = [1, 1, 1]} : vector<18x16x384xbf16> to vector<16x16x384xbf16>
    %65 = vector.shape_cast %64 : vector<16x16x384xbf16> to vector<256x384xbf16>
    %c1_25 = arith.constant 1 : index
    %c0_26 = arith.constant 0 : index
    %c0_27 = arith.constant 0 : index
    %66 = vector.load %arg6[%c1_25, %c0_26, %c0_27] : memref<3x384x128xbf16, #tpu.memory_space<vmem>>, vector<1x384x128xbf16>
    %67 = vector.shape_cast %66 : vector<1x384x128xbf16> to vector<384x128xbf16>
    %cst_28 = arith.constant dense<0.000000e+00> : vector<256x128xf32>
    %68 = tpu.matmul %65, %67, %cst_28 {dimension_numbers = #tpu.dot_dimension_numbers<[1], [0], [0], [1], [0, 0, 1, 1], [], []>} : vector<256x384xbf16>, vector<384x128xbf16>, vector<256x128xf32> -> vector<256x128xf32>
    %69 = arith.addf %63, %68 : vector<256x128xf32>
    %70 = vector.extract_strided_slice %56 {offsets = [2, 0, 0], sizes = [16, 16, 384], strides = [1, 1, 1]} : vector<18x16x384xbf16> to vector<16x16x384xbf16>
    %71 = vector.shape_cast %70 : vector<16x16x384xbf16> to vector<256x384xbf16>
    %c2_29 = arith.constant 2 : index
    %c0_30 = arith.constant 0 : index
    %c0_31 = arith.constant 0 : index
    %72 = vector.load %arg6[%c2_29, %c0_30, %c0_31] : memref<3x384x128xbf16, #tpu.memory_space<vmem>>, vector<1x384x128xbf16>
    %73 = vector.shape_cast %72 : vector<1x384x128xbf16> to vector<384x128xbf16>
    %cst_32 = arith.constant dense<0.000000e+00> : vector<256x128xf32>
    %74 = tpu.matmul %71, %73, %cst_32 {dimension_numbers = #tpu.dot_dimension_numbers<[1], [0], [0], [1], [0, 0, 1, 1], [], []>} : vector<256x384xbf16>, vector<384x128xbf16>, vector<256x128xf32> -> vector<256x128xf32>
    %75 = arith.addf %69, %74 : vector<256x128xf32>
    %76 = vector.shape_cast %75 : vector<256x128xf32> to vector<16x16x128xf32>
    %c0_33 = arith.constant 0 : index
    %c0_34 = arith.constant 0 : index
    %77 = vector.load %arg7[%c0_33, %c0_34] : memref<1x128xf32, #tpu.memory_space<vmem>>, vector<1x128xf32>
    %78 = vector.shape_cast %77 : vector<1x128xf32> to vector<1x1x128xf32>
    %79 = vector.broadcast %78 : vector<1x1x128xf32> to vector<16x16x128xf32>
    %80 = arith.addf %76, %79 : vector<16x16x128xf32>
    %c0_35 = arith.constant 0 : index
    %c0_36 = arith.constant 0 : index
    %c0_37 = arith.constant 0 : index
    %c0_38 = arith.constant 0 : index
    %81 = vector.load %arg3[%c0_35, %c0_36, %c0_37, %c0_38] : memref<1x16x16x128xf32, #tpu.memory_space<vmem>>, vector<1x16x16x128xf32>
    %82 = vector.shape_cast %81 : vector<1x16x16x128xf32> to vector<16x16x128xf32>
    %83 = arith.addf %80, %82 : vector<16x16x128xf32>
    %cst_39 = arith.constant 0.000000e+00 : f32
    %84 = vector.broadcast %cst_39 : f32 to vector<16x16x128xf32>
    %85 = arith.maximumf %83, %84 : vector<16x16x128xf32>
    %c0_40 = arith.constant 0 : index
    %c0_41 = arith.constant 0 : index
    %c0_42 = arith.constant 0 : index
    %c0_43 = arith.constant 0 : index
    %86 = vector.load %arg8[%c0_40, %c0_41, %c0_42, %c0_43] : memref<1x16x16x128xf32, #tpu.memory_space<vmem>>, vector<1x16x16x128xf32>
    %87 = vector.shape_cast %86 : vector<1x16x16x128xf32> to vector<16x16x128xf32>
    %88 = vector.shape_cast %85 : vector<16x16x128xf32> to vector<1x16x16x128xf32>
    tpu.vector_store %arg8[%c0_40, %c0_41, %c0_42, %c0_43], %88 {strides = array<i32>} : memref<1x16x16x128xf32, #tpu.memory_space<vmem>>, vector<1x16x16x128xf32>,
    return
  }
  func.func @transform_0(%arg0: i32, %arg1: i32) -> (i32, i32, i32, i32) {
    %c0_i32 = arith.constant 0 : i32
    %c0_i32_0 = arith.constant 0 : i32
    %c0_i32_1 = arith.constant 0 : i32
    %c0_i32_2 = arith.constant 0 : i32
    return %arg0, %c0_i32, %c0_i32_0, %c0_i32_1 : i32, i32, i32, i32
  }
  func.func @transform_1(%arg0: i32, %arg1: i32) -> (i32, i32, i32, i32) {
    %c0_i32 = arith.constant 0 : i32
    %c0_i32_0 = arith.constant 0 : i32
    %c0_i32_1 = arith.constant 0 : i32
    return %arg0, %arg1, %c0_i32, %c0_i32_0 : i32, i32, i32, i32
  }
  func.func @transform_2(%arg0: i32, %arg1: i32) -> (i32, i32, i32) {
    %c0_i32 = arith.constant 0 : i32
    %c0_i32_0 = arith.constant 0 : i32
    %c0_i32_1 = arith.constant 0 : i32
    %c0_i32_2 = arith.constant 0 : i32
    return %c0_i32, %c0_i32_0, %c0_i32_1 : i32, i32, i32
  }
  func.func @transform_3(%arg0: i32, %arg1: i32) -> (i32, i32) {
    %c0_i32 = arith.constant 0 : i32
    %c0_i32_0 = arith.constant 0 : i32
    %c0_i32_1 = arith.constant 0 : i32
    return %c0_i32, %c0_i32_0 : i32, i32
  }
  func.func @transform_4(%arg0: i32, %arg1: i32) -> (i32, i32, i32) {
    %c0_i32 = arith.constant 0 : i32
    %c0_i32_0 = arith.constant 0 : i32
    %c0_i32_1 = arith.constant 0 : i32
    %c0_i32_2 = arith.constant 0 : i32
    return %c0_i32, %c0_i32_0, %c0_i32_1 : i32, i32, i32
  }
  func.func @transform_5(%arg0: i32, %arg1: i32) -> (i32, i32) {
    %c0_i32 = arith.constant 0 : i32
    %c0_i32_0 = arith.constant 0 : i32
    %c0_i32_1 = arith.constant 0 : i32
    return %c0_i32, %c0_i32_0 : i32, i32
  }
  func.func @transform_6(%arg0: i32, %arg1: i32) -> (i32, i32, i32, i32) {
    %c0_i32 = arith.constant 0 : i32
    %c0_i32_0 = arith.constant 0 : i32
    %c0_i32_1 = arith.constant 0 : i32
    return %arg0, %arg1, %c0_i32, %c0_i32_0 : i32, i32, i32, i32
  }
}

</mosaic_0001>

<bundles_post_ra>
// kernel: basic_block_forward.1
= control target key start
LH: loop header
LB: loop body
LE: loop exit
PB: predicated region body
PF: predicated region fallthrough
CT: control target
= control target key end

     0   :  { %s6205_s21 = smov 0   ;;  %s6207_s22 = smov 0   ;;  %s8078_s0 = inlined_call_operand.vmem [shape: bf16[2,20,24,128], index: 0, kind: input, shape index: {}]   ;;  %s8079_s1 = inlined_call_operand.vmem [shape: f32[2,16,16,128], index: 1, kind: input, shape index: {}]   ;;  %s8080_s2 = inlined_call_operand.vmem [shape: bf16[3,128,128], index: 2, kind: input, shape index: {}]   ;;  %s8081_s3 = inlined_call_operand.vmem [shape: f32[1,128], index: 3, kind: input, shape index: {}]   ;;  %s8082_s4 = inlined_call_operand.vmem [shape: bf16[3,384,128], index: 4, kind: input, shape index: {}]   ;;  %s8083_s5 = inlined_call_operand.vmem [shape: f32[1,128], index: 5, kind: input, shape index: {}]   ;;  %s8084_s6 = inlined_call_operand.vmem [shape: f32[2,16,16,128], index: 6, kind: output, shape index: {}]  }
   0x1   :  { %s6209_s23 = smov 0  }
   0x2 LB: > { %s28_s24 = sadd.s32 1, %s6159_s22  ;;  %p4318_p0 = scmp.ge.s32.totalorder %s6163_s23, 1  ;;  %s6163_s23 = sphi %s6209_s23, %s16_s23   ;;  %s6159_s22 = sphi %s6207_s22, %s8182_s22   ;;  %s6155_s21 = sphi %s6205_s21, %s8181_s21  }
   0x3   : > { %p30_p1 = scmp.ge.s32.totalorder %s28_s24, 2  ;;  %p244_p2 = scmp.lt.s32.totalorder %s6163_s23, 3 }
   0x5   : > { %s8184_s24 = smov (%p30_p1, %s28_s24), 0  ;;  %p245_p3 = pnand %p4318_p0, %p244_p2 }
   0x7   : > { %248 = sbr.rel (%p245_p3) target bundleno = 1282 (0x502), region = 44 }
   0xe   : > { %v5987_v0 = vld [vmem:[%s8080_s2 + $0x40] sm:$0xff]   ;;  %v8085_v1 = vmov 0.0   ;;  %v5988_v2 = vld [vmem:[%s8080_s2 + $0x48] sm:$0xff]   ;;  %vm6166_vm0 = vmmov 0   ;;  %v5989_v3 = vld [vmem:[%s8080_s2 + $0x50] sm:$0xff]   ;;  %p289_p4 = scmp.lt.s32.totalorder %s6155_s21, 1 }
   0xf   : > { %5265 = vmatprep.subr.bf16.mxu0 %v8085_v1  ;;  %5781 = vmatprep.subr.bf16.mxu1 %v8085_v1  ;;  %v5996_v4 = vld [vmem:[%s8080_s2] sm:$0xff]   ;;  %v5990_v5 = vld [vmem:[%s8080_s2 + $0x58] sm:$0xff]   ;;  %v5999_v6 = vld [vmem:[%s8080_s2 + $0x8] sm:$0xff]   ;;  %vm2388_vm3 = vcmask 1046528   ;;  %vm2117_vm4 = vsmask.f32 7424 }
  0x10   : > { %5266 = vmatpush3.bf16.msra.mxu0 %v5987_v0  ;;  %5281 = vmatprep.mubr.msk.bf16.mxu0 %vm6166_vm0, %v8085_v1  ;;  %v5991_v7 = vld [vmem:[%s8080_s2 + $0x60] sm:$0xff]   ;;  %v6001_v8 = vld [vmem:[%s8080_s2 + $0x10] sm:$0xff]   ;;  %s8186_s21 = smov (!%p289_p4, %s6155_s21), 1  ;;  %v5992_v9 = vld [vmem:[%s8080_s2 + $0x68] sm:$0xff]   ;;  %vm6167_vm5 = vmmov 1  }
  0x11   : > { %5267 = vmatprep.subr.bf16.mxu0 %v8085_v1  ;;  %5429 = vmatprep.mubr.msk.bf16.mxu1 %vm6166_vm0, %v8085_v1  ;;  %v6002_v10 = vld [vmem:[%s8080_s2 + $0x18] sm:$0xff]   ;;  %s5957_s25 = smul.u32 240, %s8186_s21  ;;  %v5993_v11 = vld [vmem:[%s8080_s2 + $0x70] sm:$0xff]   ;;  %v6004_v12 = vld [vmem:[%s8080_s2 + $0x20] sm:$0xff]  }
  0x12   : > { %5789 = vmatpush3.bf16.msra.mxu1 %v5996_v4  ;;  %v5994_v13 = vld [vmem:[%s8080_s2 + $0x78] sm:$0xff]   ;;  %v6005_v16 = vld [vmem:[%s8080_s2 + $0x28] sm:$0xff]   ;;  %v6007_v18 = vld [vmem:[%s8080_s2 + $0x30] sm:$0xff]  }
  0x13   : > { %5782 = vmatprep.subr.bf16.mxu1 %v8085_v1  ;;  %s6284_s8 = scalar_lea.vmem %s8078_s0, %s5957_s25  ;;  %v6008_v21 = vld [vmem:[%s8080_s2 + $0x38] sm:$0xff]  }
  0x14   : > { %5268 = vmatpush3.bf16.msra.mxu0 %v5988_v2  ;;  %v6291_v14 = vld [vmem:[%s6284_s8 + $0xc] sm:$0xf]  ;;  %v6294_v15 = vld [vmem:[%s6284_s8 + $0x10] sm:$0xf]  ;;  %v6309_v19 = vld [vmem:[%s6284_s8 + $0x14] sm:$0xf] }
  0x15   : > { %5269 = vmatprep.subr.bf16.mxu0 %v8085_v1  ;;  %v4340_v17 = vcombine.low %v6291_v14, %v6294_v15  ;;  %v6314_v20 = vld [vmem:[%s6284_s8 + $0x18] sm:$0xf]  ;;  %v333_v22 = vld [vmem:[%s6284_s8 + $0x30] sm:$0xf]  ;;  %v334_v23 = vld [vmem:[%s6284_s8 + $0x34] sm:$0xf] }
  0x16   : > { %5790 = vmatpush3.bf16.msra.mxu1 %v5999_v6  ;;  %v4341_v24 = vcombine.low %v6309_v19, %v6314_v20  ;;  %v6325_v25 = vcombine.low %v333_v22, %v334_v23  ;;  %v6331_v26 = vld [vmem:[%s6284_s8 + $0x1c] sm:$0xf]  ;;  %v6334_v27 = vld [vmem:[%s6284_s8 + $0x20] sm:$0xf]  ;;  %v335_v28 = vld [vmem:[%s6284_s8 + $0x38] sm:$0xf] }
  0x17   : > { %5783 = vmatprep.subr.bf16.mxu1 %v8085_v1  ;;  %v336_v29 = vld [vmem:[%s6284_s8 + $0x3c] sm:$0xf]  ;;  %v4342_v30 = vcombine.low %v6331_v26, %v6334_v27  ;;  %v6350_v32 = vld [vmem:[%s6284_s8 + $0x24] sm:$0xf]  ;;  %v6353_v33 = vld [vmem:[%s6284_s8 + $0x28] sm:$0xf]  ;;  %v4345_v45 = vcombine.low %v334_v23, %v335_v28 }
  0x18   : > { %5270 = vmatpush3.bf16.msra.mxu0 %v5989_v3  ;;  %v6344_v31 = vcombine.low %v335_v28, %v336_v29  ;;  %v337_v34 = vld [vmem:[%s6284_s8 + $0x40] sm:$0xf]  ;;  %v338_v35 = vld [vmem:[%s6284_s8 + $0x44] sm:$0xf]  ;;  %v4343_v36 = vcombine.low %v6350_v32, %v6353_v33  ;;  %v6369_v38 = vld [vmem:[%s6284_s8 + $0x2c] sm:$0xf] }
  0x19   : > { %5271 = vmatprep.subr.bf16.mxu0 %v8085_v1  ;;  %v6363_v37 = vcombine.low %v337_v34, %v338_v35  ;;  %v339_v39 = vld [vmem:[%s6284_s8 + $0x48] sm:$0xf]  ;;  %v340_v40 = vld [vmem:[%s6284_s8 + $0x4c] sm:$0xf]  ;;  %v4344_v41 = vcombine.low %v6369_v38, %v333_v22  ;;  %v341_v43 = vld [vmem:[%s6284_s8 + $0x50] sm:$0xf]  ;;  %v4346_v49 = vcombine.low %v336_v29, %v337_v34 }
  0x1a   : > { %5791 = vmatpush3.bf16.msra.mxu1 %v6001_v8  ;;  %v6378_v42 = vcombine.low %v339_v39, %v340_v40  ;;  %v342_v44 = vld [vmem:[%s6284_s8 + $0x54] sm:$0xf]  ;;  %v343_v47 = vld [vmem:[%s6284_s8 + $0x58] sm:$0xf]  ;;  %v344_v48 = vld [vmem:[%s6284_s8 + $0x5c] sm:$0xf]  ;;  %v4347_v53 = vcombine.low %v338_v35, %v339_v39  ;;  %v4348_v55 = vcombine.low %v340_v40, %v341_v43 }
  0x1b   : > { %5784 = vmatprep.subr.bf16.mxu1 %v8085_v1  ;;  %v6388_v46 = vcombine.low %v341_v43, %v342_v44  ;;  %v6397_v50 = vcombine.low %v343_v47, %v344_v48  ;;  %v345_v51 = vld [vmem:[%s6284_s8 + $0x60] sm:$0xf]  ;;  %v346_v52 = vld [vmem:[%s6284_s8 + $0x64] sm:$0xf]  ;;  %v347_v56 = vld [vmem:[%s6284_s8 + $0x68] sm:$0xf]  ;;  %v4349_v59 = vcombine.low %v342_v44, %v343_v47 }
  0x1c   : > { %5272 = vmatpush3.bf16.msra.mxu0 %v5990_v5  ;;  %v6406_v54 = vcombine.low %v345_v51, %v346_v52  ;;  %v348_v57 = vld [vmem:[%s6284_s8 + $0x6c] sm:$0xf]  ;;  %v349_v60 = vld [vmem:[%s6284_s8 + $0x70] sm:$0xf]  ;;  %v350_v61 = vld [vmem:[%s6284_s8 + $0x74] sm:$0xf]  ;;  %v4350_v63 = vcombine.low %v344_v48, %v345_v51 }
  0x1d   : > { %5273 = vmatprep.subr.bf16.mxu0 %v8085_v1  ;;  %v6415_v58 = vcombine.low %v347_v56, %v348_v57  ;;  %v6424_v62 = vcombine.low %v349_v60, %v350_v61  ;;  %v351_v0 = vld [vmem:[%s6284_s8 + $0x78] sm:$0xf]  ;;  %v352_v2 = vld [vmem:[%s6284_s8 + $0x7c] sm:$0xf]  ;;  %v353_v5 = vld [vmem:[%s6284_s8 + $0x80] sm:$0xf] }
  0x1e   : > { %5792 = vmatpush3.bf16.msra.mxu1 %v6002_v10  ;;  %v6433_v3 = vcombine.low %v351_v0, %v352_v2  ;;  %v360_v22 = vld [vmem:[%s6284_s8 + $0x9c] sm:$0xf]  ;;  %v361_v28 = vld [vmem:[%s6284_s8 + $0xa0] sm:$0xf]  ;;  %v362_v29 = vld [vmem:[%s6284_s8 + $0xa4] sm:$0xf] }
  0x1f   : > { %5785 = vmatprep.subr.bf16.mxu1 %v8085_v1  ;;  %v363_v35 = vld [vmem:[%s6284_s8 + $0xa8] sm:$0xf]  ;;  %v366_v43 = vld [vmem:[%s6284_s8 + $0xb4] sm:$0xf]  ;;  %v367_v47 = vld [vmem:[%s6284_s8 + $0xb8] sm:$0xf] }
  0x20   : > { %5274 = vmatpush3.bf16.msra.mxu0 %v5991_v7  ;;  %v368_v48 = vld [vmem:[%s6284_s8 + $0xbc] sm:$0xf]  ;;  %v4359_v51 = vcombine.low %v362_v29, %v363_v35 }
  0x21   : > { %5275 = vmatprep.subr.bf16.mxu0 %v8085_v1 }
  0x22   : > { %5793 = vmatpush3.bf16.msra.mxu1 %v6004_v12 }
  0x23   : > { %5786 = vmatprep.subr.bf16.mxu1 %v8085_v1 }
  0x24   : > { %5276 = vmatpush3.bf16.msra.mxu0 %v5992_v9  ;;  %v355_v9 = vld [vmem:[%s6284_s8 + $0x88] sm:$0xf] }
  0x25   : > { %5277 = vmatprep.subr.bf16.mxu0 %v8085_v1 }
  0x26   : > { %5794 = vmatpush3.bf16.msra.mxu1 %v6005_v16 }
  0x27   : > { %5787 = vmatprep.subr.bf16.mxu1 %v8085_v1 }
  0x28   : > { %5278 = vmatpush3.bf16.msra.mxu0 %v5993_v11 }
  0x29   : > { %5279 = vmatprep.subr.bf16.mxu0 %v8085_v1 }
  0x2a   : > { %5795 = vmatpush3.bf16.msra.mxu1 %v6007_v18 }
  0x2b   : > { %5788 = vmatprep.subr.bf16.mxu1 %v8085_v1 }
  0x2c   : > { %5280 = vmatpush3.bf16.msra.mxu0 %v5994_v13  ;;  %v357_v13 = vld [vmem:[%s6284_s8 + $0x90] sm:$0xf] }
  0x2d   : > { %5389 = vmatprep.subr.bf16.mxu0 %v8085_v1 }
  0x2e   : > { %5796 = vmatpush3.bf16.msra.mxu1 %v6008_v21 }
  0x2f   : > { %5282 = vmatmul.mubr.bf16.vlgmr.msra.gmra.mrb[0].mxu0 %v4340_v17 }
  0x30   : > { %5390 = vmatpush3.bf16.msra.mxu0 %v5996_v4  ;;  %5285 = vmatprep.mubr.msk.bf16.mxu0 %vm6166_vm0, %v8085_v1  ;;  %v4351_v4 = vcombine.low %v346_v52, %v347_v56  ;;  %v369_v52 = vld [vmem:[%s6284_s8 + $0xc0] sm:$0xf] }
  0x31   : > { %5391 = vmatprep.subr.bf16.mxu0 %v8085_v1  ;;  %5430 = vmatmul.mubr.bf16.vlgmr.msra.gmra.mrb[0].mxu1 %v6325_v25 }
  0x32   : > { %5433 = vmatprep.mubr.msk.bf16.mxu1 %vm6166_vm0, %v8085_v1 }
  0x34   : > { %5392 = vmatpush3.bf16.msra.mxu0 %v5999_v6  ;;  %v354_v6 = vld [vmem:[%s6284_s8 + $0x84] sm:$0xf] }
  0x35   : > { %5393 = vmatprep.subr.bf16.mxu0 %v8085_v1  ;;  %v6442_v7 = vcombine.low %v353_v5, %v354_v6 }
  0x37   : > { %5286 = vmatmul.mubr.bf16.gmra.mrb[4].mxu0 %v4341_v24  ;;  %v4355_v24 = vcombine.low %v354_v6, %v355_v9  ;;  %v6546_v6 = vld [vmem:[%s6284_s8 + $0xd8] sm:$0xf] }
  0x38   : > { %5289 = vmatprep.mubr.msk.bf16.mxu0 %vm6166_vm0, %v8085_v1  ;;  %5394 = vmatpush3.bf16.msra.mxu0 %v6001_v8  ;;  %v4352_v8 = vcombine.low %v348_v57, %v349_v60  ;;  %v371_v57 = vld [vmem:[%s6284_s8 + $0xc8] sm:$0xf] }
  0x39   : > { %5395 = vmatprep.subr.bf16.mxu0 %v8085_v1  ;;  %5434 = vmatmul.mubr.bf16.gmra.mrb[4].mxu1 %v6344_v31 }
  0x3a   : > { %5437 = vmatprep.mubr.msk.bf16.mxu1 %vm6166_vm0, %v8085_v1 }
  0x3c   : > { %5396 = vmatpush3.bf16.msra.mxu0 %v6002_v10  ;;  %v356_v10 = vld [vmem:[%s6284_s8 + $0x8c] sm:$0xf] }
  0x3d   : > { %5397 = vmatprep.subr.bf16.mxu0 %v8085_v1  ;;  %v6451_v11 = vcombine.low %v355_v9, %v356_v10  ;;  %v4356_v34 = vcombine.low %v356_v10, %v357_v13  ;;  %v6553_v9 = vld [vmem:[%s6284_s8 + $0xdc] sm:$0xf]  ;;  %v6556_v10 = vld [vmem:[%s6284_s8 + $0xe0] sm:$0xf] }
  0x3f   : > { %5290 = vmatmul.mubr.bf16.gmra.mrb[8].mxu0 %v4342_v30  ;;  %v6478_v30 = vcombine.low %v361_v28, %v362_v29  ;;  %v323_v29 = vld [vmem:[%s6284_s8 + $0x8] sm:$0xf] }
  0x40   : > { %5293 = vmatprep.mubr.msk.bf16.mxu0 %vm6166_vm0, %v8085_v1  ;;  %5398 = vmatpush3.bf16.msra.mxu0 %v6004_v12  ;;  %v4353_v12 = vcombine.low %v350_v61, %v351_v0  ;;  %v4361_v61 = vcombine.low %v366_v43, %v367_v47 }
  0x41   : > { %5399 = vmatprep.subr.bf16.mxu0 %v8085_v1  ;;  %5438 = vmatmul.mubr.bf16.gmra.mrb[8].mxu1 %v6363_v37 }
  0x42   : > { %5441 = vmatprep.mubr.msk.bf16.mxu1 %vm6166_vm0, %v8085_v1 }
  0x44   : > { %5400 = vmatpush3.bf16.msra.mxu0 %v6005_v16  ;;  %v358_v16 = vld [vmem:[%s6284_s8 + $0x94] sm:$0xf] }
  0x45   : > { %5401 = vmatprep.subr.bf16.mxu0 %v8085_v1  ;;  %v6460_v17 = vcombine.low %v357_v13, %v358_v16 }
  0x47   : > { %5294 = vmatmul.mubr.bf16.gmra.mrb[12].mxu0 %v4343_v36  ;;  %v364_v36 = vld [vmem:[%s6284_s8 + $0xac] sm:$0xf] }
  0x48   : > { %5297 = vmatprep.mubr.msk.bf16.mxu0 %vm6166_vm0, %v8085_v1  ;;  %5402 = vmatpush3.bf16.msra.mxu0 %v6007_v18  ;;  %v4354_v18 = vcombine.low %v352_v2, %v353_v5  ;;  %v6487_v39 = vcombine.low %v363_v35, %v364_v36  ;;  %v6537_v2 = vld [vmem:[%s6284_s8 + $0xd0] sm:$0xf]  ;;  %v6543_v5 = vld [vmem:[%s6284_s8 + $0xd4] sm:$0xf] }
  0x49   : > { %5403 = vmatprep.subr.bf16.mxu0 %v8085_v1  ;;  %5442 = vmatmul.mubr.bf16.gmra.mrb[12].mxu1 %v6378_v42 }
  0x4a   : > { %5445 = vmatprep.mubr.msk.bf16.mxu1 %vm6166_vm0, %v8085_v1 }
  0x4c   : > { %5404 = vmatpush3.bf16.msra.mxu0 %v6008_v21  ;;  %v359_v21 = vld [vmem:[%s6284_s8 + $0x98] sm:$0xf] }
  0x4d   : > { %5513 = vmatprep.subr.bf16.mxu0 %v8085_v1  ;;  %v6469_v23 = vcombine.low %v359_v21, %v360_v22  ;;  %v4357_v40 = vcombine.low %v358_v16, %v359_v21 }
  0x4f   : > { %5298 = vmatmul.mubr.bf16.gmra.mrb[16].mxu0 %v4344_v41  ;;  %v365_v41 = vld [vmem:[%s6284_s8 + $0xb0] sm:$0xf] }
  0x50   : > { %5301 = vmatprep.mubr.msk.bf16.mxu0 %vm6166_vm0, %v8085_v1  ;;  %v6496_v44 = vcombine.low %v365_v41, %v366_v43  ;;  %v4360_v56 = vcombine.low %v364_v36, %v365_v41  ;;  %v4376_v36 = vcombine.low %v323_v29, %v6291_v14  ;;  %v6054_v43 = vld [vmem:[%s8080_s2 + $0x90] sm:$0xff]   ;;  %v6056_v14 = vld [vmem:[%s8080_s2 + $0x98] sm:$0xff]  }
  0x51   : > { %5446 = vmatmul.mubr.bf16.gmra.mrb[16].mxu1 %v6388_v46 }
  0x52   : > { %5449 = vmatprep.mubr.msk.bf16.mxu1 %vm6166_vm0, %v8085_v1 }
  0x57   : > { %5302 = vmatmul.mubr.bf16.gmra.mrb[20].mxu0 %v4345_v45  ;;  %v4358_v45 = vcombine.low %v360_v22, %v361_v28  ;;  %v6051_v22 = vld [vmem:[%s8080_s2 + $0x80] sm:$0xff]   ;;  %v6052_v28 = vld [vmem:[%s8080_s2 + $0x88] sm:$0xff]  }
  0x58   : > { %5305 = vmatprep.mubr.msk.bf16.mxu0 %vm6166_vm0, %v8085_v1 }
  0x59   : > { %5450 = vmatmul.mubr.bf16.gmra.mrb[20].mxu1 %v6397_v50 }
  0x5a   : > { %5453 = vmatprep.mubr.msk.bf16.mxu1 %vm6166_vm0, %v8085_v1 }
  0x5f   : > { %5306 = vmatmul.mubr.bf16.gmra.mrb[24].mxu0 %v4346_v49  ;;  %v6505_v49 = vcombine.low %v367_v47, %v368_v48 }
  0x60   : > { %5309 = vmatprep.mubr.msk.bf16.mxu0 %vm6166_vm0, %v8085_v1 }
  0x61   : > { %5454 = vmatmul.mubr.bf16.gmra.mrb[24].mxu1 %v6406_v54 }
  0x62   : > { %5457 = vmatprep.mubr.msk.bf16.mxu1 %vm6166_vm0, %v8085_v1 }
  0x67   : > { %5310 = vmatmul.mubr.bf16.gmra.mrb[28].mxu0 %v4347_v53  ;;  %v370_v53 = vld [vmem:[%s6284_s8 + $0xc4] sm:$0xf] }
  0x68   : > { %5313 = vmatprep.mubr.msk.bf16.mxu0 %vm6166_vm0, %v8085_v1  ;;  %v4363_v0 = vcombine.low %v370_v53, %v371_v57 }
  0x69   : > { %5458 = vmatmul.mubr.bf16.gmra.mrb[28].mxu1 %v6415_v58 }
  0x6a   : > { %5461 = vmatprep.mubr.msk.bf16.mxu1 %vm6166_vm0, %v8085_v1 }
  0x6f   : > { %5314 = vmatmul.mubr.bf16.gmra.mrb[32].mxu0 %v4348_v55  ;;  %v6514_v55 = vcombine.low %v369_v52, %v370_v53 }
  0x70   : > { %5317 = vmatprep.mubr.msk.bf16.mxu0 %vm6166_vm0, %v8085_v1 }
  0x71   : > { %5462 = vmatmul.mubr.bf16.gmra.mrb[32].mxu1 %v6424_v62 }
  0x72   : > { %5465 = vmatprep.mubr.msk.bf16.mxu1 %vm6166_vm0, %v8085_v1 }
  0x77   : > { %5318 = vmatmul.mubr.bf16.gmra.mrb[36].mxu0 %v4349_v59  ;;  %v372_v59 = vld [vmem:[%s6284_s8 + $0xcc] sm:$0xf] }
  0x78   : > { %5321 = vmatprep.mubr.msk.bf16.mxu0 %vm6166_vm0, %v8085_v1  ;;  %v6523_v60 = vcombine.low %v371_v57, %v372_v59 }
  0x79   : > { %5466 = vmatmul.mubr.bf16.gmra.mrb[36].mxu1 %v6433_v3 }
  0x7a   : > { %5469 = vmatprep.mubr.msk.bf16.mxu1 %vm6166_vm0, %v8085_v1 }
  0x7f   : > { %5322 = vmatmul.mubr.bf16.gmra.mrb[40].mxu0 %v4350_v63  ;;  %v4362_v63 = vcombine.low %v368_v48, %v369_v52 }
  0x80   : > { %5325 = vmatprep.mubr.msk.bf16.mxu0 %vm6166_vm0, %v8085_v1 }
  0x81   : > { %5470 = vmatmul.mubr.bf16.gmra.mrb[40].mxu1 %v6442_v7 }
  0x82   : > { %5473 = vmatprep.mubr.msk.bf16.mxu1 %vm6166_vm0, %v8085_v1 }
  0x87   : > { %5326 = vmatmul.mubr.bf16.gmra.mrb[44].mxu0 %v4351_v4  ;;  %v4364_v4 = vcombine.low %v372_v59, %v6537_v2 }
  0x88   : > { %5329 = vmatprep.mubr.msk.bf16.mxu0 %vm6166_vm0, %v8085_v1 }
  0x89   : > { %5474 = vmatmul.mubr.bf16.gmra.mrb[44].mxu1 %v6451_v11 }
  0x8a   : > { %5477 = vmatprep.mubr.msk.bf16.mxu1 %vm6166_vm0, %v8085_v1 }
  0x8f   : > { %5330 = vmatmul.mubr.bf16.gmra.mrb[48].mxu0 %v4352_v8  ;;  %v4365_v8 = vcombine.low %v6543_v5, %v6546_v6 }
  0x90   : > { %5333 = vmatprep.mubr.msk.bf16.mxu0 %vm6166_vm0, %v8085_v1 }
  0x91   : > { %5478 = vmatmul.mubr.bf16.gmra.mrb[48].mxu1 %v6460_v17 }
  0x92   : > { %5481 = vmatprep.mubr.msk.bf16.mxu1 %vm6166_vm0, %v8085_v1 }
  0x97   : > { %5334 = vmatmul.mubr.bf16.gmra.mrb[52].mxu0 %v4353_v12  ;;  %v4366_v12 = vcombine.low %v6553_v9, %v6556_v10 }
  0x98   : > { %5337 = vmatprep.mubr.msk.bf16.mxu0 %vm6166_vm0, %v8085_v1 }
  0x99   : > { %5482 = vmatmul.mubr.bf16.gmra.mrb[52].mxu1 %v6469_v23 }
  0x9a   : > { %5485 = vmatprep.mubr.msk.bf16.mxu1 %vm6166_vm0, %v8085_v1 }
  0x9f   : > { %5338 = vmatmul.mubr.bf16.gmra.mrb[56].mxu0 %v4354_v18  ;;  %v6050_v18 = vld [vmem:[%s6284_s8] sm:$0xff]  }
  0xa0   : > { %5341 = vmatprep.mubr.msk.bf16.mxu0 %vm6166_vm0, %v8085_v1 }
  0xa1   : > { %5486 = vmatmul.mubr.bf16.gmra.mrb[56].mxu1 %v6478_v30 }
  0xa2   : > { %5489 = vmatprep.mubr.msk.bf16.mxu1 %vm6166_vm0, %v8085_v1 }
  0xa7   : > { %5342 = vmatmul.mubr.bf16.gmra.mrb[60].mxu0 %v4355_v24 }
  0xa8   : > { %5345 = vmatprep.mubr.msk.bf16.mxu0 %vm6166_vm0, %v8085_v1 }
  0xa9   : > { %5490 = vmatmul.mubr.bf16.gmra.mrb[60].mxu1 %v6487_v39 }
  0xaa   : > { %5493 = vmatprep.mubr.msk.bf16.mxu1 %vm6166_vm0, %v8085_v1 }
  0xaf   : > { %5346 = vmatmul.mubr.bf16.gmra.mrb[64].mxu0 %v4356_v34 }
  0xb0   : > { %5349 = vmatprep.mubr.msk.bf16.mxu0 %vm6166_vm0, %v8085_v1 }
  0xb1   : > { %5494 = vmatmul.mubr.bf16.gmra.mrb[64].mxu1 %v6496_v44 }
  0xb2   : > { %5497 = vmatprep.mubr.msk.bf16.mxu1 %vm6166_vm0, %v8085_v1 }
  0xb7   : > { %5350 = vmatmul.mubr.bf16.gmra.mrb[68].mxu0 %v4357_v40 }
  0xb8   : > { %5353 = vmatprep.mubr.msk.bf16.mxu0 %vm6166_vm0, %v8085_v1 }
  0xb9   : > { %5498 = vmatmul.mubr.bf16.gmra.mrb[68].mxu1 %v6505_v49 }
  0xba   : > { %5501 = vmatprep.mubr.msk.bf16.mxu1 %vm6166_vm0, %v8085_v1 }
  0xbf   : > { %5354 = vmatmul.mubr.bf16.gmra.mrb[72].mxu0 %v4358_v45 }
  0xc0   : > { %5357 = vmatprep.mubr.msk.bf16.mxu0 %vm6166_vm0, %v8085_v1 }
  0xc1   : > { %5502 = vmatmul.mubr.bf16.gmra.mrb[72].mxu1 %v6514_v55 }
  0xc2   : > { %5505 = vmatprep.mubr.msk.bf16.mxu1 %vm6166_vm0, %v8085_v1 }
  0xc7   : > { %5358 = vmatmul.mubr.bf16.gmra.mrb[76].mxu0 %v4359_v51 }
  0xc8   : > { %5361 = vmatprep.mubr.msk.bf16.mxu0 %vm6166_vm0, %v8085_v1 }
  0xc9   : > { %5506 = vmatmul.mubr.bf16.gmra.mrb[76].mxu1 %v6523_v60 }
  0xca   : > { %5509 = vmatprep.mubr.msk.bf16.mxu1 %vm6166_vm0, %v8085_v1 }
  0xcf   : > { %5362 = vmatmul.mubr.bf16.gmra.mrb[80].mxu0 %v4360_v56  ;;  %v4377_v56 = vcombine.low %v6294_v15, %v6309_v19  ;;  %v6059_v15 = vld [vmem:[%s8080_s2 + $0xa8] sm:$0xff]  }
  0xd0   : > { %5365 = vmatprep.mubr.msk.bf16.mxu0 %vm6166_vm0, %v8085_v1 }
  0xd7   : > { %5366 = vmatmul.mubr.bf16.gmra.mrb[84].mxu0 %v4361_v61  ;;  %v6058_v61 = vld [vmem:[%s8080_s2 + $0xa0] sm:$0xff]  }
  0xd8   : > { %5369 = vmatprep.mubr.msk.bf16.mxu0 %vm6166_vm0, %v8085_v1 }
  0xdf   : > { %5370 = vmatmul.mubr.bf16.gmra.mrb[88].mxu0 %v4362_v63 }
  0xe0   : > { %5373 = vmatprep.mubr.msk.bf16.mxu0 %vm6166_vm0, %v8085_v1 }
  0xe7   : > { %5374 = vmatmul.mubr.bf16.gmra.mrb[92].mxu0 %v4363_v0 }
  0xe8   : > { %5377 = vmatprep.mubr.msk.bf16.mxu0 %vm6166_vm0, %v8085_v1 }
  0xef   : > { %5378 = vmatmul.mubr.bf16.gmra.mrb[96].mxu0 %v4364_v4 }
  0xf0   : > { %5381 = vmatprep.mubr.msk.bf16.mxu0 %vm6166_vm0, %v8085_v1 }
  0xf7   : > { %5382 = vmatmul.mubr.bf16.gmra.mrb[100].mxu0 %v4365_v8 }
  0xf8   : > { %5385 = vmatprep.mubr.msk.bf16.mxu0 %vm6166_vm0, %v8085_v1 }
  0xff   : > { %5386 = vmatmul.mubr.bf16.gmra.mrb[104].mxu0 %v4366_v12 }
 0x100   : > { %5405 = vmatprep.mubr.msk.bf16.mxu0 %vm6166_vm0, %v8085_v1 }
 0x102   : > { %v658_v13 = vpop.f32.mrb[0].mxu0 }
 0x103   : > { %v5283_v16 = vpop.f32.mrb[1].mxu0  ;;  %v4378_v13 = vcombine.low %v6314_v20, %v6331_v26  ;;  %v6063_v20 = vld [vmem:[%s8080_s2 + $0xb8] sm:$0xff]  }
 0x104   : > { %v661_v21 = vpop.f32.mrb[2].mxu0  ;;  %v6574_v40 = vpop.f32.mrb[0].mxu1 }
 0x105   : > { %v5284_v24 = vpop.f32.mrb[3].mxu0  ;;  %v5431_v45 = vpop.f32.mrb[1].mxu1  ;;  %v6061_v21 = vld [vmem:[%s8080_s2 + $0xb0] sm:$0xff]  }
 0x106   : > { %v6582_v48 = vpop.f32.mrb[2].mxu1 }
 0x107   : > { %5406 = vmatmul.mubr.bf16.vlgmr.msra.gmra.mrb[108].mxu0 %v6050_v18  ;;  %v5432_v51 = vpop.f32.mrb[3].mxu1 }
 0x108   : > { %5514 = vmatpush3.bf16.msra.mxu0 %v6051_v22  ;;  %5409 = vmatprep.mubr.msk.bf16.mxu0 %vm6166_vm0, %v8085_v1 }
 0x109   : > { %5515 = vmatprep.subr.bf16.mxu0 %v8085_v1 }
 0x10a   : > { %v666_v34 = vpop.f32.mrb[4].mxu0 }
 0x10b   : > { %v5287_v35 = vpop.f32.mrb[5].mxu0 }
 0x10c   : > { %v6576_v41 = vpop.f32.mrb[6].mxu0  ;;  %5516 = vmatpush3.bf16.msra.mxu0 %v6052_v28  ;;  %v6594_v57 = vpop.f32.mrb[4].mxu1  ;;  %v4379_v35 = vcombine.low %v6334_v27, %v6350_v32 }
 0x10d   : > { %v5288_v47 = vpop.f32.mrb[7].mxu0  ;;  %5517 = vmatprep.subr.bf16.mxu0 %v8085_v1  ;;  %v5435_v63 = vpop.f32.mrb[5].mxu1 }
 0x10e   : > { %v6602_v4 = vpop.f32.mrb[6].mxu1 }
 0x10f   : > { %5410 = vmatmul.mubr.bf16.gmra.mrb[112].mxu0 %v4376_v36  ;;  %v5436_v8 = vpop.f32.mrb[7].mxu1 }
 0x110   : > { %5518 = vmatpush3.bf16.msra.mxu0 %v6054_v43  ;;  %5413 = vmatprep.mubr.msk.bf16.mxu0 %vm6166_vm0, %v8085_v1 }
 0x111   : > { %5519 = vmatprep.subr.bf16.mxu0 %v8085_v1 }
 0x112   : > { %v6590_v52 = vpop.f32.mrb[8].mxu0 }
 0x113   : > { %v5291_v53 = vpop.f32.mrb[9].mxu0 }
 0x114   : > { %v6596_v59 = vpop.f32.mrb[10].mxu0  ;;  %5520 = vmatpush3.bf16.msra.mxu0 %v6056_v14  ;;  %v1079_v16 = vpop.f32.mrb[8].mxu1 }
 0x115   : > { %v5292_v0 = vpop.f32.mrb[11].mxu0  ;;  %5521 = vmatprep.subr.bf16.mxu0 %v8085_v1  ;;  %v5439_v22 = vpop.f32.mrb[9].mxu1 }
 0x116   : > { %v1082_v28 = vpop.f32.mrb[10].mxu1 }
 0x117   : > { %5414 = vmatmul.mubr.bf16.gmra.mrb[116].mxu0 %v4377_v56  ;;  %v5440_v29 = vpop.f32.mrb[11].mxu1 }
 0x118   : > { %5417 = vmatprep.mubr.msk.bf16.mxu0 %vm6166_vm0, %v8085_v1  ;;  %5522 = vmatpush3.bf16.msra.mxu0 %v6058_v61  ;;  %v4380_v61 = vcombine.low %v6353_v33, %v6369_v38 }
 0x119   : > { %5523 = vmatprep.subr.bf16.mxu0 %v8085_v1 }
 0x11a   : > { %v6610_v19 = vpop.f32.mrb[12].mxu0 }
 0x11b   : > { %v5295_v12 = vpop.f32.mrb[13].mxu0 }
 0x11c   : > { %v6614_v18 = vpop.f32.mrb[14].mxu0  ;;  %5524 = vmatpush3.bf16.msra.mxu0 %v6059_v15  ;;  %v1087_v36 = vpop.f32.mrb[12].mxu1 }
 0x11d   : > { %v5296_v24 = vpop.f32.mrb[15].mxu0  ;;  %5525 = vmatprep.subr.bf16.mxu0 %v8085_v1  ;;  %v5443_v45 = vpop.f32.mrb[13].mxu1 }
 0x11e   : > { %v1090_v51 = vpop.f32.mrb[14].mxu1 }
 0x11f   : > { %5418 = vmatmul.mubr.bf16.gmra.mrb[120].mxu0 %v4378_v13  ;;  %v5444_v14 = vpop.f32.mrb[15].mxu1 }
 0x120   : > { %5421 = vmatprep.mubr.msk.bf16.mxu0 %vm6166_vm0, %v8085_v1  ;;  %5526 = vmatpush3.bf16.msra.mxu0 %v6061_v21 }
 0x121   : > { %5527 = vmatprep.subr.bf16.mxu0 %v8085_v1 }
 0x122   : > { %v6626_v26 = vpop.f32.mrb[16].mxu0 }
 0x123   : > { %v5299_v34 = vpop.f32.mrb[17].mxu0 }
 0x124   : > { %v6630_v43 = vpop.f32.mrb[18].mxu0  ;;  %5528 = vmatpush3.bf16.msra.mxu0 %v6063_v20  ;;  %v1095_v63 = vpop.f32.mrb[16].mxu1 }
 0x125   : > { %v5300_v47 = vpop.f32.mrb[19].mxu0  ;;  %v5447_v32 = vpop.f32.mrb[17].mxu1 }
 0x126   : > { %v1098_v8 = vpop.f32.mrb[18].mxu1 }
 0x127   : > { %5422 = vmatmul.mubr.bf16.gmra.mrb[124].mxu0 %v4379_v35  ;;  %v5448_v15 = vpop.f32.mrb[19].mxu1 }
 0x128   : > { %5425 = vmatprep.mubr.msk.bf16.mxu0 %vm6166_vm0, %v8085_v1 }
 0x12a   : > { %v6634_v53 = vpop.f32.mrb[20].mxu0 }
 0x12b   : > { %v5303_v56 = vpop.f32.mrb[21].mxu0 }
 0x12c   : > { %v6638_v27 = vpop.f32.mrb[22].mxu0  ;;  %v6645_v24 = vpop.f32.mrb[20].mxu1 }
 0x12d   : > { %v5304_v0 = vpop.f32.mrb[23].mxu0  ;;  %v5451_v33 = vpop.f32.mrb[21].mxu1 }
 0x12e   : > { %v6650_v34 = vpop.f32.mrb[22].mxu1 }
 0x12f   : > { %5426 = vmatmul.mubr.bf16.gmra.mrb[128].mxu0 %v4380_v61  ;;  %v5452_v45 = vpop.f32.mrb[23].mxu1 }
 0x130   : > { %5529 = vmatprep.mubr.msk.bf16.mxu0 %vm6166_vm0, %v8085_v1 }
 0x132   : > { %v706_v12 = vpop.f32.mrb[24].mxu0 }
 0x133   : > { %v6643_v21 = vadd.f32 %v6574_v40, %v706_v12  ;;  %v5307_v22 = vpop.f32.mrb[25].mxu0 }
 0x134   : > { %v709_v29 = vpop.f32.mrb[26].mxu0  ;;  %v6657_v56 = vpop.f32.mrb[24].mxu1 }
 0x135   : > { %v6648_v38 = vadd.f32 %v6582_v48, %v709_v29  ;;  %v5308_v20 = vpop.f32.mrb[27].mxu0  ;;  %v5455_v0 = vpop.f32.mrb[25].mxu1 }
 0x136   : > { %v6662_v12 = vpop.f32.mrb[26].mxu1  ;;  %v6064_v20 = vld [vmem:[%s8082_s4 + $0x100] sm:$0xff]  }
 0x137   : > { %5530 = vmatmul.mubr.bf16.vlgmr.msra.gmra.mrb[132].mxu0 %v4378_v13  ;;  %v5456_v22 = vpop.f32.mrb[27].mxu1  ;;  %4857 = vmatprep.subr.bf16.mxu1 %v6064_v20 }
 0x138   : > { %5533 = vmatprep.mubr.msk.bf16.mxu0 %vm6166_vm0, %v8085_v1 }
 0x13a   : > { %v714_v47 = vpop.f32.mrb[28].mxu0 }
 0x13b   : > { %v6655_v40 = vadd.f32 %v6594_v57, %v714_v47  ;;  %v5311_v14 = vpop.f32.mrb[29].mxu0 }
 0x13c   : > { %v717_v32 = vpop.f32.mrb[30].mxu0  ;;  %v6668_v33 = vpop.f32.mrb[28].mxu1 }
 0x13d   : > { %v6660_v48 = vadd.f32 %v6602_v4, %v717_v32  ;;  %v5312_v15 = vpop.f32.mrb[31].mxu0  ;;  %v6065_v4 = vld [vmem:[%s8082_s4 + $0xc0] sm:$0xff]   ;;  %v5459_v47 = vpop.f32.mrb[29].mxu1 }
 0x13e   : > { %v6678_v32 = vpop.f32.mrb[30].mxu1  ;;  %4858 = vmatpush3.bf16.msra.mxu1 %v6065_v4 }
 0x13f   : > { %5534 = vmatmul.mubr.bf16.gmra.mrb[136].mxu0 %v4379_v35 }
 0x140   : > { %5537 = vmatprep.mubr.msk.bf16.mxu0 %vm6166_vm0, %v8085_v1 }
 0x142   : > { %v722_v13 = vpop.f32.mrb[32].mxu0 }
 0x143   : > { %v6666_v29 = vadd.f32 %v1079_v16, %v722_v13  ;;  %v5315_v57 = vpop.f32.mrb[33].mxu0  ;;  %v5460_v16 = vpop.f32.mrb[31].mxu1 }
 0x144   : > { %v725_v45 = vpop.f32.mrb[34].mxu0  ;;  %v6684_v13 = vpop.f32.mrb[32].mxu1 }
 0x145   : > { %v6676_v35 = vadd.f32 %v1082_v28, %v725_v45  ;;  %v5316_v14 = vpop.f32.mrb[35].mxu0  ;;  %v5463_v47 = vpop.f32.mrb[33].mxu1 }
 0x146   : > { %v6688_v14 = vpop.f32.mrb[34].mxu1 }
 0x147   : > { %5538 = vmatmul.mubr.bf16.gmra.mrb[140].mxu0 %v4380_v61  ;;  %v5464_v20 = vpop.f32.mrb[35].mxu1 }
 0x148   : > { %5541 = vmatprep.mubr.msk.bf16.mxu0 %vm6166_vm0, %v8085_v1 }
 0x14a   : > { %v730_v0 = vpop.f32.mrb[36].mxu0 }
 0x14b   : > { %v6682_v15 = vadd.f32 %v1087_v36, %v730_v0  ;;  %v5319_v22 = vpop.f32.mrb[37].mxu0 }
 0x14c   : > { %v733_v57 = vpop.f32.mrb[38].mxu0  ;;  %v6695_v16 = vpop.f32.mrb[36].mxu1 }
 0x14d   : > { %v6686_v28 = vadd.f32 %v1090_v51, %v733_v57  ;;  %v5320_v45 = vpop.f32.mrb[39].mxu0  ;;  %v5467_v22 = vpop.f32.mrb[37].mxu1 }
 0x14e   : > { %v6699_v57 = vpop.f32.mrb[38].mxu1 }
 0x14f   : > { %5542 = vmatmul.mubr.bf16.gmra.mrb[144].mxu0 %v6325_v25  ;;  %v5468_v45 = vpop.f32.mrb[39].mxu1  ;;  %v6066_v25 = vld [vmem:[%s8082_s4 + $0x108] sm:$0xff]  }
 0x150   : > { %5545 = vmatprep.mubr.msk.bf16.mxu0 %vm6166_vm0, %v8085_v1  ;;  %4859 = vmatprep.subr.bf16.mxu1 %v6066_v25 }
 0x152   : > { %v738_v61 = vpop.f32.mrb[40].mxu0 }
 0x153   : > { %v6693_v4 = vadd.f32 %v1095_v63, %v738_v61  ;;  %v5323_v36 = vpop.f32.mrb[41].mxu0  ;;  %v6067_v63 = vld [vmem:[%s8082_s4 + $0xc8] sm:$0xff]  }
 0x154   : > { %v741_v0 = vpop.f32.mrb[42].mxu0  ;;  %4860 = vmatpush3.bf16.msra.mxu1 %v6067_v63  ;;  %v6713_v36 = vpop.f32.mrb[40].mxu1 }
 0x155   : > { %v6697_v47 = vadd.f32 %v1098_v8, %v741_v0  ;;  %v5324_v51 = vpop.f32.mrb[43].mxu0  ;;  %v5471_v0 = vpop.f32.mrb[41].mxu1 }
 0x156   : > { %v6718_v45 = vpop.f32.mrb[42].mxu1 }
 0x157   : > { %8097 = vst [vmem:[#allocation2_spill] sm:$0xff] %v6697_v47  ;;  %5546 = vmatmul.mubr.bf16.gmra.mrb[148].mxu0 %v6344_v31  ;;  %v5472_v47 = vpop.f32.mrb[43].mxu1 }
 0x158   : > { %5549 = vmatprep.mubr.msk.bf16.mxu0 %vm6166_vm0, %v8085_v1 }
 0x15a   : > { %v746_v8 = vpop.f32.mrb[44].mxu0 }
 0x15b   : > { %v6711_v20 = vadd.f32 %v6645_v24, %v746_v8  ;;  %v5327_v61 = vpop.f32.mrb[45].mxu0 }
 0x15c   : > { %v749_v31 = vpop.f32.mrb[46].mxu0  ;;  %v6726_v8 = vpop.f32.mrb[44].mxu1 }
 0x15d   : > { %v6716_v22 = vadd.f32 %v6650_v34, %v749_v31  ;;  %v5328_v51 = vpop.f32.mrb[47].mxu0  ;;  %v5475_v0 = vpop.f32.mrb[45].mxu1 }
 0x15e   : > { %v6731_v51 = vpop.f32.mrb[46].mxu1 }
 0x15f   : > { %5550 = vmatmul.mubr.bf16.gmra.mrb[152].mxu0 %v6363_v37  ;;  %v5476_v47 = vpop.f32.mrb[47].mxu1 }
 0x160   : > { %5553 = vmatprep.mubr.msk.bf16.mxu0 %vm6166_vm0, %v8085_v1 }
 0x162   : > { %v754_v25 = vpop.f32.mrb[48].mxu0 }
 0x163   : > { %v6724_v24 = vadd.f32 %v6657_v56, %v754_v25  ;;  %v5331_v63 = vpop.f32.mrb[49].mxu0 }
 0x164   : > { %v757_v61 = vpop.f32.mrb[50].mxu0  ;;  %v6739_v63 = vpop.f32.mrb[48].mxu1 }
 0x165   : > { %8098 = vst [vmem:[#allocation3_spill] sm:$0xff] %v6724_v24  ;;  %v6729_v34 = vadd.f32 %v6662_v12, %v757_v61  ;;  %v5332_v31 = vpop.f32.mrb[51].mxu0  ;;  %v5479_v24 = vpop.f32.mrb[49].mxu1 }
 0x166   : > { %v6744_v31 = vpop.f32.mrb[50].mxu1  ;;  %v6755_v24 = vcombine.low %v6537_v2, %v6543_v5 }
 0x167   : > { %5554 = vmatmul.mubr.bf16.gmra.mrb[156].mxu0 %v6378_v42  ;;  %v6068_v42 = vld [vmem:[%s8082_s4 + $0x110] sm:$0xff]   ;;  %v5480_v47 = vpop.f32.mrb[51].mxu1 }
 0x168   : > { %5557 = vmatprep.mubr.msk.bf16.mxu0 %vm6166_vm0, %v8085_v1  ;;  %4861 = vmatprep.subr.bf16.mxu1 %v6068_v42 }
 0x169   : > { %5510 = vmatmul.mubr.bf16.gmra.mrb[80].mxu1 %v6755_v24 }
 0x16a   : > { %v762_v37 = vpop.f32.mrb[52].mxu0 }
 0x16b   : > { %v6737_v56 = vadd.f32 %v6668_v33, %v762_v37  ;;  %v5335_v25 = vpop.f32.mrb[53].mxu0  ;;  %v6069_v33 = vld [vmem:[%s8082_s4 + $0xd0] sm:$0xff]  }
 0x16c   : > { %v765_v0 = vpop.f32.mrb[54].mxu0  ;;  %4862 = vmatpush3.bf16.msra.mxu1 %v6069_v33 }
 0x16d   : > { %v6742_v12 = vadd.f32 %v6678_v32, %v765_v0  ;;  %v5336_v61 = vpop.f32.mrb[55].mxu0  ;;  %v6763_v0 = vpop.f32.mrb[52].mxu1 }
 0x16f   : > { %5558 = vmatmul.mubr.bf16.gmra.mrb[160].mxu0 %v6388_v46  ;;  %v5483_v46 = vpop.f32.mrb[53].mxu1 }
 0x170   : > { %5561 = vmatprep.mubr.msk.bf16.mxu0 %vm6166_vm0, %v8085_v1  ;;  %v6768_v5 = vpop.f32.mrb[54].mxu1 }
 0x171   : > { %v5484_v47 = vpop.f32.mrb[55].mxu1 }
 0x172   : > { %v770_v32 = vpop.f32.mrb[56].mxu0 }
 0x173   : > { %v6761_v37 = vadd.f32 %v6684_v13, %v770_v32  ;;  %v5339_v25 = vpop.f32.mrb[57].mxu0 }
 0x174   : > { %v773_v61 = vpop.f32.mrb[58].mxu0  ;;  %v6776_v25 = vpop.f32.mrb[56].mxu1 }
 0x175   : > { %8099 = vst [vmem:[#allocation4_spill] sm:$0xff] %v6761_v37  ;;  %v6766_v42 = vadd.f32 %v6688_v14, %v773_v61  ;;  %v5340_v2 = vpop.f32.mrb[59].mxu0  ;;  %v5487_v37 = vpop.f32.mrb[57].mxu1 }
 0x176   : > { %v6781_v2 = vpop.f32.mrb[58].mxu1 }
 0x177   : > { %5562 = vmatmul.mubr.bf16.gmra.mrb[164].mxu0 %v6397_v50  ;;  %v5488_v47 = vpop.f32.mrb[59].mxu1  ;;  %v6073_v50 = vld [vmem:[%s8082_s4 + $0x118] sm:$0xff]  }
 0x178   : > { %5565 = vmatprep.mubr.msk.bf16.mxu0 %vm6166_vm0, %v8085_v1  ;;  %4863 = vmatprep.subr.bf16.mxu1 %v6073_v50 }
 0x17a   : > { %v778_v33 = vpop.f32.mrb[60].mxu0 }
 0x17b   : > { %v6774_v13 = vadd.f32 %v6695_v16, %v778_v33  ;;  %v5343_v32 = vpop.f32.mrb[61].mxu0 }
 0x17c   : > { %v781_v46 = vpop.f32.mrb[62].mxu0  ;;  %v6792_v33 = vpop.f32.mrb[60].mxu1  ;;  %v6074_v32 = vld [vmem:[%s8082_s4 + $0xd8] sm:$0xff]  }
 0x17d   : > { %v6779_v14 = vadd.f32 %v6699_v57, %v781_v46  ;;  %v5344_v61 = vpop.f32.mrb[63].mxu0  ;;  %v5491_v46 = vpop.f32.mrb[61].mxu1  ;;  %4864 = vmatpush3.bf16.msra.mxu1 %v6074_v32 }
 0x17f   : > { %8100 = vst [vmem:[#allocation5_spill] sm:$0xff] %v6779_v14  ;;  %5566 = vmatmul.mubr.bf16.gmra.mrb[168].mxu0 %v6406_v54  ;;  %v6800_v14 = vpop.f32.mrb[62].mxu1 }
 0x180   : > { %5569 = vmatprep.mubr.msk.bf16.mxu0 %vm6166_vm0, %v8085_v1  ;;  %v5492_v50 = vpop.f32.mrb[63].mxu1 }
 0x182   : > { %v786_v16 = vpop.f32.mrb[64].mxu0 }
 0x183   : > { %v6790_v37 = vadd.f32 %v6713_v36, %v786_v16  ;;  %v5347_v57 = vpop.f32.mrb[65].mxu0 }
 0x184   : > { %v789_v54 = vpop.f32.mrb[66].mxu0 }
 0x185   : > { %8101 = vst [vmem:[#allocation6_spill] sm:$0xff] %v6790_v37  ;;  %v6798_v61 = vadd.f32 %v6718_v45, %v789_v54  ;;  %v5348_v47 = vpop.f32.mrb[67].mxu0  ;;  %v6808_v37 = vpop.f32.mrb[64].mxu1 }
 0x186   : > { %v5495_v45 = vpop.f32.mrb[65].mxu1 }
 0x187   : > { %5570 = vmatmul.mubr.bf16.gmra.mrb[172].mxu0 %v6415_v58  ;;  %v6813_v32 = vpop.f32.mrb[66].mxu1 }
 0x188   : > { %5573 = vmatprep.mubr.msk.bf16.mxu0 %vm6166_vm0, %v8085_v1  ;;  %v5496_v50 = vpop.f32.mrb[67].mxu1 }
 0x18a   : > { %v794_v36 = vpop.f32.mrb[68].mxu0 }
 0x18b   : > { %v6806_v16 = vadd.f32 %v6726_v8, %v794_v36  ;;  %v5351_v57 = vpop.f32.mrb[69].mxu0 }
 0x18c   : > { %v797_v46 = vpop.f32.mrb[70].mxu0  ;;  %v6821_v57 = vpop.f32.mrb[68].mxu1 }
 0x18d   : > { %8102 = vst [vmem:[#allocation7_spill] sm:$0xff] %v6806_v16  ;;  %v6811_v54 = vadd.f32 %v6731_v51, %v797_v46  ;;  %v5352_v47 = vpop.f32.mrb[71].mxu0  ;;  %v5499_v16 = vpop.f32.mrb[69].mxu1 }
 0x18e   : > { %v6826_v47 = vpop.f32.mrb[70].mxu1 }
 0x18f   : > { %5574 = vmatmul.mubr.bf16.gmra.mrb[176].mxu0 %v6424_v62  ;;  %v5500_v50 = vpop.f32.mrb[71].mxu1  ;;  %v6077_v62 = vld [vmem:[%s8082_s4 + $0x1c0] sm:$0xff]  }
 0x190   : > { %5577 = vmatprep.mubr.msk.bf16.mxu0 %vm6166_vm0, %v8085_v1  ;;  %5129 = vmatprep.subr.bf16.mxu0 %v6077_v62 }
 0x192   : > { %v802_v58 = vpop.f32.mrb[72].mxu0 }
 0x193   : > { %v6819_v8 = vadd.f32 %v6739_v63, %v802_v58  ;;  %v5355_v36 = vpop.f32.mrb[73].mxu0  ;;  %v6078_v63 = vld [vmem:[%s8082_s4 + $0x180] sm:$0xff]  }
 0x194   : > { %v805_v45 = vpop.f32.mrb[74].mxu0  ;;  %v6843_v36 = vpop.f32.mrb[72].mxu1  ;;  %5130 = vmatpush3.bf16.msra.mxu0 %v6078_v63  ;;  %v6081_v63 = vld [vmem:[%s8082_s4 + $0x128] sm:$0xff]  }
 0x195   : > { %v6824_v51 = vadd.f32 %v6744_v31, %v805_v45  ;;  %v5356_v46 = vpop.f32.mrb[75].mxu0  ;;  %v6075_v31 = vld [vmem:[%s8082_s4 + $0x120] sm:$0xff]   ;;  %v5503_v50 = vpop.f32.mrb[73].mxu1 }
 0x196   : > { %v6076_v45 = vld [vmem:[%s8082_s4 + $0xe0] sm:$0xff]   ;;  %4865 = vmatprep.subr.bf16.mxu1 %v6075_v31  ;;  %v8105_v31 = vmov 0.0  }
 0x197   : > { %5578 = vmatmul.mubr.bf16.gmra.mrb[180].mxu0 %v6433_v3  ;;  %4866 = vmatpush3.bf16.msra.mxu1 %v6076_v45  ;;  %v6083_v45 = vld [vmem:[%s8082_s4 + $0x1d0] sm:$0xff]  }
 0x198   : > { %5581 = vmatprep.mubr.msk.bf16.mxu0 %vm6166_vm0, %v8085_v1  ;;  %v6079_v1 = vld [vmem:[%s8082_s4 + $0x1c8] sm:$0xff]   ;;  %4867 = vmatprep.subr.bf16.mxu1 %v6081_v63 }
 0x199   : > { %5131 = vmatprep.subr.bf16.mxu0 %v6079_v1  ;;  %v6084_v1 = vld [vmem:[%s8082_s4 + $0x190] sm:$0xff]  }
 0x19a   : > { %v810_v16 = vpop.f32.mrb[76].mxu0 }
 0x19b   : > { %v6841_v58 = vadd.f32 %v6763_v0, %v810_v16  ;;  %v5359_v3 = vpop.f32.mrb[77].mxu0  ;;  %v6854_v16 = vpop.f32.mrb[74].mxu1 }
 0x19c   : > { %v813_v46 = vpop.f32.mrb[78].mxu0  ;;  %v6080_v3 = vld [vmem:[%s8082_s4 + $0x188] sm:$0xff]  }
 0x19d   : > { %8103 = vst [vmem:[#allocation8_spill] sm:$0xff] %v6841_v58  ;;  %v6852_v62 = vadd.f32 %v6768_v5, %v813_v46  ;;  %v5360_v0 = vpop.f32.mrb[79].mxu0  ;;  %v5504_v58 = vpop.f32.mrb[75].mxu1  ;;  %v6082_v5 = vld [vmem:[%s8082_s4 + $0xe8] sm:$0xff]   ;;  %5132 = vmatpush3.bf16.msra.mxu0 %v6080_v3  ;;  %v6086_v3 = vld [vmem:[%s8082_s4 + $0xf0] sm:$0xff]  }
 0x19e   : > { %4868 = vmatpush3.bf16.msra.mxu1 %v6082_v5  ;;  %5133 = vmatprep.subr.bf16.mxu0 %v6083_v45  ;;  %v6880_v0 = vpop.f32.mrb[76].mxu1  ;;  %v6087_v5 = vld [vmem:[%s8082_s4 + $0x1d8] sm:$0xff]  }
 0x19f   : > { %8104 = vst [vmem:[#allocation9_spill] sm:$0xff] %v6852_v62  ;;  %5582 = vmatmul.mubr.bf16.gmra.mrb[184].mxu0 %v6442_v7  ;;  %v6085_v7 = vld [vmem:[%s8082_s4 + $0x130] sm:$0xff]   ;;  %v5507_v45 = vpop.f32.mrb[77].mxu1 }
 0x1a0   : > { %5585 = vmatprep.mubr.msk.bf16.mxu0 %vm6166_vm0, %v8105_v31  ;;  %4869 = vmatprep.subr.bf16.mxu1 %v6085_v7 }
 0x1a1   : > { %5134 = vmatpush3.bf16.msra.mxu0 %v6084_v1  ;;  %v6089_v1 = vld [vmem:[%s8082_s4 + $0x138] sm:$0xff]  }
 0x1a2   : > { %v818_v58 = vpop.f32.mrb[80].mxu0  ;;  %4870 = vmatpush3.bf16.msra.mxu1 %v6086_v3  ;;  %5135 = vmatprep.subr.bf16.mxu0 %v6087_v5  ;;  %v6091_v3 = vld [vmem:[%s8082_s4 + $0x1e0] sm:$0xff]  }
 0x1a3   : > { %v6878_v46 = vadd.f32 %v6776_v25, %v818_v58  ;;  %v5363_v50 = vpop.f32.mrb[81].mxu0  ;;  %v6088_v58 = vld [vmem:[%s8082_s4 + $0x198] sm:$0xff]   ;;  %4871 = vmatprep.subr.bf16.mxu1 %v6089_v1 }
 0x1a4   : > { %v821_v63 = vpop.f32.mrb[82].mxu0  ;;  %v1218_v50 = vpop.f32.mrb[78].mxu1 }
 0x1a5   : > { %v6889_v62 = vadd.f32 %v6781_v2, %v821_v63  ;;  %v5364_v25 = vpop.f32.mrb[83].mxu0  ;;  %v5508_v7 = vpop.f32.mrb[79].mxu1  ;;  %v6090_v2 = vld [vmem:[%s8082_s4 + $0xf8] sm:$0xff]   ;;  %5136 = vmatpush3.bf16.msra.mxu0 %v6088_v58  ;;  %v6092_v63 = vld [vmem:[%s8082_s4 + $0x1a0] sm:$0xff]   ;;  %v6093_v58 = vld [vmem:[%s8082_s4 + $0x1e8] sm:$0xff]  }
 0x1a6   : > { %4872 = vmatpush3.bf16.msra.mxu1 %v6090_v2  ;;  %5137 = vmatprep.subr.bf16.mxu0 %v6091_v3  ;;  %v6094_v7 = vld [vmem:[%s8082_s4 + $0x1a8] sm:$0xff]  }
 0x1a7   : > { %5586 = vmatmul.mubr.bf16.gmra.mrb[188].mxu0 %v6451_v11 }
 0x1a8   : > { %5589 = vmatprep.mubr.msk.bf16.mxu0 %vm6166_vm0, %v8105_v31 }
 0x1a9   : > { %5138 = vmatpush3.bf16.msra.mxu0 %v6092_v63 }
 0x1aa   : > { %v826_v5 = vpop.f32.mrb[84].mxu0  ;;  %5139 = vmatprep.subr.bf16.mxu0 %v6093_v58  ;;  %v6099_v58 = vld [vmem:[%s8082_s4 + $0x1b8] sm:$0xff]  }
 0x1ab   : > { %v6910_v11 = vadd.f32 %v6792_v33, %v826_v5  ;;  %v5367_v45 = vpop.f32.mrb[85].mxu0  ;;  %v6096_v33 = vld [vmem:[%s8082_s4 + $0x1f0] sm:$0xff]  }
 0x1ac   : > { %v829_v25 = vpop.f32.mrb[86].mxu0 }
 0x1ad   : > { %v6916_v50 = vadd.f32 %v6800_v14, %v829_v25  ;;  %v5368_v1 = vpop.f32.mrb[87].mxu0  ;;  %5140 = vmatpush3.bf16.msra.mxu0 %v6094_v7  ;;  %v6097_v14 = vld [vmem:[%s8082_s4 + $0x1b0] sm:$0xff]  }
 0x1ae   : > { %5141 = vmatprep.subr.bf16.mxu0 %v6096_v33 }
 0x1af   : > { %5590 = vmatmul.mubr.bf16.gmra.mrb[192].mxu0 %v6460_v17  ;;  %v6098_v17 = vld [vmem:[%s8082_s4 + $0x1f8] sm:$0xff]  }
 0x1b0   : > { %5593 = vmatprep.mubr.msk.bf16.mxu0 %vm6166_vm0, %v8105_v31 }
 0x1b1   : > { %5142 = vmatpush3.bf16.msra.mxu0 %v6097_v14 }
 0x1b2   : > { %v834_v2 = vpop.f32.mrb[88].mxu0  ;;  %5143 = vmatprep.subr.bf16.mxu0 %v6098_v17 }
 0x1b3   : > { %v6931_v3 = vadd.f32 %v6808_v37, %v834_v2  ;;  %v5371_v63 = vpop.f32.mrb[89].mxu0 }
 0x1b4   : > { %v837_v5 = vpop.f32.mrb[90].mxu0 }
 0x1b5   : > { %v6937_v45 = vadd.f32 %v6813_v32, %v837_v5  ;;  %v5372_v25 = vpop.f32.mrb[91].mxu0  ;;  %5144 = vmatpush3.bf16.msra.mxu0 %v6099_v58 }
 0x1b7   : > { %5594 = vmatmul.mubr.bf16.gmra.mrb[196].mxu0 %v6469_v23 }
 0x1b8   : > { %5597 = vmatprep.mubr.msk.bf16.mxu0 %vm6166_vm0, %v8105_v31 }
 0x1ba   : > { %v842_v37 = vpop.f32.mrb[92].mxu0 }
 0x1bb   : > { %v6946_v1 = vadd.f32 %v6821_v57, %v842_v37  ;;  %v5375_v7 = vpop.f32.mrb[93].mxu0 }
 0x1bc   : > { %v845_v33 = vpop.f32.mrb[94].mxu0 }
 0x1bd   : > { %v6949_v32 = vadd.f32 %v6826_v47, %v845_v33  ;;  %v5376_v14 = vpop.f32.mrb[95].mxu0 }
 0x1bf   : > { %5598 = vmatmul.mubr.bf16.gmra.mrb[200].mxu0 %v6478_v30 }
 0x1c0   : > { %5601 = vmatprep.mubr.msk.bf16.mxu0 %vm6166_vm0, %v8105_v31 }
 0x1c2   : > { %v850_v23 = vpop.f32.mrb[96].mxu0 }
 0x1c3   : > { %v6955_v2 = vadd.f32 %v6843_v36, %v850_v23  ;;  %v5379_v63 = vpop.f32.mrb[97].mxu0 }
 0x1c4   : > { %v853_v5 = vpop.f32.mrb[98].mxu0 }
 0x1c5   : > { %v6958_v57 = vadd.f32 %v6854_v16, %v853_v5  ;;  %v5380_v17 = vpop.f32.mrb[99].mxu0 }
 0x1c7   : > { %5602 = vmatmul.mubr.bf16.gmra.mrb[204].mxu0 %v6487_v39 }
 0x1c8   : > { %5605 = vmatprep.mubr.msk.bf16.mxu0 %vm6166_vm0, %v8105_v31 }
 0x1ca   : > { %v858_v47 = vpop.f32.mrb[100].mxu0 }
 0x1cb   : > { %v5383_v30 = vpop.f32.mrb[101].mxu0  ;;  %v6964_v25 = vadd.f32 %v6880_v0, %v858_v47 }
 0x1cc   : > { %v861_v58 = vpop.f32.mrb[102].mxu0 }
 0x1cd   : > { %v5384_v37 = vpop.f32.mrb[103].mxu0 }
 0x1cf   : > { %5606 = vmatmul.mubr.bf16.gmra.mrb[208].mxu0 %v6496_v44 }
 0x1d0   : > { %5609 = vmatprep.mubr.msk.bf16.mxu0 %vm6166_vm0, %v8105_v31 }
 0x1d2   : > { %v866_v36 = vpop.f32.mrb[104].mxu0 }
 0x1d3   : > { %v5387_v16 = vpop.f32.mrb[105].mxu0 }
 0x1d4   : > { %v869_v7 = vpop.f32.mrb[106].mxu0 }
 0x1d5   : > { %v5388_v33 = vpop.f32.mrb[107].mxu0  ;;  %v4426_v7 = vcombine.low %v6546_v6, %v6553_v9 }
 0x1d7   : > { %5610 = vmatmul.mubr.bf16.gmra.mrb[212].mxu0 %v6505_v49 }
 0x1d8   : > { %5613 = vmatprep.mubr.msk.bf16.mxu0 %vm6166_vm0, %v8105_v31 }
 0x1da   : > { %v1015_v39 = vpop.f32.mrb[108].mxu0 }
 0x1db   : > { %v5407_v14 = vpop.f32.mrb[109].mxu0  ;;  %v378_v39 = vld [vmem:[%s6284_s8 + $0xe4] sm:$0xf] }
 0x1dc   : > { %v1018_v0 = vpop.f32.mrb[110].mxu0  ;;  %v4427_v6 = vcombine.low %v6556_v10, %v378_v39 }
 0x1dd   : > { %v5408_v23 = vpop.f32.mrb[111].mxu0 }
 0x1df   : > { %5614 = vmatmul.mubr.bf16.gmra.mrb[216].mxu0 %v6514_v55 }
 0x1e0   : > { %5617 = vmatprep.mubr.msk.bf16.mxu0 %vm6166_vm0, %v8105_v31 }
 0x1e2   : > { %v1023_v44 = vpop.f32.mrb[112].mxu0 }
 0x1e3   : > { %v5411_v63 = vpop.f32.mrb[113].mxu0 }
 0x1e4   : > { %v1026_v5 = vpop.f32.mrb[114].mxu0 }
 0x1e5   : > { %v1027_v17 = vadd.f32 %v1026_v5, %v6576_v41  ;;  %v5412_v47 = vpop.f32.mrb[115].mxu0 }
 0x1e6   : > { %v6095_v47 = vld [vmem:[%s6284_s8 + $0xe8] sm:$0xff]   ;;  %s4750_s8 = sshll.u32 %s8186_s21, 8 }
 0x1e7   : > { %5618 = vmatmul.mubr.bf16.gmra.mrb[220].mxu0 %v6523_v60  ;;  %v6987_v60 = vld [vmem:[%s8082_s4 + $0x140] sm:$0xff]   ;;  %s7929_s7 = scalar_lea.vmem %s8079_s1, %s4750_s8  ;;  %s7950_s12 = scalar_lea.vmem %s8084_s6, %s4750_s8 }
 0x1e8   : > { %5621 = vmatprep.mubr.msk.bf16.mxu0 %vm6166_vm0, %v8105_v31  ;;  %5637 = vmatprep.subr.bf16.mxu1 %v6987_v60 }
 0x1ea   : > { %v1031_v49 = vpop.f32.mrb[116].mxu0 }
 0x1eb   : > { %v1032_v30 = vadd.f32 %v1031_v49, %v6590_v52  ;;  %v5415_v58 = vpop.f32.mrb[117].mxu0 }
 0x1ec   : > { %v1034_v37 = vpop.f32.mrb[118].mxu0 }
 0x1ed   : > { %v1035_v55 = vadd.f32 %v1034_v37, %v6596_v59  ;;  %v5416_v36 = vpop.f32.mrb[119].mxu0 }
 0x1ef   : > { %5622 = vmatmul.mubr.bf16.gmra.mrb[224].mxu0 %v6755_v24 }
 0x1f0   : > { %5625 = vmatprep.mubr.msk.bf16.mxu0 %vm6166_vm0, %v8105_v31 }
 0x1f2   : > { %v1039_v41 = vpop.f32.mrb[120].mxu0 }
 0x1f3   : > { %v1040_v16 = vadd.f32 %v1039_v41, %v6610_v19  ;;  %v5419_v52 = vpop.f32.mrb[121].mxu0  ;;  %v1690_v41 = vlaneseq }
 0x1f4   : > { %v1042_v59 = vpop.f32.mrb[122].mxu0 }
 0x1f5   : > { %v6994_v24 = vadd.f32 %v1042_v59, %v6614_v18  ;;  %v5420_v33 = vpop.f32.mrb[123].mxu0 }
 0x1f6   : > { %v1691_v33 = vshrl.u32 %v1690_v41, 7 }
 0x1f7   : > { %5626 = vmatmul.mubr.bf16.gmra.mrb[228].mxu0 %v4426_v7 }
 0x1f8   : > { %5629 = vmatprep.mubr.msk.bf16.mxu0 %vm6166_vm0, %v8105_v31 }
 0x1fa   : > { %v1047_v14 = vpop.f32.mrb[124].mxu0 }
 0x1fb   : > { %v7000_v19 = vadd.f32 %v1047_v14, %v6626_v26  ;;  %v5423_v0 = vpop.f32.mrb[125].mxu0  ;;  %v1693_v14 = vadd.s32 16, %v1691_v33 }
 0x1fc   : > { %v1050_v9 = vpop.f32.mrb[126].mxu0  ;;  %v7021_v0 = vadd.s32 4294967295, %v1691_v33 }
 0x1fd   : > { %v7004_v23 = vadd.f32 %v1050_v9, %v6630_v43  ;;  %v5424_v18 = vpop.f32.mrb[127].mxu0 }
 0x1fe   : > { %vm1751_vm1 = vcmp.ge.s32.totalorder %v7021_v0, 0 }
 0x1ff   : > { %5630 = vmatmul.mubr.bf16.gmra.mrb[232].mxu0 %v4427_v6  ;;  %vm7045_vm6 = vmpackc.low %vm6167_vm5, %vm1751_vm1 }
 0x200   : > { %5633 = vmatprep.mubr.msk.bf16.mxu0 %vm6166_vm0, %v8105_v31 }
 0x202   : > { %v1055_v44 = vpop.f32.mrb[128].mxu0 }
 0x203   : > { %v7009_v63 = vadd.f32 %v1055_v44, %v6634_v53  ;;  %v5427_v5 = vpop.f32.mrb[129].mxu0  ;;  %v7018_v53 = vld [vmem:[%s8081_s3] ss:$0 sm:$0xff] }
 0x204   : > { %v1058_v26 = vpop.f32.mrb[130].mxu0 }
 0x205   : > { %v7013_v49 = vadd.f32 %v1058_v26, %v6638_v27  ;;  %v5428_v10 = vpop.f32.mrb[131].mxu0 }
 0x207   : > { %5634 = vmatmul.mubr.bf16.gmra.mrb[236].mxu0 %v6095_v47  ;;  %v7023_v47 = vadd.s32 4294967295, %v1693_v14 }
 0x209   : > { %vm1810_vm2 = vcmp.lt.s32.totalorder %v7023_v47, 16  ;;  %v6168_v47 = vmov 0  }
 0x20a   : > { %v1341_v58 = vpop.f32.mrb[132].mxu0 }
 0x20b   : > { %v5531_v43 = vpop.f32.mrb[133].mxu0 }
 0x20c   : > { %v1344_v37 = vpop.f32.mrb[134].mxu0 }
 0x20d   : > { %v5532_v36 = vpop.f32.mrb[135].mxu0 }
 0x212   : > { %v1349_v52 = vpop.f32.mrb[136].mxu0 }
 0x213   : > { %v5535_v7 = vpop.f32.mrb[137].mxu0 }
 0x214   : > { %v1352_v31 = vpop.f32.mrb[138].mxu0 }
 0x215   : > { %v1559_v59 = vadd.f32 %v1352_v31, %v1027_v17  ;;  %v5536_v39 = vpop.f32.mrb[139].mxu0 }
 0x217   : > { %v1620_v27 = vadd.f32 %v7018_v53, %v1559_v59 }
 0x219   : > { %v1868_v44 = vmax.f32 %v1620_v27, 0.0 }
 0x21a   : > { %v1357_v6 = vpop.f32.mrb[140].mxu0 }
 0x21b   : > { %v1560_v9 = vadd.f32 %v1357_v6, %v1032_v30  ;;  %v5539_v18 = vpop.f32.mrb[141].mxu0  ;;  %v2030_v37 = vsel %vm1751_vm1, %v1868_v44, 0.0 }
 0x21c   : > { %v1360_v5 = vpop.f32.mrb[142].mxu0 }
 0x21d   : > { %v1621_v17 = vadd.f32 %v7018_v53, %v1560_v9  ;;  %v1561_v26 = vadd.f32 %v1360_v5, %v1035_v55  ;;  %v5540_v10 = vpop.f32.mrb[143].mxu0 }
 0x21f   : > { %v1869_v58 = vmax.f32 %v1621_v17, 0.0  ;;  %v1622_v43 = vadd.f32 %v7018_v53, %v1561_v26 }
 0x221   : > { %v2083_v30 = vpack.c.bf16 %v1869_v58, %v2030_v37  ;;  %v7031_v36 = vpack.c.bf16 %v1869_v58, %v1868_v44  ;;  %v1870_v41 = vmax.f32 %v1622_v43, 0.0 }
 0x222   : > { %v1365_v52 = vpop.f32.mrb[144].mxu0 }
 0x223   : > { %v2032_v7 = vsel %vm1810_vm2, %v1870_v41, 0.0  ;;  %v1562_v31 = vadd.f32 %v1365_v52, %v1040_v16  ;;  %v5543_v59 = vpop.f32.mrb[145].mxu0  ;;  %v2133_v55 = vshll.u32 %v2083_v30, 16  ;;  %v2131_v9 = vshrl.u32 %v2083_v30, 16 }
 0x224   : > { %v2084_v33 = vpack.c.bf16 %v2032_v7, %v2032_v7  ;;  %v1368_v39 = vpop.f32.mrb[146].mxu0  ;;  %v2392_v5 = vrot.slane %v2083_v30, 1  ;;  %v6101_v7 = vld [vmem:[%s8082_s4 + $0x148] sm:$0xff]  }
 0x225   : > { %v1623_v27 = vadd.f32 %v7018_v53, %v1562_v31  ;;  %v1563_v14 = vadd.f32 %v1368_v39, %v6994_v24  ;;  %v5544_v6 = vpop.f32.mrb[147].mxu0  ;;  %v2135_v18 = vrot.slane %v2133_v55, 1 }
 0x226   : > { %v2138_v44 = vshll.u32 %v2084_v33, 16  ;;  %v2393_v17 = vrot.slane %v2084_v33, 1 }
 0x227   : > { %v1871_v26 = vmax.f32 %v1623_v27, 0.0  ;;  %v1624_v10 = vadd.f32 %v7018_v53, %v1563_v14  ;;  %v2136_v16 = vor.u32 %v2135_v18, %v2131_v9 }
 0x228   : > { %v2140_v58 = vrot.slane %v2138_v44, 1  ;;  %v7039_v43 = vsel %vm2388_vm3, %v2392_v5, %v2393_v17 }
 0x229   : > { %v2033_v37 = vsel %vm1751_vm1, %v1871_v26, 0.0  ;;  %v1872_v41 = vmax.f32 %v1624_v10, 0.0 }
 0x22a   : > { %v1373_v30 = vpop.f32.mrb[148].mxu0  ;;  %v7050_v52 = vsel %vm2117_vm4, %v2136_v16, %v2140_v58 }
 0x22b   : > { %v2085_v31 = vpack.c.bf16 %v1872_v41, %v2033_v37  ;;  %v7055_v59 = vpack.c.bf16 %v1872_v41, %v1871_v26  ;;  %v1564_v55 = vadd.f32 %v1373_v30, %v7000_v19  ;;  %v5547_v33 = vpop.f32.mrb[149].mxu0  ;;  %2734 = vmatprep.mubr.bf16.mxu1 %v7050_v52  ;;  %v6102_v19 = vld [vmem:[%s8082_s4 + $0x150] sm:$0xff]  }
 0x22c   : > { %v1376_v39 = vpop.f32.mrb[150].mxu0  ;;  %4515 = vmatmul.mubr.msk.bf16.vlgmr.msra.gmra.mrb[84].mxu1 %vm7045_vm6, %v7031_v36 }
 0x22d   : > { %v1625_v27 = vadd.f32 %v7018_v53, %v1564_v55  ;;  %v1565_v14 = vadd.f32 %v1376_v39, %v7004_v23  ;;  %v5548_v6 = vpop.f32.mrb[151].mxu0  ;;  %5638 = vmatpush3.bf16.msra.mxu1 %v6987_v60  ;;  %v2145_v9 = vshll.u32 %v2085_v31, 16  ;;  %v6103_v60 = vld [vmem:[%s8082_s4 + $0x158] sm:$0xff]   ;;  %v2395_v23 = vrot.slane %v2085_v31, 1 }
 0x22e   : > { %5639 = vmatprep.subr.bf16.mxu1 %v6101_v7  ;;  %v2143_v55 = vshrl.u32 %v2085_v31, 16 }
 0x22f   : > { %v1873_v18 = vmax.f32 %v1625_v27, 0.0  ;;  %v1626_v44 = vadd.f32 %v7018_v53, %v1565_v14  ;;  %v2147_v10 = vrot.slane %v2145_v9, 1 }
 0x231   : > { %v2035_v5 = vsel %vm1810_vm2, %v1873_v18, 0.0  ;;  %5640 = vmatpush3.bf16.msra.mxu1 %v6101_v7  ;;  %v1874_v41 = vmax.f32 %v1626_v44, 0.0  ;;  %v2148_v14 = vor.u32 %v2147_v10, %v2143_v55 }
 0x232   : > { %v2086_v17 = vpack.c.bf16 %v2035_v5, %v2035_v5  ;;  %v1381_v26 = vpop.f32.mrb[152].mxu0  ;;  %5641 = vmatprep.subr.bf16.mxu1 %v6102_v19 }
 0x233   : > { %v1566_v16 = vadd.f32 %v1381_v26, %v7009_v63  ;;  %v5551_v58 = vpop.f32.mrb[153].mxu0  ;;  %v2036_v44 = vsel %vm1751_vm1, %v1874_v41, 0.0 }
 0x234   : > { %v2396_v37 = vrot.slane %v2086_v17, 1  ;;  %v1384_v30 = vpop.f32.mrb[154].mxu0  ;;  %v2150_v33 = vshll.u32 %v2086_v17, 16 }
 0x235   : > { %v1627_v39 = vadd.f32 %v7018_v53, %v1566_v16  ;;  %v1567_v7 = vadd.f32 %v1384_v30, %v7013_v49  ;;  %v5552_v27 = vpop.f32.mrb[155].mxu0  ;;  %5642 = vmatpush3.bf16.msra.mxu1 %v6102_v19  ;;  %v6104_v49 = vld [vmem:[%s8082_s4 + $0x160] sm:$0xff]  }
 0x236   : > { %v2152_v6 = vrot.slane %v2150_v33, 1  ;;  %5643 = vmatprep.subr.bf16.mxu1 %v6103_v60  ;;  %v7078_v9 = vsel %vm2388_vm3, %v2395_v23, %v2396_v37 }
 0x237   : > { %v1875_v18 = vmax.f32 %v1627_v39, 0.0  ;;  %v1628_v63 = vadd.f32 %v7018_v53, %v1567_v7 }
 0x238   : > { %v7084_v31 = vsel %vm2117_vm4, %v2148_v14, %v2152_v6 }
 0x239   : > { %v2087_v19 = vpack.c.bf16 %v1875_v18, %v2036_v44  ;;  %v7089_v5 = vpack.c.bf16 %v1875_v18, %v1874_v41  ;;  %v1876_v17 = vmax.f32 %v1628_v63, 0.0  ;;  %2742 = vmatprep.mubr.bf16.mxu1 %v7084_v31  ;;  %3715 = vmatprep.mubr.bf16.mxu0 %v7084_v31 }
 0x23a   : > { %v1389_v26 = vpop.f32.mrb[156].mxu0  ;;  %4518 = vmatmul.mubr.msk.bf16.gmra.mrb[88].mxu1 %vm7045_vm6, %v7055_v59  ;;  %4704 = vmatmul.mubr.msk.bf16.vlgmr.msra.gmra.mrb[240].mxu0 %vm7045_vm6, %v7055_v59 }
 0x23b   : > { %v2038_v10 = vsel %vm1810_vm2, %v1876_v17, 0.0  ;;  %v1568_v23 = vadd.f32 %v1389_v26, %v6643_v21  ;;  %v5555_v16 = vpop.f32.mrb[157].mxu0  ;;  %v2157_v58 = vshll.u32 %v2087_v19, 16  ;;  %5644 = vmatpush3.bf16.msra.mxu1 %v6103_v60  ;;  %v2155_v39 = vshrl.u32 %v2087_v19, 16 }
 0x23c   : > { %v2088_v37 = vpack.c.bf16 %v2038_v10, %v2038_v10  ;;  %v1392_v41 = vpop.f32.mrb[158].mxu0  ;;  %5645 = vmatprep.subr.bf16.mxu1 %v6104_v49  ;;  %v2398_v14 = vrot.slane %v2087_v19, 1  ;;  %v6105_v19 = vld [vmem:[%s8082_s4 + $0x168] sm:$0xff]  }
 0x23d   : > { %v1629_v30 = vadd.f32 %v7018_v53, %v1568_v23  ;;  %v1569_v55 = vadd.f32 %v1392_v41, %v6648_v38  ;;  %v5556_v33 = vpop.f32.mrb[159].mxu0  ;;  %v2159_v7 = vrot.slane %v2157_v58, 1  ;;  %v1223_v41 = vpop.f32.mrb[80].mxu1 }
 0x23e   : > { %v2162_v27 = vshll.u32 %v2088_v37, 16  ;;  %v2399_v6 = vrot.slane %v2088_v37, 1  ;;  %v5511_v33 = vpop.f32.mrb[81].mxu1 }
 0x23f   : > { %v1877_v18 = vmax.f32 %v1629_v30, 0.0  ;;  %v1630_v63 = vadd.f32 %v7018_v53, %v1569_v55  ;;  %v2160_v21 = vor.u32 %v2159_v7, %v2155_v39  ;;  %5646 = vmatpush3.bf16.msra.mxu1 %v6104_v49  ;;  %v1226_v7 = vpop.f32.mrb[82].mxu1 }
 0x240   : > { %v2164_v44 = vrot.slane %v2162_v27, 1  ;;  %v7106_v60 = vsel %vm2388_vm3, %v2398_v14, %v2399_v6  ;;  %5647 = vmatprep.subr.bf16.mxu1 %v6105_v19  ;;  %v5512_v14 = vpop.f32.mrb[83].mxu1 }
 0x241   : > { %v2039_v17 = vsel %vm1751_vm1, %v1877_v18, 0.0  ;;  %v1878_v26 = vmax.f32 %v1630_v63, 0.0 }
 0x242   : > { %v1397_v38 = vpop.f32.mrb[160].mxu0  ;;  %v7111_v10 = vsel %vm2117_vm4, %v2160_v21, %v2164_v44 }
 0x243   : > { %v2089_v23 = vpack.c.bf16 %v1878_v26, %v2039_v17  ;;  %v7116_v16 = vpack.c.bf16 %v1878_v26, %v1877_v18  ;;  %v1570_v49 = vadd.f32 %v1397_v38, %v6655_v40  ;;  %v5559_v58 = vpop.f32.mrb[161].mxu0  ;;  %2750 = vmatprep.mubr.bf16.mxu1 %v7111_v10  ;;  %3723 = vmatprep.mubr.bf16.mxu0 %v7111_v10 }
 0x244   : > { %v1400_v37 = vpop.f32.mrb[162].mxu0  ;;  %4521 = vmatmul.mubr.msk.bf16.gmra.mrb[92].mxu1 %vm7045_vm6, %v7089_v5  ;;  %4707 = vmatmul.mubr.msk.bf16.gmra.mrb[244].mxu0 %vm7045_vm6, %v7089_v5 }
 0x245   : > { %v1631_v30 = vadd.f32 %v7018_v53, %v1570_v49  ;;  %v1571_v55 = vadd.f32 %v1400_v37, %v6660_v48  ;;  %v5560_v40 = vpop.f32.mrb[163].mxu0  ;;  %v2169_v39 = vshll.u32 %v2089_v23, 16  ;;  %5648 = vmatpush3.bf16.msra.mxu1 %v6105_v19  ;;  %v2167_v48 = vshrl.u32 %v2089_v23, 16 }
 0x246   : > { %v2401_v37 = vrot.slane %v2089_v23, 1 }
 0x247   : > { %v1879_v27 = vmax.f32 %v1631_v30, 0.0  ;;  %v1632_v6 = vadd.f32 %v7018_v53, %v1571_v55  ;;  %v2171_v44 = vrot.slane %v2169_v39, 1 }
 0x249   : > { %v2041_v18 = vsel %vm1810_vm2, %v1879_v27, 0.0  ;;  %v1880_v38 = vmax.f32 %v1632_v6, 0.0  ;;  %v2172_v40 = vor.u32 %v2171_v44, %v2167_v48 }
 0x24a   : > { %v2090_v63 = vpack.c.bf16 %v2041_v18, %v2041_v18  ;;  %v1405_v21 = vpop.f32.mrb[164].mxu0 }
 0x24b   : > { %v1572_v17 = vadd.f32 %v1405_v21, %v6666_v29  ;;  %v5563_v26 = vpop.f32.mrb[165].mxu0  ;;  %v2042_v27 = vsel %vm1751_vm1, %v1880_v38, 0.0 }
 0x24c   : > { %v1408_v49 = vpop.f32.mrb[166].mxu0  ;;  %v2174_v58 = vshll.u32 %v2090_v63, 16  ;;  %v2402_v19 = vrot.slane %v2090_v63, 1 }
 0x24d   : > { %v1633_v41 = vadd.f32 %v7018_v53, %v1572_v17  ;;  %v1573_v30 = vadd.f32 %v1408_v49, %v6676_v35  ;;  %v5564_v55 = vpop.f32.mrb[167].mxu0  ;;  %v6106_v35 = vld [vmem:[%s8082_s4 + $0x170] sm:$0xff]  }
 0x24e   : > { %v2176_v33 = vrot.slane %v2174_v58, 1  ;;  %v7136_v7 = vsel %vm2388_vm3, %v2401_v37, %v2402_v19  ;;  %5649 = vmatprep.subr.bf16.mxu1 %v6106_v35 }
 0x24f   : > { %v1881_v39 = vmax.f32 %v1633_v41, 0.0  ;;  %v1634_v29 = vadd.f32 %v7018_v53, %v1573_v30  ;;  %5650 = vmatpush3.bf16.msra.mxu1 %v6106_v35 }
 0x250   : > { %v7142_v14 = vsel %vm2117_vm4, %v2172_v40, %v2176_v33 }
 0x251   : > { %v2091_v23 = vpack.c.bf16 %v1881_v39, %v2042_v27  ;;  %v7144_v6 = vpack.c.bf16 %v1881_v39, %v1880_v38  ;;  %v1882_v18 = vmax.f32 %v1634_v29, 0.0  ;;  %2758 = vmatprep.mubr.bf16.mxu1 %v7142_v14  ;;  %3731 = vmatprep.mubr.bf16.mxu0 %v7142_v14 }
 0x252   : > { %v1413_v63 = vpop.f32.mrb[168].mxu0  ;;  %4524 = vmatmul.mubr.msk.bf16.gmra.mrb[96].mxu1 %vm7045_vm6, %v7116_v16  ;;  %4710 = vmatmul.mubr.msk.bf16.gmra.mrb[248].mxu0 %vm7045_vm6, %v7116_v16 }
 0x253   : > { %v2044_v21 = vsel %vm1810_vm2, %v1882_v18, 0.0  ;;  %v1574_v44 = vadd.f32 %v1413_v63, %v6682_v15  ;;  %v5567_v17 = vpop.f32.mrb[169].mxu0  ;;  %v2181_v26 = vshll.u32 %v2091_v23, 16  ;;  %v2179_v19 = vshrl.u32 %v2091_v23, 16 }
 0x254   : > { %v2092_v48 = vpack.c.bf16 %v2044_v21, %v2044_v21  ;;  %v1416_v38 = vpop.f32.mrb[170].mxu0  ;;  %v2404_v55 = vrot.slane %v2091_v23, 1  ;;  %v6107_v23 = vld [vmem:[%s8082_s4 + $0x178] sm:$0xff]  }
 0x255   : > { %v1635_v49 = vadd.f32 %v7018_v53, %v1574_v44  ;;  %v1575_v58 = vadd.f32 %v1416_v38, %v6686_v28  ;;  %v5568_v37 = vpop.f32.mrb[171].mxu0  ;;  %v2183_v41 = vrot.slane %v2181_v26, 1  ;;  %5651 = vmatprep.subr.bf16.mxu1 %v6107_v23 }
 0x256   : > { %v2186_v30 = vshll.u32 %v2092_v48, 16  ;;  %v2405_v40 = vrot.slane %v2092_v48, 1  ;;  %5652 = vmatpush3.bf16.msra.mxu1 %v6107_v23 }
 0x257   : > { %v1883_v33 = vmax.f32 %v1635_v49, 0.0  ;;  %v1636_v39 = vadd.f32 %v7018_v53, %v1575_v58  ;;  %v2184_v15 = vor.u32 %v2183_v41, %v2179_v19  ;;  %v8108_v49 = vld [vmem:[#allocation2_spill] sm:$0xff] }
 0x258   : > { %v2188_v29 = vrot.slane %v2186_v30, 1  ;;  %v7164_v27 = vsel %vm2388_vm3, %v2404_v55, %v2405_v40 }
 0x259   : > { %v2045_v18 = vsel %vm1751_vm1, %v1883_v33, 0.0  ;;  %v1884_v35 = vmax.f32 %v1636_v39, 0.0 }
 0x25a   : > { %v1421_v63 = vpop.f32.mrb[172].mxu0  ;;  %v7169_v28 = vsel %vm2117_vm4, %v2184_v15, %v2188_v29 }
 0x25b   : > { %v2093_v21 = vpack.c.bf16 %v1884_v35, %v2045_v18  ;;  %v7174_v44 = vpack.c.bf16 %v1884_v35, %v1883_v33  ;;  %v1576_v17 = vadd.f32 %v1421_v63, %v6693_v4  ;;  %v5571_v26 = vpop.f32.mrb[173].mxu0  ;;  %2766 = vmatprep.mubr.bf16.mxu1 %v7169_v28  ;;  %3739 = vmatprep.mubr.bf16.mxu0 %v7169_v28 }
 0x25c   : > { %v1424_v48 = vpop.f32.mrb[174].mxu0  ;;  %4527 = vmatmul.mubr.msk.bf16.gmra.mrb[100].mxu1 %vm7045_vm6, %v7144_v6  ;;  %4713 = vmatmul.mubr.msk.bf16.gmra.mrb[252].mxu0 %vm7045_vm6, %v7144_v6 }
 0x25d   : > { %v1637_v38 = vadd.f32 %v7018_v53, %v1576_v17  ;;  %v1577_v58 = vadd.f32 %v1424_v48, %v8108_v49  ;;  %v5572_v37 = vpop.f32.mrb[175].mxu0  ;;  %v2193_v4 = vshll.u32 %v2093_v21, 16  ;;  %v2191_v29 = vshrl.u32 %v2093_v21, 16 }
 0x25e   : > { %v2407_v17 = vrot.slane %v2093_v21, 1 }
 0x25f   : > { %v1885_v19 = vmax.f32 %v1637_v38, 0.0  ;;  %v1638_v41 = vadd.f32 %v7018_v53, %v1577_v58  ;;  %v2195_v33 = vrot.slane %v2193_v4, 1 }
 0x261   : > { %v2047_v30 = vsel %vm1810_vm2, %v1885_v19, 0.0  ;;  %v1886_v18 = vmax.f32 %v1638_v41, 0.0  ;;  %v2196_v49 = vor.u32 %v2195_v33, %v2191_v29 }
 0x262   : > { %v2094_v55 = vpack.c.bf16 %v2047_v30, %v2047_v30  ;;  %v1429_v40 = vpop.f32.mrb[176].mxu0 }
 0x263   : > { %v1578_v39 = vadd.f32 %v1429_v40, %v6711_v20  ;;  %v5575_v15 = vpop.f32.mrb[177].mxu0  ;;  %v2048_v19 = vsel %vm1751_vm1, %v1886_v18, 0.0  ;;  %v6108_v40 = vld [vmem:[%s8082_s4 + $0x40] sm:$0xff]  }
 0x264   : > { %v1432_v35 = vpop.f32.mrb[178].mxu0  ;;  %v2198_v63 = vshll.u32 %v2094_v55, 16  ;;  %v2408_v26 = vrot.slane %v2094_v55, 1  ;;  %4993 = vmatprep.subr.bf16.mxu1 %v6108_v40 }
 0x265   : > { %v1639_v23 = vadd.f32 %v7018_v53, %v1578_v39  ;;  %v1579_v48 = vadd.f32 %v1432_v35, %v6716_v22  ;;  %v5576_v38 = vpop.f32.mrb[179].mxu0  ;;  %v8110_v39 = vld [vmem:[#allocation3_spill] sm:$0xff] }
 0x266   : > { %v2200_v58 = vrot.slane %v2198_v63, 1  ;;  %v7194_v37 = vsel %vm2388_vm3, %v2407_v17, %v2408_v26 }
 0x267   : > { %v1887_v4 = vmax.f32 %v1639_v23, 0.0  ;;  %v1640_v20 = vadd.f32 %v7018_v53, %v1579_v48 }
 0x268   : > { %v7200_v41 = vsel %vm2117_vm4, %v2196_v49, %v2200_v58 }
 0x269   : > { %v2095_v21 = vpack.c.bf16 %v1887_v4, %v2048_v19  ;;  %v7202_v30 = vpack.c.bf16 %v1887_v4, %v1886_v18  ;;  %v1888_v55 = vmax.f32 %v1640_v20, 0.0  ;;  %2774 = vmatprep.mubr.bf16.mxu1 %v7200_v41  ;;  %3747 = vmatprep.mubr.bf16.mxu0 %v7200_v41 }
 0x26a   : > { %v1437_v22 = vpop.f32.mrb[180].mxu0  ;;  %4530 = vmatmul.mubr.msk.bf16.gmra.mrb[104].mxu1 %vm7045_vm6, %v7174_v44  ;;  %4716 = vmatmul.mubr.msk.bf16.gmra.mrb[0].mxu0 %vm7045_vm6, %v7174_v44 }
 0x26b   : > { %8109 = vst [vmem:[#allocation2_spill] sm:$0xff] %v7202_v30  ;;  %v2050_v33 = vsel %vm1810_vm2, %v1888_v55, 0.0  ;;  %v1580_v15 = vadd.f32 %v1437_v22, %v8110_v39  ;;  %v5579_v29 = vpop.f32.mrb[181].mxu0  ;;  %v2205_v18 = vshll.u32 %v2095_v21, 16  ;;  %v2203_v48 = vshrl.u32 %v2095_v21, 16 }
 0x26c   : > { %v2096_v35 = vpack.c.bf16 %v2050_v33, %v2050_v33  ;;  %v1440_v63 = vpop.f32.mrb[182].mxu0  ;;  %v2410_v58 = vrot.slane %v2095_v21, 1 }
 0x26d   : > { %v1641_v17 = vadd.f32 %v7018_v53, %v1580_v15  ;;  %v1581_v26 = vadd.f32 %v1440_v63, %v6729_v34  ;;  %v5580_v23 = vpop.f32.mrb[183].mxu0  ;;  %v2207_v38 = vrot.slane %v2205_v18, 1 }
 0x26e   : > { %v2210_v49 = vshll.u32 %v2096_v35, 16  ;;  %v2411_v4 = vrot.slane %v2096_v35, 1 }
 0x26f   : > { %v1889_v20 = vmax.f32 %v1641_v17, 0.0  ;;  %v1642_v19 = vadd.f32 %v7018_v53, %v1581_v26  ;;  %v2208_v55 = vor.u32 %v2207_v38, %v2203_v48 }
 0x270   : > { %v2212_v22 = vrot.slane %v2210_v49, 1  ;;  %v7222_v39 = vsel %vm2388_vm3, %v2410_v58, %v2411_v4 }
 0x271   : > { %v2051_v40 = vsel %vm1751_vm1, %v1889_v20, 0.0  ;;  %v1890_v33 = vmax.f32 %v1642_v19, 0.0  ;;  %v8112_v19 = vld [vmem:[#allocation4_spill] sm:$0xff] }
 0x272   : > { %v1445_v15 = vpop.f32.mrb[184].mxu0  ;;  %v7227_v34 = vsel %vm2117_vm4, %v2208_v55, %v2212_v22 }
 0x273   : > { %v2097_v29 = vpack.c.bf16 %v1890_v33, %v2051_v40  ;;  %v7229_v18 = vpack.c.bf16 %v1890_v33, %v1889_v20  ;;  %v1582_v21 = vadd.f32 %v1445_v15, %v6737_v56  ;;  %v5583_v35 = vpop.f32.mrb[185].mxu0  ;;  %2782 = vmatprep.mubr.bf16.mxu1 %v7227_v34  ;;  %3755 = vmatprep.mubr.bf16.mxu0 %v7227_v34 }
 0x274   : > { %v1448_v63 = vpop.f32.mrb[186].mxu0  ;;  %4533 = vmatmul.mubr.msk.bf16.gmra.mrb[108].mxu1 %vm7045_vm6, %v7202_v30  ;;  %4719 = vmatmul.mubr.msk.bf16.gmra.mrb[4].mxu0 %vm7045_vm6, %v7202_v30 }
 0x275   : > { %8111 = vst [vmem:[#allocation3_spill] sm:$0xff] %v7229_v18  ;;  %v1643_v17 = vadd.f32 %v7018_v53, %v1582_v21  ;;  %v1583_v26 = vadd.f32 %v1448_v63, %v6742_v12  ;;  %v5584_v23 = vpop.f32.mrb[187].mxu0  ;;  %v2217_v56 = vshll.u32 %v2097_v29, 16  ;;  %v2215_v40 = vshrl.u32 %v2097_v29, 16 }
 0x276   : > { %v2413_v35 = vrot.slane %v2097_v29, 1 }
 0x277   : > { %v1891_v48 = vmax.f32 %v1643_v17, 0.0  ;;  %v1644_v38 = vadd.f32 %v7018_v53, %v1583_v26  ;;  %v2219_v20 = vrot.slane %v2217_v56, 1 }
 0x279   : > { %v2053_v49 = vsel %vm1810_vm2, %v1891_v48, 0.0  ;;  %v1892_v33 = vmax.f32 %v1644_v38, 0.0  ;;  %v2220_v23 = vor.u32 %v2219_v20, %v2215_v40 }
 0x27a   : > { %v2098_v58 = vpack.c.bf16 %v2053_v49, %v2053_v49  ;;  %v1453_v4 = vpop.f32.mrb[188].mxu0 }
 0x27b   : > { %v1584_v55 = vadd.f32 %v1453_v4, %v8112_v19  ;;  %v5587_v22 = vpop.f32.mrb[189].mxu0  ;;  %v2054_v38 = vsel %vm1751_vm1, %v1892_v33, 0.0 }
 0x27c   : > { %v1456_v15 = vpop.f32.mrb[190].mxu0  ;;  %v2222_v21 = vshll.u32 %v2098_v58, 16  ;;  %v2414_v12 = vrot.slane %v2098_v58, 1 }
 0x27d   : > { %v1645_v63 = vadd.f32 %v7018_v53, %v1584_v55  ;;  %v1585_v17 = vadd.f32 %v1456_v15, %v6766_v42  ;;  %v5588_v26 = vpop.f32.mrb[191].mxu0 }
 0x27e   : > { %v2224_v30 = vrot.slane %v2222_v21, 1  ;;  %v7249_v48 = vsel %vm2388_vm3, %v2413_v35, %v2414_v12  ;;  %v8114_v21 = vld [vmem:[#allocation5_spill] sm:$0xff] }
 0x27f   : > { %v1893_v56 = vmax.f32 %v1645_v63, 0.0  ;;  %v1646_v49 = vadd.f32 %v7018_v53, %v1585_v17 }
 0x280   : > { %v7255_v4 = vsel %vm2117_vm4, %v2220_v23, %v2224_v30 }
 0x281   : > { %v2099_v29 = vpack.c.bf16 %v1893_v56, %v2054_v38  ;;  %v7257_v58 = vpack.c.bf16 %v1893_v56, %v1892_v33  ;;  %v1894_v19 = vmax.f32 %v1646_v49, 0.0  ;;  %2790 = vmatprep.mubr.bf16.mxu1 %v7255_v4  ;;  %3763 = vmatprep.mubr.bf16.mxu0 %v7255_v4 }
 0x282   : > { %v1461_v42 = vpop.f32.mrb[192].mxu0  ;;  %4536 = vmatmul.mubr.msk.bf16.gmra.mrb[112].mxu1 %vm7045_vm6, %v7229_v18  ;;  %4722 = vmatmul.mubr.msk.bf16.gmra.mrb[8].mxu0 %vm7045_vm6, %v7229_v18 }
 0x283   : > { %8113 = vst [vmem:[#allocation4_spill] sm:$0xff] %v7257_v58  ;;  %v2056_v30 = vsel %vm1810_vm2, %v1894_v19, 0.0  ;;  %v1586_v20 = vadd.f32 %v1461_v42, %v6774_v13  ;;  %v5591_v55 = vpop.f32.mrb[193].mxu0  ;;  %v2229_v22 = vshll.u32 %v2099_v29, 16  ;;  %v2227_v63 = vshrl.u32 %v2099_v29, 16 }
 0x284   : > { %v2100_v40 = vpack.c.bf16 %v2056_v30, %v2056_v30  ;;  %v1464_v33 = vpop.f32.mrb[194].mxu0  ;;  %v2416_v23 = vrot.slane %v2099_v29, 1  ;;  %v8116_v29 = vld [vmem:[#allocation6_spill] sm:$0xff] }
 0x285   : > { %v1647_v15 = vadd.f32 %v7018_v53, %v1586_v20  ;;  %v1587_v35 = vadd.f32 %v1464_v33, %v8114_v21  ;;  %v5592_v12 = vpop.f32.mrb[195].mxu0  ;;  %v2231_v17 = vrot.slane %v2229_v22, 1 }
 0x286   : > { %v2234_v26 = vshll.u32 %v2100_v40, 16  ;;  %v2417_v56 = vrot.slane %v2100_v40, 1 }
 0x287   : > { %v1895_v49 = vmax.f32 %v1647_v15, 0.0  ;;  %v1648_v38 = vadd.f32 %v7018_v53, %v1587_v35  ;;  %v2232_v19 = vor.u32 %v2231_v17, %v2227_v63 }
 0x288   : > { %v2236_v18 = vrot.slane %v2234_v26, 1  ;;  %v7274_v13 = vsel %vm2388_vm3, %v2416_v23, %v2417_v56 }
 0x289   : > { %v2057_v42 = vsel %vm1751_vm1, %v1895_v49, 0.0  ;;  %v1896_v30 = vmax.f32 %v1648_v38, 0.0 }
 0x28a   : > { %v1469_v20 = vpop.f32.mrb[196].mxu0  ;;  %v7279_v55 = vsel %vm2117_vm4, %v2232_v19, %v2236_v18  ;;  %v8117_v19 = vld [vmem:[#allocation7_spill] sm:$0xff] }
 0x28b   : > { %8115 = vst [vmem:[#allocation5_spill] sm:$0xff] %v7279_v55  ;;  %v2101_v22 = vpack.c.bf16 %v1896_v30, %v2057_v42  ;;  %v7281_v33 = vpack.c.bf16 %v1896_v30, %v1895_v49  ;;  %v1588_v40 = vadd.f32 %v1469_v20, %v8116_v29  ;;  %v5595_v15 = vpop.f32.mrb[197].mxu0  ;;  %2798 = vmatprep.mubr.bf16.mxu1 %v7279_v55 }
 0x28c   : > { %3771 = vmatprep.mubr.bf16.mxu0 %v7279_v55  ;;  %v1472_v21 = vpop.f32.mrb[198].mxu0  ;;  %4539 = vmatmul.mubr.msk.bf16.gmra.mrb[116].mxu1 %vm7045_vm6, %v7257_v58 }
 0x28d   : > { %4725 = vmatmul.mubr.msk.bf16.gmra.mrb[12].mxu0 %vm7045_vm6, %v7257_v58  ;;  %v1649_v18 = vadd.f32 %v7018_v53, %v1588_v40  ;;  %v1589_v35 = vadd.f32 %v1472_v21, %v6798_v61  ;;  %v5596_v12 = vpop.f32.mrb[199].mxu0  ;;  %v2241_v63 = vshll.u32 %v2101_v22, 16  ;;  %v2239_v20 = vshrl.u32 %v2101_v22, 16 }
 0x28e   : > { %v2419_v58 = vrot.slane %v2101_v22, 1 }
 0x28f   : > { %v1897_v17 = vmax.f32 %v1649_v18, 0.0  ;;  %v1650_v26 = vadd.f32 %v7018_v53, %v1589_v35  ;;  %v2243_v38 = vrot.slane %v2241_v63, 1 }
 0x291   : > { %v2059_v23 = vsel %vm1810_vm2, %v1897_v17, 0.0  ;;  %v1898_v29 = vmax.f32 %v1650_v26, 0.0  ;;  %v2244_v12 = vor.u32 %v2243_v38, %v2239_v20 }
 0x292   : > { %v2102_v56 = vpack.c.bf16 %v2059_v23, %v2059_v23  ;;  %v1477_v49 = vpop.f32.mrb[200].mxu0 }
 0x293   : > { %v1590_v42 = vadd.f32 %v1477_v49, %v8117_v19  ;;  %v5599_v30 = vpop.f32.mrb[201].mxu0  ;;  %v2060_v26 = vsel %vm1751_vm1, %v1898_v29, 0.0 }
 0x294   : > { %v1480_v15 = vpop.f32.mrb[202].mxu0  ;;  %v2246_v40 = vshll.u32 %v2102_v56, 16  ;;  %v2420_v61 = vrot.slane %v2102_v56, 1 }
 0x295   : > { %v1651_v21 = vadd.f32 %v7018_v53, %v1590_v42  ;;  %v1591_v18 = vadd.f32 %v1480_v15, %v6811_v54  ;;  %v5600_v35 = vpop.f32.mrb[203].mxu0 }
 0x296   : > { %v2248_v55 = vrot.slane %v2246_v40, 1  ;;  %v7301_v17 = vsel %vm2388_vm3, %v2419_v58, %v2420_v61 }
 0x297   : > { %v1899_v63 = vmax.f32 %v1651_v21, 0.0  ;;  %v1652_v23 = vadd.f32 %v7018_v53, %v1591_v18 }
 0x298   : > { %v7307_v49 = vsel %vm2117_vm4, %v2244_v12, %v2248_v55 }
 0x299   : > { %v2103_v22 = vpack.c.bf16 %v1899_v63, %v2060_v26  ;;  %v7309_v56 = vpack.c.bf16 %v1899_v63, %v1898_v29  ;;  %v1900_v19 = vmax.f32 %v1652_v23, 0.0  ;;  %2806 = vmatprep.mubr.bf16.mxu1 %v7307_v49  ;;  %3779 = vmatprep.mubr.bf16.mxu0 %v7307_v49 }
 0x29a   : > { %v1485_v54 = vpop.f32.mrb[204].mxu0  ;;  %4542 = vmatmul.mubr.msk.bf16.gmra.mrb[120].mxu1 %vm7045_vm6, %v7281_v33  ;;  %4728 = vmatmul.mubr.msk.bf16.gmra.mrb[16].mxu0 %vm7045_vm6, %v7281_v33 }
 0x29b   : > { %8118 = vst [vmem:[#allocation6_spill] sm:$0xff] %v7309_v56  ;;  %v2062_v58 = vsel %vm1810_vm2, %v1900_v19, 0.0  ;;  %v1592_v55 = vadd.f32 %v1485_v54, %v6819_v8  ;;  %v5603_v38 = vpop.f32.mrb[205].mxu0  ;;  %v2253_v42 = vshll.u32 %v2103_v22, 16  ;;  %v2251_v61 = vshrl.u32 %v2103_v22, 16 }
 0x29c   : > { %v2104_v30 = vpack.c.bf16 %v2062_v58, %v2062_v58  ;;  %v1488_v20 = vpop.f32.mrb[206].mxu0  ;;  %v2422_v35 = vrot.slane %v2103_v22, 1  ;;  %v8120_v22 = vld [vmem:[#allocation8_spill] sm:$0xff] }
 0x29d   : > { %v1653_v29 = vadd.f32 %v7018_v53, %v1592_v55  ;;  %v1593_v15 = vadd.f32 %v1488_v20, %v6824_v51  ;;  %v5604_v40 = vpop.f32.mrb[207].mxu0  ;;  %v2255_v21 = vrot.slane %v2253_v42, 1 }
 0x29e   : > { %v2258_v18 = vshll.u32 %v2104_v30, 16  ;;  %v2423_v12 = vrot.slane %v2104_v30, 1  ;;  %v8121_v40 = vld [vmem:[#allocation9_spill] sm:$0xff] }
 0x29f   : > { %v1901_v63 = vmax.f32 %v1653_v29, 0.0  ;;  %v1654_v23 = vadd.f32 %v7018_v53, %v1593_v15  ;;  %v2256_v26 = vor.u32 %v2255_v21, %v2251_v61 }
 0x2a0   : > { %v2260_v19 = vrot.slane %v2258_v18, 1  ;;  %v7326_v8 = vsel %vm2388_vm3, %v2422_v35, %v2423_v12 }
 0x2a1   : > { %v2063_v54 = vsel %vm1751_vm1, %v1901_v63, 0.0  ;;  %v1902_v58 = vmax.f32 %v1654_v23, 0.0 }
 0x2a2   : > { %v1493_v55 = vpop.f32.mrb[208].mxu0  ;;  %v7331_v51 = vsel %vm2117_vm4, %v2256_v26, %v2260_v19 }
 0x2a3   : > { %8119 = vst [vmem:[#allocation7_spill] sm:$0xff] %v7331_v51  ;;  %v2105_v38 = vpack.c.bf16 %v1902_v58, %v2063_v54  ;;  %v7333_v42 = vpack.c.bf16 %v1902_v58, %v1901_v63  ;;  %v1594_v30 = vadd.f32 %v1493_v55, %v8120_v22  ;;  %v5607_v20 = vpop.f32.mrb[209].mxu0  ;;  %2814 = vmatprep.mubr.bf16.mxu1 %v7331_v51 }
 0x2a4   : > { %3787 = vmatprep.mubr.bf16.mxu0 %v7331_v51  ;;  %v1496_v29 = vpop.f32.mrb[210].mxu0  ;;  %4545 = vmatmul.mubr.msk.bf16.gmra.mrb[124].mxu1 %vm7045_vm6, %v7309_v56 }
 0x2a5   : > { %4731 = vmatmul.mubr.msk.bf16.gmra.mrb[20].mxu0 %vm7045_vm6, %v7309_v56  ;;  %v1655_v15 = vadd.f32 %v7018_v53, %v1594_v30  ;;  %v1595_v61 = vadd.f32 %v1496_v29, %v8121_v40  ;;  %v5608_v21 = vpop.f32.mrb[211].mxu0  ;;  %v2265_v18 = vshll.u32 %v2105_v38, 16  ;;  %v2263_v55 = vshrl.u32 %v2105_v38, 16 }
 0x2a6   : > { %v2425_v56 = vrot.slane %v2105_v38, 1 }
 0x2a7   : > { %v1903_v35 = vmax.f32 %v1655_v15, 0.0  ;;  %v1656_v12 = vadd.f32 %v7018_v53, %v1595_v61  ;;  %v2267_v19 = vrot.slane %v2265_v18, 1 }
 0x2a9   : > { %v2065_v63 = vsel %vm1810_vm2, %v1903_v35, 0.0  ;;  %v1904_v22 = vmax.f32 %v1656_v12, 0.0  ;;  %v2268_v21 = vor.u32 %v2267_v19, %v2263_v55 }
 0x2aa   : > { %v2106_v23 = vpack.c.bf16 %v2065_v63, %v2065_v63  ;;  %v1501_v26 = vpop.f32.mrb[212].mxu0 }
 0x2ab   : > { %v1596_v54 = vadd.f32 %v1501_v26, %v6878_v46  ;;  %v5611_v58 = vpop.f32.mrb[213].mxu0  ;;  %v2066_v12 = vsel %vm1751_vm1, %v1904_v22, 0.0 }
 0x2ac   : > { %v1504_v20 = vpop.f32.mrb[214].mxu0  ;;  %v2270_v30 = vshll.u32 %v2106_v23, 16  ;;  %v2426_v29 = vrot.slane %v2106_v23, 1 }
 0x2ad   : > { %v1657_v40 = vadd.f32 %v7018_v53, %v1596_v54  ;;  %v1597_v15 = vadd.f32 %v1504_v20, %v6889_v62  ;;  %v5612_v61 = vpop.f32.mrb[215].mxu0 }
 0x2ae   : > { %v2272_v51 = vrot.slane %v2270_v30, 1  ;;  %v7353_v35 = vsel %vm2388_vm3, %v2425_v56, %v2426_v29 }
 0x2af   : > { %v1905_v18 = vmax.f32 %v1657_v40, 0.0  ;;  %v1658_v46 = vadd.f32 %v7018_v53, %v1597_v15 }
 0x2b0   : > { %v7359_v63 = vsel %vm2117_vm4, %v2268_v21, %v2272_v51 }
 0x2b1   : > { %v2107_v38 = vpack.c.bf16 %v1905_v18, %v2066_v12  ;;  %v7361_v23 = vpack.c.bf16 %v1905_v18, %v1904_v22  ;;  %v1906_v26 = vmax.f32 %v1658_v46, 0.0  ;;  %2822 = vmatprep.mubr.bf16.mxu1 %v7359_v63  ;;  %3795 = vmatprep.mubr.bf16.mxu0 %v7359_v63 }
 0x2b2   : > { %v1509_v62 = vpop.f32.mrb[216].mxu0  ;;  %4548 = vmatmul.mubr.msk.bf16.gmra.mrb[128].mxu1 %vm7045_vm6, %v7333_v42  ;;  %4734 = vmatmul.mubr.msk.bf16.gmra.mrb[24].mxu0 %vm7045_vm6, %v7333_v42 }
 0x2b3   : > { %v2068_v56 = vsel %vm1810_vm2, %v1906_v26, 0.0  ;;  %v1598_v51 = vadd.f32 %v1509_v62, %v6910_v11  ;;  %v5615_v19 = vpop.f32.mrb[217].mxu0  ;;  %v2277_v54 = vshll.u32 %v2107_v38, 16  ;;  %v2275_v29 = vshrl.u32 %v2107_v38, 16 }
 0x2b4   : > { %v2108_v58 = vpack.c.bf16 %v2068_v56, %v2068_v56  ;;  %v1512_v55 = vpop.f32.mrb[218].mxu0  ;;  %v2428_v61 = vrot.slane %v2107_v38, 1 }
 0x2b5   : > { %v1659_v22 = vadd.f32 %v7018_v53, %v1598_v51  ;;  %v1599_v20 = vadd.f32 %v1512_v55, %v6916_v50  ;;  %v5616_v30 = vpop.f32.mrb[219].mxu0  ;;  %v2279_v40 = vrot.slane %v2277_v54, 1 }
 0x2b6   : > { %v2282_v15 = vshll.u32 %v2108_v58, 16  ;;  %v2429_v21 = vrot.slane %v2108_v58, 1 }
 0x2b7   : > { %v1907_v18 = vmax.f32 %v1659_v22, 0.0  ;;  %v1660_v46 = vadd.f32 %v7018_v53, %v1599_v20  ;;  %v2280_v12 = vor.u32 %v2279_v40, %v2275_v29 }
 0x2b8   : > { %v2284_v26 = vrot.slane %v2282_v15, 1  ;;  %v7378_v11 = vsel %vm2388_vm3, %v2428_v61, %v2429_v21 }
 0x2b9   : > { %v2069_v62 = vsel %vm1751_vm1, %v1907_v18, 0.0  ;;  %v1908_v56 = vmax.f32 %v1660_v46, 0.0 }
 0x2ba   : > { %v1517_v51 = vpop.f32.mrb[220].mxu0  ;;  %v7383_v50 = vsel %vm2117_vm4, %v2280_v12, %v2284_v26 }
 0x2bb   : > { %v2109_v19 = vpack.c.bf16 %v1908_v56, %v2069_v62  ;;  %v7385_v54 = vpack.c.bf16 %v1908_v56, %v1907_v18  ;;  %v1600_v38 = vadd.f32 %v1517_v51, %v6931_v3  ;;  %v5619_v58 = vpop.f32.mrb[221].mxu0  ;;  %2830 = vmatprep.mubr.bf16.mxu1 %v7383_v50  ;;  %3803 = vmatprep.mubr.bf16.mxu0 %v7383_v50 }
 0x2bc   : > { %v1520_v55 = vpop.f32.mrb[222].mxu0  ;;  %4551 = vmatmul.mubr.msk.bf16.gmra.mrb[132].mxu1 %vm7045_vm6, %v7361_v23  ;;  %4737 = vmatmul.mubr.msk.bf16.gmra.mrb[28].mxu0 %vm7045_vm6, %v7361_v23  ;;  %v6140_v58 = vld [vmem:[%s8081_s3] ss:$0 sm:$0xff] }
 0x2bd   : > { %8122 = vst [vmem:[#allocation8_spill] sm:$0xff] %v7385_v54  ;;  %v1661_v22 = vadd.f32 %v7018_v53, %v1600_v38  ;;  %v1601_v20 = vadd.f32 %v1520_v55, %v6937_v45  ;;  %v5620_v30 = vpop.f32.mrb[223].mxu0  ;;  %v2289_v3 = vshll.u32 %v2109_v19, 16  ;;  %v2287_v26 = vshrl.u32 %v2109_v19, 16 }
 0x2be   : > { %v2431_v38 = vrot.slane %v2109_v19, 1 }
 0x2bf   : > { %v1909_v29 = vmax.f32 %v1661_v22, 0.0  ;;  %v1662_v40 = vadd.f32 %v7018_v53, %v1601_v20  ;;  %v2291_v18 = vrot.slane %v2289_v3, 1 }
 0x2c1   : > { %v2071_v15 = vsel %vm1810_vm2, %v1909_v29, 0.0  ;;  %v1910_v62 = vmax.f32 %v1662_v40, 0.0  ;;  %v2292_v20 = vor.u32 %v2291_v18, %v2287_v26 }
 0x2c2   : > { %v2110_v61 = vpack.c.bf16 %v2071_v15, %v2071_v15  ;;  %v1525_v21 = vpop.f32.mrb[224].mxu0 }
 0x2c3   : > { %v1602_v46 = vadd.f32 %v1525_v21, %v6946_v1  ;;  %v5623_v12 = vpop.f32.mrb[225].mxu0  ;;  %v2072_v40 = vsel %vm1751_vm1, %v1910_v62, 0.0 }
 0x2c4   : > { %v1528_v56 = vpop.f32.mrb[226].mxu0  ;;  %v2294_v51 = vshll.u32 %v2110_v61, 16  ;;  %v2432_v45 = vrot.slane %v2110_v61, 1 }
 0x2c5   : > { %v1663_v53 = vadd.f32 %v6140_v58, %v1602_v46  ;;  %v1603_v55 = vadd.f32 %v1528_v56, %v6949_v32  ;;  %v5624_v22 = vpop.f32.mrb[227].mxu0 }
 0x2c6   : > { %v2296_v30 = vrot.slane %v2294_v51, 1  ;;  %v7407_v3 = vsel %vm2388_vm3, %v2431_v38, %v2432_v45 }
 0x2c7   : > { %v1911_v1 = vmax.f32 %v1663_v53, 0.0  ;;  %v1664_v29 = vadd.f32 %v6140_v58, %v1603_v55 }
 0x2c8   : > { %v7412_v19 = vsel %vm2117_vm4, %v2292_v20, %v2296_v30 }
 0x2c9   : > { %v2111_v15 = vpack.c.bf16 %v1911_v1, %v2072_v40  ;;  %v7414_v61 = vpack.c.bf16 %v1911_v1, %v1910_v62  ;;  %v1912_v21 = vmax.f32 %v1664_v29, 0.0  ;;  %2838 = vmatprep.mubr.bf16.mxu1 %v7412_v19  ;;  %3811 = vmatprep.mubr.bf16.mxu0 %v7412_v19 }
 0x2ca   : > { %v1533_v32 = vpop.f32.mrb[228].mxu0  ;;  %4554 = vmatmul.mubr.msk.bf16.gmra.mrb[136].mxu1 %vm7045_vm6, %v7385_v54  ;;  %4740 = vmatmul.mubr.msk.bf16.gmra.mrb[32].mxu0 %vm7045_vm6, %v7385_v54 }
 0x2cb   : > { %v2074_v18 = vsel %vm1810_vm2, %v1912_v21, 0.0  ;;  %v1604_v46 = vadd.f32 %v1533_v32, %v6955_v2  ;;  %v5627_v12 = vpop.f32.mrb[229].mxu0  ;;  %v2301_v26 = vshll.u32 %v2111_v15, 16  ;;  %v2299_v53 = vshrl.u32 %v2111_v15, 16 }
 0x2cc   : > { %v2112_v62 = vpack.c.bf16 %v2074_v18, %v2074_v18  ;;  %v1536_v56 = vpop.f32.mrb[230].mxu0  ;;  %v2434_v20 = vrot.slane %v2111_v15, 1 }
 0x2cd   : > { %v1665_v51 = vadd.f32 %v6140_v58, %v1604_v46  ;;  %v1605_v38 = vadd.f32 %v1536_v56, %v6958_v57  ;;  %v5628_v45 = vpop.f32.mrb[231].mxu0  ;;  %v2303_v55 = vrot.slane %v2301_v26, 1 }
 0x2ce   : > { %v2306_v22 = vshll.u32 %v2112_v62, 16  ;;  %v2435_v30 = vrot.slane %v2112_v62, 1 }
 0x2cf   : > { %v1913_v1 = vmax.f32 %v1665_v51, 0.0  ;;  %v1666_v29 = vadd.f32 %v6140_v58, %v1605_v38  ;;  %v2304_v40 = vor.u32 %v2303_v55, %v2299_v53 }
 0x2d0   : > { %v2308_v54 = vrot.slane %v2306_v22, 1  ;;  %v7429_v21 = vsel %vm2388_vm3, %v2434_v20, %v2435_v30 }
 0x2d1   : > { %v2075_v2 = vsel %vm1751_vm1, %v1913_v1, 0.0  ;;  %v1914_v32 = vmax.f32 %v1666_v29, 0.0 }
 0x2d2   : > { %v1541_v18 = vpop.f32.mrb[232].mxu0  ;;  %v7434_v57 = vsel %vm2117_vm4, %v2304_v40, %v2308_v54 }
 0x2d3   : > { %v2113_v46 = vpack.c.bf16 %v1914_v32, %v2075_v2  ;;  %v4559_v12 = vpack.c.bf16 %v1914_v32, %v1913_v1  ;;  %v1606_v15 = vadd.f32 %v1541_v18, %v6964_v25  ;;  %v5631_v26 = vpop.f32.mrb[233].mxu0  ;;  %2846 = vmatprep.mubr.bf16.mxu1 %v7434_v57  ;;  %3819 = vmatprep.mubr.bf16.mxu0 %v7434_v57 }
 0x2d4   : > { %v1544_v62 = vpop.f32.mrb[234].mxu0  ;;  %4557 = vmatmul.mubr.msk.bf16.gmra.mrb[140].mxu1 %vm7045_vm6, %v7414_v61  ;;  %4743 = vmatmul.mubr.msk.bf16.gmra.mrb[36].mxu0 %vm7045_vm6, %v7414_v61  ;;  %v6110_v26 = vld [vmem:[%s8082_s4 + $0x48] sm:$0xff]  }
 0x2d5   : > { %v1667_v0 = vadd.f32 %v6140_v58, %v1606_v15  ;;  %v5632_v54 = vpop.f32.mrb[235].mxu0  ;;  %v2313_v56 = vshll.u32 %v2113_v46, 16  ;;  %v2311_v22 = vshrl.u32 %v2113_v46, 16  ;;  %v2437_v1 = vrot.slane %v2113_v46, 1  ;;  %v6109_v46 = vld [vmem:[%s8082_s4] sm:$0xff]  }
 0x2d6   : > { %v7451_v15 = vrot.slane %v6168_v47, 1  ;;  %v8094_v62 = vmov 0.0|0.0   ;;  %v6113_v54 = vld [vmem:[%s8082_s4 + $0x10] sm:$0xff]   ;;  %v6124_v47 = vld [vmem:[%s8082_s4 + $0x80] sm:$0xff]  }
 0x2d7   : > { %v1915_v51 = vmax.f32 %v1667_v0, 0.0  ;;  %v2315_v45 = vrot.slane %v2313_v56, 1  ;;  %v6112_v0 = vld [vmem:[%s8082_s4 + $0x50] sm:$0xff]   ;;  %v6114_v56 = vld [vmem:[%s8082_s4 + $0x58] sm:$0xff]  }
 0x2d9   : > { %v2077_v25 = vsel %vm1810_vm2, %v1915_v51, 0.0  ;;  %v2316_v2 = vor.u32 %v2315_v45, %v2311_v22  ;;  %v6115_v51 = vld [vmem:[%s8082_s4 + $0x18] sm:$0xff]   ;;  %v6118_v45 = vld [vmem:[%s8082_s4 + $0x68] sm:$0xff]  }
 0x2da   : > { %v2114_v38 = vpack.c.bf16 %v2077_v25, %v2077_v25  ;;  %v1549_v53 = vpop.f32.mrb[236].mxu0  ;;  %v6116_v25 = vld [vmem:[%s8082_s4 + $0x60] sm:$0xff]  }
 0x2db   : > { %v5635_v55 = vpop.f32.mrb[237].mxu0  ;;  %v6119_v53 = vld [vmem:[%s8082_s4 + $0x28] sm:$0xff]  }
 0x2dc   : > { %v2318_v20 = vshll.u32 %v2114_v38, 16  ;;  %v1552_v30 = vpop.f32.mrb[238].mxu0  ;;  %v2438_v29 = vrot.slane %v2114_v38, 1  ;;  %v6117_v38 = vld [vmem:[%s8082_s4 + $0x20] sm:$0xff]   ;;  %v6120_v55 = vld [vmem:[%s8082_s4 + $0x70] sm:$0xff]  }
 0x2dd   : > { %v5636_v40 = vpop.f32.mrb[239].mxu0 }
 0x2de   : > { %v2320_v32 = vrot.slane %v2318_v20, 1  ;;  %v7448_v58 = vsel %vm2388_vm3, %v2437_v1, %v2438_v29  ;;  %v6121_v20 = vld [vmem:[%s8082_s4 + $0x30] sm:$0xff]   ;;  %v6122_v1 = vld [vmem:[%s8082_s4 + $0x78] sm:$0xff]  }
 0x2df   : > { %8123 = vst [vmem:[#allocation9_spill] sm:$0xff] %v7448_v58 }
 0x2e0   : > { %v2321_v18 = vsel %vm2117_vm4, %v2316_v2, %v2320_v32 }
 0x2e1   : > { %2854 = vmatprep.mubr.bf16.mxu1 %v2321_v18  ;;  %3827 = vmatprep.mubr.bf16.mxu0 %v2321_v18  ;;  %v6123_v18 = vld [vmem:[%s8082_s4 + $0x38] sm:$0xff]  }
 0x2e2   : > { %4560 = vmatmul.mubr.msk.bf16.gmra.mrb[144].mxu1 %vm7045_vm6, %v4559_v12  ;;  %4746 = vmatmul.mubr.msk.bf16.gmra.mrb[40].mxu0 %vm7045_vm6, %v4559_v12  ;;  %v6111_v12 = vld [vmem:[%s8082_s4 + $0x8] sm:$0xff]  }
 0x2e3   : > { %5653 = vmatprep.mubr.bf16.mxu1 %v7039_v43  ;;  %3835 = vmatprep.mubr.bf16.mxu0 %v7451_v15 }
 0x2ea   : > { %5654 = vmatmul.mubr.bf16.vlgmr.msra.gmra.mrb[148].mxu1 %v7078_v9  ;;  %3836 = vmatmul.mubr.bf16.gmra.mrb[44].mxu0 %v8094_v62 }
 0x2eb   : > { %5657 = vmatprep.mubr.bf16.mxu1 %v7106_v60  ;;  %4994 = vmatpush3.bf16.msra.mxu1 %v6109_v46 }
 0x2ec   : > { %4995 = vmatprep.subr.bf16.mxu1 %v6110_v26 }
 0x2ef   : > { %4996 = vmatpush3.bf16.msra.mxu1 %v6111_v12 }
 0x2f0   : > { %4997 = vmatprep.subr.bf16.mxu1 %v6112_v0 }
 0x2f2   : > { %5658 = vmatmul.mubr.bf16.gmra.mrb[152].mxu1 %v7136_v7 }
 0x2f3   : > { %5661 = vmatprep.mubr.bf16.mxu1 %v7164_v27  ;;  %4998 = vmatpush3.bf16.msra.mxu1 %v6113_v54 }
 0x2f4   : > { %4999 = vmatprep.subr.bf16.mxu1 %v6114_v56 }
 0x2f7   : > { %5000 = vmatpush3.bf16.msra.mxu1 %v6115_v51 }
 0x2f8   : > { %5001 = vmatprep.subr.bf16.mxu1 %v6116_v25 }
 0x2fa   : > { %5662 = vmatmul.mubr.bf16.gmra.mrb[156].mxu1 %v7194_v37 }
 0x2fb   : > { %5665 = vmatprep.mubr.bf16.mxu1 %v7222_v39  ;;  %5002 = vmatpush3.bf16.msra.mxu1 %v6117_v38 }
 0x2fc   : > { %5003 = vmatprep.subr.bf16.mxu1 %v6118_v45 }
 0x2ff   : > { %v4873_v22 = vpop.f32.mrb[84].mxu1  ;;  %5004 = vmatpush3.bf16.msra.mxu1 %v6119_v53 }
 0x300   : > { %v4874_v30 = vpop.f32.mrb[85].mxu1  ;;  %5005 = vmatprep.subr.bf16.mxu1 %v6120_v55 }
 0x301   : > { %v7508_v29 = vadd.f32 %v4874_v30, %v4873_v22  ;;  %v4876_v40 = vpop.f32.mrb[86].mxu1 }
 0x302   : > { %v4877_v2 = vpop.f32.mrb[87].mxu1  ;;  %5666 = vmatmul.mubr.bf16.gmra.mrb[160].mxu1 %v7249_v48 }
 0x303   : > { %v7511_v32 = vadd.f32 %v4877_v2, %v4876_v40  ;;  %5669 = vmatprep.mubr.bf16.mxu1 %v7274_v13  ;;  %5006 = vmatpush3.bf16.msra.mxu1 %v6121_v20 }
 0x304   : > { %5007 = vmatprep.subr.bf16.mxu1 %v6122_v1 }
 0x307   : > { %5008 = vmatpush3.bf16.msra.mxu1 %v6123_v18 }
 0x308   : > { %5685 = vmatprep.subr.bf16.mxu1 %v6124_v47 }
 0x30a   : > { %5670 = vmatmul.mubr.bf16.gmra.mrb[164].mxu1 %v7301_v17 }
 0x30b   : > { %5673 = vmatprep.mubr.bf16.mxu1 %v7326_v8 }
 0x30d   : > { %v4879_v46 = vpop.f32.mrb[88].mxu1  ;;  %v5145_v26 = vpop.f32.mrb[240].mxu0 }
 0x30e   : > { %v4880_v12 = vpop.f32.mrb[89].mxu1  ;;  %v5146_v0 = vpop.f32.mrb[241].mxu0 }
 0x30f   : > { %v7522_v54 = vadd.f32 %v4880_v12, %v4879_v46  ;;  %v7524_v56 = vadd.f32 %v5146_v0, %v5145_v26  ;;  %v4882_v51 = vpop.f32.mrb[90].mxu1  ;;  %v5148_v25 = vpop.f32.mrb[242].mxu0 }
 0x310   : > { %v4883_v38 = vpop.f32.mrb[91].mxu1  ;;  %v5149_v45 = vpop.f32.mrb[243].mxu0 }
 0x311   : > { %v7526_v53 = vadd.f32 %v4883_v38, %v4882_v51  ;;  %v7528_v55 = vadd.f32 %v5149_v45, %v5148_v25 }
 0x312   : > { %5674 = vmatmul.mubr.bf16.gmra.mrb[168].mxu1 %v7353_v35 }
 0x313   : > { %5677 = vmatprep.mubr.bf16.mxu1 %v7378_v11 }
 0x317   : > { %v4885_v22 = vpop.f32.mrb[92].mxu1  ;;  %v5151_v20 = vpop.f32.mrb[244].mxu0 }
 0x318   : > { %v4886_v30 = vpop.f32.mrb[93].mxu1  ;;  %v5152_v1 = vpop.f32.mrb[245].mxu0 }
 0x319   : > { %v7532_v40 = vadd.f32 %v4886_v30, %v4885_v22  ;;  %v7534_v2 = vadd.f32 %v5152_v1, %v5151_v20  ;;  %v4888_v18 = vpop.f32.mrb[94].mxu1  ;;  %v5154_v46 = vpop.f32.mrb[246].mxu0 }
 0x31a   : > { %v4889_v26 = vpop.f32.mrb[95].mxu1  ;;  %5678 = vmatmul.mubr.bf16.gmra.mrb[172].mxu1 %v7407_v3  ;;  %v5155_v12 = vpop.f32.mrb[247].mxu0 }
 0x31b   : > { %v7537_v0 = vadd.f32 %v4889_v26, %v4888_v18  ;;  %v7539_v51 = vadd.f32 %v5155_v12, %v5154_v46  ;;  %5681 = vmatprep.mubr.bf16.mxu1 %v7429_v21  ;;  %v6125_v46 = vld [vmem:[%s8082_s4 + $0x88] sm:$0xff]  }
 0x322   : > { %5682 = vmatmul.mubr.bf16.gmra.mrb[176].mxu1 %v7448_v58 }
 0x323   : > { %3200 = vmatprep.mubr.bf16.mxu1 %v7451_v15  ;;  %v8127_v15 = vmov 0.0|0.0  }
 0x325   : > { %v4891_v25 = vpop.f32.mrb[96].mxu1  ;;  %v5157_v38 = vpop.f32.mrb[248].mxu0 }
 0x326   : > { %v4892_v45 = vpop.f32.mrb[97].mxu1  ;;  %v5158_v22 = vpop.f32.mrb[249].mxu0 }
 0x327   : > { %v7544_v20 = vadd.f32 %v4892_v45, %v4891_v25  ;;  %v7546_v30 = vadd.f32 %v5158_v22, %v5157_v38  ;;  %v4894_v1 = vpop.f32.mrb[98].mxu1  ;;  %v5160_v62 = vpop.f32.mrb[250].mxu0  ;;  %v6126_v25 = vld [vmem:[%s8082_s4 + $0x90] sm:$0xff]  }
 0x328   : > { %v4895_v18 = vpop.f32.mrb[99].mxu1  ;;  %v5161_v26 = vpop.f32.mrb[251].mxu0 }
 0x329   : > { %8124 = vst [vmem:[#allocation10_spill] sm:$0xff] %v7544_v20  ;;  %v7551_v12 = vadd.f32 %v4895_v18, %v4894_v1  ;;  %v7553_v58 = vadd.f32 %v5161_v26, %v5160_v62  ;;  %v6127_v62 = vld [vmem:[%s8082_s4 + $0x98] sm:$0xff]  }
 0x32a   : > { %3201 = vmatmul.mubr.bf16.vlgmr.msra.gmra.mrb[180].mxu1 %v8127_v15 }
 0x32b   : > { %8125 = vst [vmem:[#allocation11_spill] sm:$0xff] %v7551_v12  ;;  %8126 = vst [vmem:[#allocation12_spill] sm:$0xff] %v7553_v58  ;;  %3208 = vmatprep.mubr.bf16.mxu1 %v7050_v52  ;;  %5686 = vmatpush3.bf16.msra.mxu1 %v6124_v47 }
 0x32c   : > { %5687 = vmatprep.subr.bf16.mxu1 %v6125_v46 }
 0x32f   : > { %v4897_v38 = vpop.f32.mrb[100].mxu1  ;;  %v5163_v45 = vpop.f32.mrb[252].mxu0  ;;  %5688 = vmatpush3.bf16.msra.mxu1 %v6125_v46 }
 0x330   : > { %v4898_v22 = vpop.f32.mrb[101].mxu1  ;;  %v5164_v20 = vpop.f32.mrb[253].mxu0  ;;  %5689 = vmatprep.subr.bf16.mxu1 %v6126_v25 }
 0x331   : > { %v7563_v1 = vadd.f32 %v4898_v22, %v4897_v38  ;;  %v7565_v18 = vadd.f32 %v5164_v20, %v5163_v45  ;;  %v4900_v52 = vpop.f32.mrb[102].mxu1  ;;  %v5166_v47 = vpop.f32.mrb[254].mxu0  ;;  %v6128_v20 = vld [vmem:[%s8082_s4 + $0xa0] sm:$0xff]   ;;  %v6129_v38 = vld [vmem:[%s8082_s4 + $0xa8] sm:$0xff]  }
 0x332   : > { %v4901_v26 = vpop.f32.mrb[103].mxu1  ;;  %4587 = vmatmul.mubr.msk.bf16.gmra.mrb[184].mxu1 %vm7045_vm6, %v7031_v36  ;;  %v5167_v12 = vpop.f32.mrb[255].mxu0  ;;  %v6130_v36 = vld [vmem:[%s8082_s4 + $0xb0] sm:$0xff]  }
 0x333   : > { %v7570_v46 = vadd.f32 %v4901_v26, %v4900_v52  ;;  %v7572_v58 = vadd.f32 %v5167_v12, %v5166_v47  ;;  %3216 = vmatprep.mubr.bf16.mxu1 %v7084_v31  ;;  %5690 = vmatpush3.bf16.msra.mxu1 %v6126_v25 }
 0x334   : > { %5691 = vmatprep.subr.bf16.mxu1 %v6127_v62 }
 0x335   : > { %8128 = vst [vmem:[#allocation13_spill] sm:$0xff] %v7570_v46 }
 0x337   : > { %5692 = vmatpush3.bf16.msra.mxu1 %v6127_v62 }
 0x338   : > { %5693 = vmatprep.subr.bf16.mxu1 %v6128_v20 }
 0x33a   : > { %4590 = vmatmul.mubr.msk.bf16.gmra.mrb[188].mxu1 %vm7045_vm6, %v7055_v59 }
 0x33b   : > { %3224 = vmatprep.mubr.bf16.mxu1 %v7111_v10  ;;  %5694 = vmatpush3.bf16.msra.mxu1 %v6128_v20  ;;  %v6131_v10 = vld [vmem:[%s8082_s4 + $0xb8] sm:$0xff]  }
 0x33c   : > { %5695 = vmatprep.subr.bf16.mxu1 %v6129_v38 }
 0x33d   : > { %v4903_v31 = vpop.f32.mrb[104].mxu1  ;;  %v5169_v12 = vpop.f32.mrb[0].mxu0 }
 0x33e   : > { %v4904_v25 = vpop.f32.mrb[105].mxu1  ;;  %v5170_v45 = vpop.f32.mrb[1].mxu0 }
 0x33f   : > { %v7588_v22 = vadd.f32 %v4904_v25, %v4903_v31  ;;  %v7590_v62 = vadd.f32 %v5170_v45, %v5169_v12  ;;  %v4906_v52 = vpop.f32.mrb[106].mxu1  ;;  %v5172_v47 = vpop.f32.mrb[2].mxu0  ;;  %5696 = vmatpush3.bf16.msra.mxu1 %v6129_v38  ;;  %v7606_v38 = vld [vmem:[%s8082_s4 + $0x200] sm:$0xff]  }
 0x340   : > { %v4907_v59 = vpop.f32.mrb[107].mxu1  ;;  %v5173_v26 = vpop.f32.mrb[3].mxu0  ;;  %5697 = vmatprep.subr.bf16.mxu1 %v6130_v36 }
 0x341   : > { %v7595_v20 = vadd.f32 %v4907_v59, %v4906_v52  ;;  %v7597_v46 = vadd.f32 %v5173_v26, %v5172_v47 }
 0x342   : > { %4593 = vmatmul.mubr.msk.bf16.gmra.mrb[192].mxu1 %vm7045_vm6, %v7089_v5 }
 0x343   : > { %8129 = vst [vmem:[#allocation14_spill] sm:$0xff] %v7595_v20  ;;  %3232 = vmatprep.mubr.bf16.mxu1 %v7142_v14  ;;  %5698 = vmatpush3.bf16.msra.mxu1 %v6130_v36 }
 0x344   : > { %5699 = vmatprep.subr.bf16.mxu1 %v6131_v10 }
 0x347   : > { %v4909_v31 = vpop.f32.mrb[108].mxu1  ;;  %v5175_v12 = vpop.f32.mrb[4].mxu0  ;;  %5700 = vmatpush3.bf16.msra.mxu1 %v6131_v10 }
 0x348   : > { %v4910_v25 = vpop.f32.mrb[109].mxu1  ;;  %v5176_v45 = vpop.f32.mrb[5].mxu0  ;;  %5733 = vmatprep.subr.bf16.mxu1 %v7606_v38 }
 0x349   : > { %v7609_v52 = vadd.f32 %v4910_v25, %v4909_v31  ;;  %v7611_v47 = vadd.f32 %v5176_v45, %v5175_v12  ;;  %v4912_v5 = vpop.f32.mrb[110].mxu1  ;;  %v5178_v14 = vpop.f32.mrb[6].mxu0 }
 0x34a   : > { %v4913_v36 = vpop.f32.mrb[111].mxu1  ;;  %4596 = vmatmul.mubr.msk.bf16.gmra.mrb[196].mxu1 %vm7045_vm6, %v7116_v16  ;;  %v5179_v59 = vpop.f32.mrb[7].mxu0 }
 0x34b   : > { %v7616_v26 = vadd.f32 %v4913_v36, %v4912_v5  ;;  %v7618_v20 = vadd.f32 %v5179_v59, %v5178_v14  ;;  %3240 = vmatprep.mubr.bf16.mxu1 %v7169_v28 }
 0x34d   : > { %8130 = vst [vmem:[#allocation15_spill] sm:$0xff] %v7616_v26 }
 0x352   : > { %4599 = vmatmul.mubr.msk.bf16.gmra.mrb[200].mxu1 %vm7045_vm6, %v7144_v6 }
 0x353   : > { %3248 = vmatprep.mubr.bf16.mxu1 %v7200_v41 }
 0x355   : > { %v4915_v10 = vpop.f32.mrb[112].mxu1  ;;  %v5181_v31 = vpop.f32.mrb[8].mxu0 }
 0x356   : > { %v4916_v12 = vpop.f32.mrb[113].mxu1  ;;  %v5182_v25 = vpop.f32.mrb[9].mxu0 }
 0x357   : > { %v7625_v45 = vadd.f32 %v4916_v12, %v4915_v10  ;;  %v7627_v16 = vadd.f32 %v5182_v25, %v5181_v31  ;;  %v4918_v5 = vpop.f32.mrb[114].mxu1  ;;  %v5184_v36 = vpop.f32.mrb[10].mxu0 }
 0x358   : > { %v4919_v14 = vpop.f32.mrb[115].mxu1  ;;  %v5185_v59 = vpop.f32.mrb[11].mxu0 }
 0x359   : > { %8131 = vst [vmem:[#allocation16_spill] sm:$0xff] %v7625_v45  ;;  %8132 = vst [vmem:[#allocation17_spill] sm:$0xff] %v7627_v16  ;;  %v7629_v26 = vadd.f32 %v4919_v14, %v4918_v5  ;;  %v7631_v28 = vadd.f32 %v5185_v59, %v5184_v36  ;;  %v8135_v14 = vld [vmem:[#allocation2_spill] sm:$0xff] }
 0x35a   : > { %4602 = vmatmul.mubr.msk.bf16.gmra.mrb[204].mxu1 %vm7045_vm6, %v7174_v44 }
 0x35b   : > { %3256 = vmatprep.mubr.bf16.mxu1 %v7227_v34  ;;  %v8138_v34 = vld [vmem:[#allocation3_spill] sm:$0xff] }
 0x35f   : > { %v4921_v6 = vpop.f32.mrb[116].mxu1 }
 0x360   : > { %v5187_v41 = vpop.f32.mrb[12].mxu0  ;;  %v4922_v10 = vpop.f32.mrb[117].mxu1 }
 0x361   : > { %v5188_v12 = vpop.f32.mrb[13].mxu0  ;;  %v7637_v31 = vadd.f32 %v4922_v10, %v4921_v6  ;;  %v4924_v45 = vpop.f32.mrb[118].mxu1  ;;  %v8139_v6 = vld [vmem:[#allocation5_spill] sm:$0xff] }
 0x362   : > { %v7639_v25 = vadd.f32 %v5188_v12, %v5187_v41  ;;  %v5190_v16 = vpop.f32.mrb[14].mxu0  ;;  %v4925_v5 = vpop.f32.mrb[119].mxu1  ;;  %4605 = vmatmul.mubr.msk.bf16.gmra.mrb[208].mxu1 %vm7045_vm6, %v8135_v14 }
 0x363   : > { %8133 = vst [vmem:[#allocation18_spill] sm:$0xff] %v7637_v31  ;;  %v5191_v36 = vpop.f32.mrb[15].mxu0  ;;  %v7644_v59 = vadd.f32 %v4925_v5, %v4924_v45  ;;  %3264 = vmatprep.mubr.bf16.mxu1 %v7255_v4 }
 0x364   : > { %8134 = vst [vmem:[#allocation19_spill] sm:$0xff] %v7639_v25  ;;  %v7646_v44 = vadd.f32 %v5191_v36, %v5190_v16 }
 0x365   : > { %8136 = vst [vmem:[#allocation2_spill] sm:$0xff] %v7644_v59 }
 0x366   : > { %8137 = vst [vmem:[#allocation20_spill] sm:$0xff] %v7646_v44  ;;  %v8142_v44 = vld [vmem:[#allocation4_spill] sm:$0xff] }
 0x36a   : > { %4608 = vmatmul.mubr.msk.bf16.gmra.mrb[212].mxu1 %vm7045_vm6, %v8138_v34 }
 0x36b   : > { %3272 = vmatprep.mubr.bf16.mxu1 %v8139_v6 }
 0x36d   : > { %v4927_v41 = vpop.f32.mrb[120].mxu1  ;;  %v5193_v10 = vpop.f32.mrb[16].mxu0 }
 0x36e   : > { %v4928_v12 = vpop.f32.mrb[121].mxu1  ;;  %v5194_v31 = vpop.f32.mrb[17].mxu0 }
 0x36f   : > { %v7653_v25 = vadd.f32 %v4928_v12, %v4927_v41  ;;  %v7655_v14 = vadd.f32 %v5194_v31, %v5193_v10  ;;  %v4930_v45 = vpop.f32.mrb[122].mxu1  ;;  %v5196_v5 = vpop.f32.mrb[18].mxu0 }
 0x370   : > { %v4931_v16 = vpop.f32.mrb[123].mxu1  ;;  %v5197_v36 = vpop.f32.mrb[19].mxu0 }
 0x371   : > { %8140 = vst [vmem:[#allocation3_spill] sm:$0xff] %v7653_v25  ;;  %8141 = vst [vmem:[#allocation5_spill] sm:$0xff] %v7655_v14  ;;  %v7657_v59 = vadd.f32 %v4931_v16, %v4930_v45  ;;  %v7659_v4 = vadd.f32 %v5197_v36, %v5196_v5  ;;  %v8146_v36 = vld [vmem:[#allocation6_spill] sm:$0xff] }
 0x372   : > { %4611 = vmatmul.mubr.msk.bf16.gmra.mrb[216].mxu1 %vm7045_vm6, %v8142_v44 }
 0x373   : > { %3280 = vmatprep.mubr.bf16.mxu1 %v7307_v49  ;;  %v8145_v49 = vld [vmem:[#allocation7_spill] sm:$0xff] }
 0x377   : > { %v4933_v34 = vpop.f32.mrb[124].mxu1 }
 0x378   : > { %v5199_v6 = vpop.f32.mrb[20].mxu0  ;;  %v4934_v41 = vpop.f32.mrb[125].mxu1 }
 0x379   : > { %v5200_v12 = vpop.f32.mrb[21].mxu0  ;;  %v7665_v31 = vadd.f32 %v4934_v41, %v4933_v34  ;;  %v4936_v25 = vpop.f32.mrb[126].mxu1 }
 0x37a   : > { %v7667_v10 = vadd.f32 %v5200_v12, %v5199_v6  ;;  %v5202_v14 = vpop.f32.mrb[22].mxu0  ;;  %v4937_v45 = vpop.f32.mrb[127].mxu1  ;;  %4614 = vmatmul.mubr.msk.bf16.gmra.mrb[220].mxu1 %vm7045_vm6, %v7281_v33 }
 0x37b   : > { %8143 = vst [vmem:[#allocation4_spill] sm:$0xff] %v7665_v31  ;;  %v5203_v5 = vpop.f32.mrb[23].mxu0  ;;  %v7672_v16 = vadd.f32 %v4937_v45, %v4936_v25  ;;  %3288 = vmatprep.mubr.bf16.mxu1 %v8145_v49 }
 0x37c   : > { %v7674_v44 = vadd.f32 %v5203_v5, %v5202_v14 }
 0x37d   : > { %8144 = vst [vmem:[#allocation21_spill] sm:$0xff] %v7672_v16 }
 0x382   : > { %4617 = vmatmul.mubr.msk.bf16.gmra.mrb[224].mxu1 %vm7045_vm6, %v8146_v36 }
 0x383   : > { %3296 = vmatprep.mubr.bf16.mxu1 %v7359_v63 }
 0x385   : > { %v4939_v34 = vpop.f32.mrb[128].mxu1  ;;  %v5205_v6 = vpop.f32.mrb[24].mxu0 }
 0x386   : > { %v4940_v41 = vpop.f32.mrb[129].mxu1  ;;  %v5206_v12 = vpop.f32.mrb[25].mxu0 }
 0x387   : > { %v7681_v31 = vadd.f32 %v4940_v41, %v4939_v34  ;;  %v7683_v33 = vadd.f32 %v5206_v12, %v5205_v6  ;;  %v4942_v25 = vpop.f32.mrb[130].mxu1  ;;  %v5208_v45 = vpop.f32.mrb[26].mxu0 }
 0x388   : > { %v4943_v14 = vpop.f32.mrb[131].mxu1  ;;  %v5209_v5 = vpop.f32.mrb[27].mxu0 }
 0x389   : > { %8147 = vst [vmem:[#allocation7_spill] sm:$0xff] %v7681_v31  ;;  %8148 = vst [vmem:[#allocation6_spill] sm:$0xff] %v7683_v33  ;;  %v7685_v16 = vadd.f32 %v4943_v14, %v4942_v25  ;;  %v7687_v49 = vadd.f32 %v5209_v5, %v5208_v45 }
 0x38a   : > { %4620 = vmatmul.mubr.msk.bf16.gmra.mrb[228].mxu1 %vm7045_vm6, %v7333_v42 }
 0x38b   : > { %3304 = vmatprep.mubr.bf16.mxu1 %v7383_v50  ;;  %v8150_v50 = vld [vmem:[#allocation8_spill] sm:$0xff] }
 0x38f   : > { %v4945_v63 = vpop.f32.mrb[132].mxu1  ;;  %v5211_v36 = vpop.f32.mrb[28].mxu0 }
 0x390   : > { %v4946_v34 = vpop.f32.mrb[133].mxu1  ;;  %v5212_v41 = vpop.f32.mrb[29].mxu0 }
 0x391   : > { %v7693_v6 = vadd.f32 %v4946_v34, %v4945_v63  ;;  %v7695_v12 = vadd.f32 %v5212_v41, %v5211_v36  ;;  %v4948_v31 = vpop.f32.mrb[134].mxu1  ;;  %v5214_v33 = vpop.f32.mrb[30].mxu0 }
 0x392   : > { %v4949_v25 = vpop.f32.mrb[135].mxu1  ;;  %4623 = vmatmul.mubr.msk.bf16.gmra.mrb[232].mxu1 %vm7045_vm6, %v7361_v23  ;;  %v5215_v45 = vpop.f32.mrb[31].mxu0 }
 0x393   : > { %v7700_v14 = vadd.f32 %v4949_v25, %v4948_v31  ;;  %v7702_v42 = vadd.f32 %v5215_v45, %v5214_v33  ;;  %3312 = vmatprep.mubr.bf16.mxu1 %v7412_v19  ;;  %v7714_v33 = vrot.slane %v8127_v15, 1  ;;  %v6133_v15 = vld [vmem:[%s8082_s4 + $0x208] sm:$0xff]  }
 0x395   : > { %8149 = vst [vmem:[#allocation22_spill] sm:$0xff] %v7700_v14 }
 0x39a   : > { %4626 = vmatmul.mubr.msk.bf16.gmra.mrb[236].mxu1 %vm7045_vm6, %v8150_v50 }
 0x39b   : > { %3320 = vmatprep.mubr.bf16.mxu1 %v7434_v57 }
 0x39d   : > { %v4951_v5 = vpop.f32.mrb[136].mxu1  ;;  %v5217_v63 = vpop.f32.mrb[32].mxu0 }
 0x39e   : > { %v4952_v36 = vpop.f32.mrb[137].mxu1  ;;  %v5218_v34 = vpop.f32.mrb[33].mxu0 }
 0x39f   : > { %v7709_v41 = vadd.f32 %v4952_v36, %v4951_v5  ;;  %v7711_v23 = vadd.f32 %v5218_v34, %v5217_v63  ;;  %v4954_v31 = vpop.f32.mrb[138].mxu1  ;;  %v5220_v25 = vpop.f32.mrb[34].mxu0 }
 0x3a0   : > { %v4955_v19 = vpop.f32.mrb[139].mxu1  ;;  %v5221_v45 = vpop.f32.mrb[35].mxu0 }
 0x3a1   : > { %v7716_v14 = vadd.f32 %v4955_v19, %v4954_v31  ;;  %v7718_v50 = vadd.f32 %v5221_v45, %v5220_v25 }
 0x3a2   : > { %4629 = vmatmul.mubr.msk.bf16.gmra.mrb[240].mxu1 %vm7045_vm6, %v7414_v61 }
 0x3a3   : > { %8151 = vst [vmem:[#allocation8_spill] sm:$0xff] %v7716_v14  ;;  %5701 = vmatprep.mubr.bf16.mxu1 %v7714_v33 }
 0x3a7   : > { %v4957_v57 = vpop.f32.mrb[140].mxu1  ;;  %v5223_v5 = vpop.f32.mrb[36].mxu0 }
 0x3a8   : > { %v4958_v63 = vpop.f32.mrb[141].mxu1  ;;  %v5224_v36 = vpop.f32.mrb[37].mxu0 }
 0x3a9   : > { %v7727_v34 = vadd.f32 %v4958_v63, %v4957_v57  ;;  %v7729_v31 = vadd.f32 %v5224_v36, %v5223_v5  ;;  %v4960_v25 = vpop.f32.mrb[142].mxu1  ;;  %v5226_v19 = vpop.f32.mrb[38].mxu0  ;;  %v6134_v57 = vld [vmem:[%s8082_s4 + $0x210] sm:$0xff]  }
 0x3aa   : > { %v4961_v45 = vpop.f32.mrb[143].mxu1  ;;  %5702 = vmatmul.mubr.bf16.vlgmr.msra.gmra.mrb[148].mxu1 %v7039_v43  ;;  %v5227_v24 = vpop.f32.mrb[39].mxu0  ;;  %v6135_v43 = vld [vmem:[%s8082_s4 + $0x218] sm:$0xff]  }
 0x3ab   : > { %8152 = vst [vmem:[#allocation23_spill] sm:$0xff] %v7727_v34  ;;  %8153 = vst [vmem:[#allocation24_spill] sm:$0xff] %v7729_v31  ;;  %v7732_v61 = vadd.f32 %v4961_v45, %v4960_v25  ;;  %v7734_v14 = vadd.f32 %v5227_v24, %v5226_v19  ;;  %5705 = vmatprep.mubr.bf16.mxu1 %v7078_v9  ;;  %5734 = vmatpush3.bf16.msra.mxu1 %v7606_v38  ;;  %v6136_v38 = vld [vmem:[%s8082_s4 + $0x220] sm:$0xff]  }
 0x3ac   : > { %5735 = vmatprep.subr.bf16.mxu1 %v6133_v15 }
 0x3ad   : > { %8154 = vst [vmem:[#allocation25_spill] sm:$0xff] %v7732_v61  ;;  %8155 = vst [vmem:[#allocation26_spill] sm:$0xff] %v7734_v14 }
 0x3af   : > { %5736 = vmatpush3.bf16.msra.mxu1 %v6133_v15 }
 0x3b0   : > { %5737 = vmatprep.subr.bf16.mxu1 %v6134_v57 }
 0x3b2   : > { %5706 = vmatmul.mubr.bf16.gmra.mrb[152].mxu1 %v7106_v60 }
 0x3b3   : > { %5709 = vmatprep.mubr.bf16.mxu1 %v7136_v7  ;;  %5738 = vmatpush3.bf16.msra.mxu1 %v6134_v57  ;;  %v6137_v57 = vld [vmem:[%s8082_s4 + $0x228] sm:$0xff]  }
 0x3b4   : > { %5739 = vmatprep.subr.bf16.mxu1 %v6135_v43 }
 0x3b5   : > { %v4963_v5 = vpop.f32.mrb[144].mxu1  ;;  %v5229_v63 = vpop.f32.mrb[40].mxu0 }
 0x3b6   : > { %v4964_v36 = vpop.f32.mrb[145].mxu1  ;;  %v5230_v25 = vpop.f32.mrb[41].mxu0 }
 0x3b7   : > { %v7749_v15 = vadd.f32 %v4964_v36, %v4963_v5  ;;  %v7751_v19 = vadd.f32 %v5230_v25, %v5229_v63  ;;  %v4966_v45 = vpop.f32.mrb[146].mxu1  ;;  %v5232_v24 = vpop.f32.mrb[42].mxu0  ;;  %5740 = vmatpush3.bf16.msra.mxu1 %v6135_v43  ;;  %v6138_v43 = vld [vmem:[%s8082_s4 + $0x230] sm:$0xff]   ;;  %v6139_v5 = vld [vmem:[%s8082_s4 + $0x238] sm:$0xff]  }
 0x3b8   : > { %v4967_v61 = vpop.f32.mrb[147].mxu1  ;;  %v5233_v34 = vpop.f32.mrb[43].mxu0  ;;  %5741 = vmatprep.subr.bf16.mxu1 %v6136_v38 }
 0x3b9   : > { %v7756_v14 = vadd.f32 %v4967_v61, %v4966_v45  ;;  %v7758_v31 = vadd.f32 %v5233_v34, %v5232_v24 }
 0x3ba   : > { %5710 = vmatmul.mubr.bf16.gmra.mrb[156].mxu1 %v7164_v27 }
 0x3bb   : > { %5713 = vmatprep.mubr.bf16.mxu1 %v7194_v37  ;;  %5742 = vmatpush3.bf16.msra.mxu1 %v6136_v38 }
 0x3bc   : > { %5743 = vmatprep.subr.bf16.mxu1 %v6137_v57 }
 0x3bd   : > { %v5235_v34 = vpop.f32.mrb[44].mxu0 }
 0x3be   : > { %v5236_v61 = vpop.f32.mrb[45].mxu0 }
 0x3bf   : > { %5744 = vmatpush3.bf16.msra.mxu1 %v6137_v57  ;;  %v7783_v38 = vadd.f32 %v5236_v61, %v5235_v34  ;;  %v5238_v63 = vpop.f32.mrb[46].mxu0 }
 0x3c0   : > { %5745 = vmatprep.subr.bf16.mxu1 %v6138_v43  ;;  %v5239_v36 = vpop.f32.mrb[47].mxu0 }
 0x3c1   : > { %v7786_v25 = vadd.f32 %v5239_v36, %v5238_v63 }
 0x3c2   : > { %5714 = vmatmul.mubr.bf16.gmra.mrb[160].mxu1 %v7222_v39 }
 0x3c3   : > { %5717 = vmatprep.mubr.bf16.mxu1 %v7249_v48  ;;  %5746 = vmatpush3.bf16.msra.mxu1 %v6138_v43 }
 0x3c4   : > { %5747 = vmatprep.subr.bf16.mxu1 %v6139_v5 }
 0x3c7   : > { %5748 = vmatpush3.bf16.msra.mxu1 %v6139_v5 }
 0x3ca   : > { %5718 = vmatmul.mubr.bf16.gmra.mrb[164].mxu1 %v7274_v13 }
 0x3cb   : > { %5721 = vmatprep.mubr.bf16.mxu1 %v7301_v17 }
 0x3d2   : > { %5722 = vmatmul.mubr.bf16.gmra.mrb[168].mxu1 %v7326_v8 }
 0x3d3   : > { %5725 = vmatprep.mubr.bf16.mxu1 %v7353_v35 }
 0x3da   : > { %5726 = vmatmul.mubr.bf16.gmra.mrb[172].mxu1 %v7378_v11 }
 0x3db   : > { %5729 = vmatprep.mubr.bf16.mxu1 %v7407_v3 }
 0x3e2   : > { %5730 = vmatmul.mubr.bf16.gmra.mrb[176].mxu1 %v7429_v21 }
 0x3e3   : > { %5749 = vmatprep.mubr.bf16.mxu1 %v7078_v9 }
 0x3ea   : > { %5750 = vmatmul.mubr.bf16.vlgmr.msra.gmra.mrb[148].mxu1 %v7106_v60 }
 0x3eb   : > { %5753 = vmatprep.mubr.bf16.mxu1 %v7136_v7 }
 0x3f2   : > { %5754 = vmatmul.mubr.bf16.gmra.mrb[152].mxu1 %v7164_v27 }
 0x3f3   : > { %5757 = vmatprep.mubr.bf16.mxu1 %v7194_v37 }
 0x3fa   : > { %5758 = vmatmul.mubr.bf16.gmra.mrb[156].mxu1 %v7222_v39 }
 0x3fb   : > { %5761 = vmatprep.mubr.bf16.mxu1 %v7249_v48 }
 0x3fd   : > { %v5009_v9 = vpop.f32.mrb[180].mxu1 }
 0x3fe   : > { %v5010_v60 = vpop.f32.mrb[181].mxu1 }
 0x3ff   : > { %v5011_v45 = vadd.f32 %v5010_v60, %v5009_v9  ;;  %v5012_v7 = vpop.f32.mrb[182].mxu1 }
 0x400   : > { %v5013_v24 = vpop.f32.mrb[183].mxu1 }
 0x401   : > { %v5800_v27 = vadd.f32 %v5011_v45, %v7508_v29  ;;  %v5014_v37 = vadd.f32 %v5013_v24, %v5012_v7 }
 0x402   : > { %5762 = vmatmul.mubr.bf16.gmra.mrb[160].mxu1 %v7274_v13 }
 0x403   : > { %v5806_v39 = vadd.f32 %v5014_v37, %v7511_v32  ;;  %5765 = vmatprep.mubr.bf16.mxu1 %v7301_v17  ;;  %v7793_v57 = vadd.f32 %v5800_v27, %v7524_v56 }
 0x405   : > { %v5015_v48 = vpop.f32.mrb[184].mxu1  ;;  %v7796_v43 = vadd.f32 %v5806_v39, %v7528_v55 }
 0x406   : > { %v5016_v5 = vpop.f32.mrb[185].mxu1 }
 0x407   : > { %v5017_v34 = vadd.f32 %v5016_v5, %v5015_v48  ;;  %v5018_v61 = vpop.f32.mrb[186].mxu1  ;;  %v8157_v48 = vld [vmem:[#allocation10_spill] sm:$0xff] }
 0x408   : > { %v5019_v63 = vpop.f32.mrb[187].mxu1 }
 0x409   : > { %v5797_v29 = vadd.f32 %v5017_v34, %v7522_v54  ;;  %v5020_v36 = vadd.f32 %v5019_v63, %v5018_v61  ;;  %v8159_v34 = vld [vmem:[#allocation9_spill] sm:$0xff] }
 0x40a   : > { %5766 = vmatmul.mubr.bf16.gmra.mrb[164].mxu1 %v7326_v8 }
 0x40b   : > { %v5803_v13 = vadd.f32 %v5020_v36, %v7526_v53  ;;  %5769 = vmatprep.mubr.bf16.mxu1 %v7353_v35  ;;  %v7803_v17 = vadd.f32 %v5797_v29, %v7534_v2  ;;  %v8156_v2 = vld [vmem:[#allocation12_spill] sm:$0xff] }
 0x40d   : > { %v5021_v32 = vpop.f32.mrb[188].mxu1  ;;  %v7806_v56 = vadd.f32 %v5803_v13, %v7539_v51 }
 0x40e   : > { %v5022_v55 = vpop.f32.mrb[189].mxu1 }
 0x40f   : > { %v5023_v9 = vadd.f32 %v5022_v55, %v5021_v32  ;;  %v5024_v60 = vpop.f32.mrb[190].mxu1 }
 0x410   : > { %v5025_v45 = vpop.f32.mrb[191].mxu1 }
 0x411   : > { %v5812_v54 = vadd.f32 %v5023_v9, %v7532_v40  ;;  %v5026_v7 = vadd.f32 %v5025_v45, %v5024_v60 }
 0x412   : > { %5770 = vmatmul.mubr.bf16.gmra.mrb[168].mxu1 %v7378_v11  ;;  %v8158_v11 = vld [vmem:[#allocation11_spill] sm:$0xff] }
 0x413   : > { %v5818_v8 = vadd.f32 %v5026_v7, %v7537_v0  ;;  %5773 = vmatprep.mubr.bf16.mxu1 %v7407_v3  ;;  %v7813_v35 = vadd.f32 %v5812_v54, %v7546_v30 }
 0x415   : > { %v5027_v53 = vpop.f32.mrb[192].mxu1  ;;  %v7816_v51 = vadd.f32 %v5818_v8, %v8156_v2 }
 0x416   : > { %v5028_v24 = vpop.f32.mrb[193].mxu1 }
 0x417   : > { %v5029_v27 = vadd.f32 %v5028_v24, %v5027_v53  ;;  %v5030_v37 = vpop.f32.mrb[194].mxu1 }
 0x418   : > { %v5031_v39 = vpop.f32.mrb[195].mxu1 }
 0x419   : > { %v5809_v40 = vadd.f32 %v5029_v27, %v8157_v48  ;;  %v5032_v5 = vadd.f32 %v5031_v39, %v5030_v37 }
 0x41a   : > { %5774 = vmatmul.mubr.bf16.gmra.mrb[172].mxu1 %v7429_v21  ;;  %v8160_v21 = vld [vmem:[#allocation13_spill] sm:$0xff] }
 0x41b   : > { %v5815_v0 = vadd.f32 %v5032_v5, %v8158_v11  ;;  %5777 = vmatprep.mubr.bf16.mxu1 %v8159_v34  ;;  %v7823_v3 = vadd.f32 %v5809_v40, %v7565_v18  ;;  %v8162_v11 = vld [vmem:[#allocation15_spill] sm:$0xff] }
 0x41d   : > { %v5033_v30 = vpop.f32.mrb[196].mxu1  ;;  %v7826_v61 = vadd.f32 %v5815_v0, %v7572_v58 }
 0x41e   : > { %v5034_v63 = vpop.f32.mrb[197].mxu1 }
 0x41f   : > { %v5035_v29 = vadd.f32 %v5034_v63, %v5033_v30  ;;  %v5036_v36 = vpop.f32.mrb[198].mxu1 }
 0x420   : > { %v5037_v13 = vpop.f32.mrb[199].mxu1 }
 0x421   : > { %v5824_v32 = vadd.f32 %v5035_v29, %v7563_v1  ;;  %v5038_v55 = vadd.f32 %v5037_v13, %v5036_v36  ;;  %v8161_v1 = vld [vmem:[#allocation14_spill] sm:$0xff]  ;;  %v8164_v13 = vld [vmem:[#allocation16_spill] sm:$0xff] }
 0x422   : > { %5778 = vmatmul.mubr.bf16.gmra.mrb[176].mxu1 %v7714_v33 }
 0x423   : > { %v5830_v9 = vadd.f32 %v5038_v55, %v8160_v21  ;;  %v7832_v60 = vadd.f32 %v5824_v32, %v7590_v62 }
 0x425   : > { %v5039_v18 = vpop.f32.mrb[200].mxu1  ;;  %v7835_v45 = vadd.f32 %v5830_v9, %v7597_v46 }
 0x426   : > { %v5040_v58 = vpop.f32.mrb[201].mxu1 }
 0x427   : > { %v5041_v54 = vadd.f32 %v5040_v58, %v5039_v18  ;;  %v5042_v7 = vpop.f32.mrb[202].mxu1  ;;  %v8166_v58 = vld [vmem:[#allocation20_spill] sm:$0xff] }
 0x428   : > { %v5043_v8 = vpop.f32.mrb[203].mxu1 }
 0x429   : > { %v5821_v53 = vadd.f32 %v5041_v54, %v7588_v22  ;;  %v5044_v2 = vadd.f32 %v5043_v8, %v5042_v7  ;;  %v8163_v22 = vld [vmem:[#allocation17_spill] sm:$0xff] }
 0x42b   : > { %v5827_v24 = vadd.f32 %v5044_v2, %v8161_v1  ;;  %v7840_v33 = vadd.f32 %v5821_v53, %v7611_v47  ;;  %v8167_v2 = vld [vmem:[#allocation18_spill] sm:$0xff] }
 0x42d   : > { %v5045_v27 = vpop.f32.mrb[204].mxu1  ;;  %v7843_v62 = vadd.f32 %v5827_v24, %v7618_v20 }
 0x42e   : > { %v5046_v37 = vpop.f32.mrb[205].mxu1 }
 0x42f   : > { %v5047_v39 = vadd.f32 %v5046_v37, %v5045_v27  ;;  %v5048_v46 = vpop.f32.mrb[206].mxu1  ;;  %v8168_v27 = vld [vmem:[#allocation2_spill] sm:$0xff] }
 0x430   : > { %v5049_v48 = vpop.f32.mrb[207].mxu1 }
 0x431   : > { %v5836_v40 = vadd.f32 %v5047_v39, %v7609_v52  ;;  %v5050_v5 = vadd.f32 %v5049_v48, %v5048_v46  ;;  %v8165_v52 = vld [vmem:[#allocation19_spill] sm:$0xff]  ;;  %v8169_v39 = vld [vmem:[#allocation5_spill] sm:$0xff] }
 0x433   : > { %v5842_v0 = vadd.f32 %v5050_v5, %v8162_v11  ;;  %v7848_v34 = vadd.f32 %v5836_v40, %v8163_v22  ;;  %v8170_v22 = vld [vmem:[#allocation3_spill] sm:$0xff] }
 0x435   : > { %v5051_v30 = vpop.f32.mrb[208].mxu1  ;;  %v7851_v47 = vadd.f32 %v5842_v0, %v7631_v28 }
 0x436   : > { %v5052_v63 = vpop.f32.mrb[209].mxu1 }
 0x437   : > { %v5053_v29 = vadd.f32 %v5052_v63, %v5051_v30  ;;  %v5054_v20 = vpop.f32.mrb[210].mxu1 }
 0x438   : > { %v5055_v36 = vpop.f32.mrb[211].mxu1 }
 0x439   : > { %v5833_v32 = vadd.f32 %v5053_v29, %v8164_v13  ;;  %v5056_v55 = vadd.f32 %v5055_v36, %v5054_v20 }
 0x43b   : > { %v5839_v21 = vadd.f32 %v5056_v55, %v7629_v26  ;;  %v7856_v9 = vadd.f32 %v5833_v32, %v8165_v52  ;;  %v8171_v52 = vld [vmem:[#allocation4_spill] sm:$0xff] }
 0x43d   : > { %v5057_v18 = vpop.f32.mrb[212].mxu1  ;;  %v7859_v54 = vadd.f32 %v5839_v21, %v8166_v58 }
 0x43e   : > { %v5058_v7 = vpop.f32.mrb[213].mxu1 }
 0x43f   : > { %v5059_v8 = vadd.f32 %v5058_v7, %v5057_v18  ;;  %v5060_v28 = vpop.f32.mrb[214].mxu1  ;;  %v8172_v7 = vld [vmem:[#allocation21_spill] sm:$0xff] }
 0x440   : > { %v5061_v53 = vpop.f32.mrb[215].mxu1 }
 0x441   : > { %v5848_v1 = vadd.f32 %v5059_v8, %v8167_v2  ;;  %v5062_v24 = vadd.f32 %v5061_v53, %v5060_v28  ;;  %v8173_v28 = vld [vmem:[#allocation6_spill] sm:$0xff] }
 0x443   : > { %v5854_v37 = vadd.f32 %v5062_v24, %v8168_v27  ;;  %v7864_v46 = vadd.f32 %v5848_v1, %v8169_v39  ;;  %v8174_v27 = vld [vmem:[#allocation7_spill] sm:$0xff] }
 0x445   : > { %v5063_v26 = vpop.f32.mrb[216].mxu1  ;;  %v7867_v48 = vadd.f32 %v5854_v37, %v7659_v4 }
 0x446   : > { %v5064_v40 = vpop.f32.mrb[217].mxu1 }
 0x447   : > { %v5065_v5 = vadd.f32 %v5064_v40, %v5063_v26  ;;  %v5066_v11 = vpop.f32.mrb[218].mxu1 }
 0x448   : > { %v5067_v0 = vpop.f32.mrb[219].mxu1 }
 0x449   : > { %v5845_v30 = vadd.f32 %v5065_v5, %v8170_v22  ;;  %v5068_v63 = vadd.f32 %v5067_v0, %v5066_v11 }
 0x44b   : > { %v5851_v29 = vadd.f32 %v5068_v63, %v7657_v59  ;;  %v7872_v20 = vadd.f32 %v5845_v30, %v7667_v10 }
 0x44d   : > { %v5069_v36 = vpop.f32.mrb[220].mxu1  ;;  %v7875_v13 = vadd.f32 %v5851_v29, %v7674_v44 }
 0x44e   : > { %v5070_v32 = vpop.f32.mrb[221].mxu1 }
 0x44f   : > { %v5071_v55 = vadd.f32 %v5070_v32, %v5069_v36  ;;  %v5072_v4 = vpop.f32.mrb[222].mxu1  ;;  %v8175_v36 = vld [vmem:[#allocation22_spill] sm:$0xff] }
 0x450   : > { %v5073_v21 = vpop.f32.mrb[223].mxu1 }
 0x451   : > { %v5860_v18 = vadd.f32 %v5071_v55, %v8171_v52  ;;  %v5074_v58 = vadd.f32 %v5073_v21, %v5072_v4 }
 0x453   : > { %v5866_v8 = vadd.f32 %v5074_v58, %v8172_v7  ;;  %v7880_v53 = vadd.f32 %v5860_v18, %v8173_v28  ;;  %v8176_v7 = vld [vmem:[#allocation8_spill] sm:$0xff] }
 0x455   : > { %v5075_v59 = vpop.f32.mrb[224].mxu1  ;;  %v7883_v10 = vadd.f32 %v5866_v8, %v7687_v49 }
 0x456   : > { %v5076_v2 = vpop.f32.mrb[225].mxu1 }
 0x457   : > { %v5077_v1 = vadd.f32 %v5076_v2, %v5075_v59  ;;  %v5078_v44 = vpop.f32.mrb[226].mxu1  ;;  %v8178_v2 = vld [vmem:[#allocation26_spill] sm:$0xff] }
 0x458   : > { %v5079_v24 = vpop.f32.mrb[227].mxu1 }
 0x459   : > { %v5857_v37 = vadd.f32 %v5077_v1, %v8174_v27  ;;  %v5080_v39 = vadd.f32 %v5079_v24, %v5078_v44  ;;  %v8179_v27 = vld [vmem:[#allocation23_spill] sm:$0xff] }
 0x45b   : > { %v5863_v26 = vadd.f32 %v5080_v39, %v7685_v16  ;;  %v7888_v40 = vadd.f32 %v5857_v37, %v7695_v12 }
 0x45d   : > { %v5081_v5 = vpop.f32.mrb[228].mxu1  ;;  %v7891_v11 = vadd.f32 %v5863_v26, %v7702_v42  ;;  %v8180_v26 = vld [vmem:[#allocation25_spill] sm:$0xff] }
 0x45e   : > { %v5082_v0 = vpop.f32.mrb[229].mxu1 }
 0x45f   : > { %v5083_v22 = vadd.f32 %v5082_v0, %v5081_v5  ;;  %v5084_v49 = vpop.f32.mrb[230].mxu1 }
 0x460   : > { %v5085_v30 = vpop.f32.mrb[231].mxu1 }
 0x461   : > { %v5872_v63 = vadd.f32 %v5083_v22, %v7693_v6  ;;  %v5086_v29 = vadd.f32 %v5085_v30, %v5084_v49  ;;  %v8177_v6 = vld [vmem:[#allocation24_spill] sm:$0xff] }
 0x463   : > { %v5878_v32 = vadd.f32 %v5086_v29, %v8175_v36  ;;  %v7896_v55 = vadd.f32 %v5872_v63, %v7711_v23 }
 0x465   : > { %v5087_v16 = vpop.f32.mrb[232].mxu1  ;;  %v7899_v12 = vadd.f32 %v5878_v32, %v7718_v50 }
 0x466   : > { %v5088_v4 = vpop.f32.mrb[233].mxu1 }
 0x467   : > { %v5089_v21 = vadd.f32 %v5088_v4, %v5087_v16  ;;  %v5090_v42 = vpop.f32.mrb[234].mxu1 }
 0x468   : > { %v5091_v52 = vpop.f32.mrb[235].mxu1 }
 0x469   : > { %v5869_v18 = vadd.f32 %v5089_v21, %v7709_v41  ;;  %v5092_v58 = vadd.f32 %v5091_v52, %v5090_v42 }
 0x46b   : > { %v5875_v8 = vadd.f32 %v5092_v58, %v8176_v7  ;;  %v7904_v28 = vadd.f32 %v5869_v18, %v8177_v6  ;;  %v4076_v18 = vld [vmem:[%s7929_s7] sm:$0xff]  ;;  %v4079_v6 = vld [vmem:[%s7929_s7 + $0x18] sm:$0xff] }
 0x46d   : > { %v5093_v59 = vpop.f32.mrb[236].mxu1  ;;  %v7907_v23 = vadd.f32 %v5875_v8, %v8178_v2 }
 0x46e   : > { %v5094_v1 = vpop.f32.mrb[237].mxu1 }
 0x46f   : > { %v5095_v44 = vadd.f32 %v5094_v1, %v5093_v59  ;;  %v5096_v50 = vpop.f32.mrb[238].mxu1 }
 0x470   : > { %v5097_v24 = vpop.f32.mrb[239].mxu1 }
 0x471   : > { %v5884_v37 = vadd.f32 %v5095_v44, %v8179_v27  ;;  %v5098_v39 = vadd.f32 %v5097_v24, %v5096_v50 }
 0x473   : > { %v5890_v41 = vadd.f32 %v5098_v39, %v8180_v26  ;;  %v7912_v5 = vadd.f32 %v5884_v37, %v7751_v19 }
 0x475   : > { %v5099_v0 = vpop.f32.mrb[240].mxu1  ;;  %v7915_v22 = vadd.f32 %v5890_v41, %v7758_v31 }
 0x476   : > { %v5100_v49 = vpop.f32.mrb[241].mxu1 }
 0x477   : > { %v5101_v30 = vadd.f32 %v5100_v49, %v5099_v0  ;;  %v5102_v63 = vpop.f32.mrb[242].mxu1  ;;  %v4082_v0 = vld [vmem:[%s7929_s7 + $0x30] sm:$0xff] }
 0x478   : > { %v5103_v29 = vpop.f32.mrb[243].mxu1 }
 0x479   : > { %v5881_v36 = vadd.f32 %v5101_v30, %v7749_v15  ;;  %v5104_v32 = vadd.f32 %v5103_v29, %v5102_v63  ;;  %v4080_v29 = vld [vmem:[%s7929_s7 + $0x20] sm:$0xff] }
 0x47b   : > { %v5887_v16 = vadd.f32 %v5104_v32, %v7756_v14  ;;  %v7920_v4 = vadd.f32 %v5881_v36, %v7783_v38  ;;  %v7934_v14 = vld [vmem:[%s8083_s5] ss:$0 sm:$0xff]  ;;  %v4078_v38 = vld [vmem:[%s7929_s7 + $0x10] sm:$0xff] }
 0x47d   : > { %v7923_v21 = vadd.f32 %v5887_v16, %v7786_v25 }
 0x4bd   : > { %v5751_v31 = vpop.f32.mrb[148].mxu1 }
 0x4be   : > { %v5799_v15 = vadd.f32 %v7803_v17, %v5751_v31  ;;  %v3878_v19 = vpop.f32.mrb[149].mxu1  ;;  %v4077_v17 = vld [vmem:[%s7929_s7 + $0x8] sm:$0xff] }
 0x4bf   : > { %v5802_v25 = vadd.f32 %v7793_v57, %v3878_v19  ;;  %v5752_v42 = vpop.f32.mrb[150].mxu1  ;;  %v4081_v19 = vld [vmem:[%s7929_s7 + $0x28] sm:$0xff] }
 0x4c0   : > { %v4046_v52 = vadd.f32 %v5799_v15, %v7934_v14  ;;  %v5805_v58 = vadd.f32 %v7806_v56, %v5752_v42  ;;  %v3881_v7 = vpop.f32.mrb[151].mxu1 }
 0x4c1   : > { %v4044_v8 = vadd.f32 %v5802_v25, %v7934_v14  ;;  %v5808_v59 = vadd.f32 %v7796_v43, %v3881_v7 }
 0x4c2   : > { %v4110_v2 = vadd.f32 %v4078_v38, %v4046_v52  ;;  %v4047_v1 = vadd.f32 %v5805_v58, %v7934_v14 }
 0x4c3   : > { %v4108_v57 = vadd.f32 %v4076_v18, %v4044_v8  ;;  %v4045_v56 = vadd.f32 %v5808_v59, %v7934_v14  ;;  %v4086_v59 = vld [vmem:[%s7929_s7 + $0x50] sm:$0xff] }
 0x4c4   : > { %v4142_v44 = vmax.f32 %v4110_v2, 0.0  ;;  %v4111_v50 = vadd.f32 %v4079_v6, %v4047_v1 }
 0x4c5   : > { %v4140_v43 = vmax.f32 %v4108_v57, 0.0  ;;  %v4109_v24 = vadd.f32 %v4077_v17, %v4045_v56  ;;  %v5755_v27 = vpop.f32.mrb[152].mxu1  ;;  %v4084_v57 = vld [vmem:[%s7929_s7 + $0x40] sm:$0xff] }
 0x4c6   : > { %4174 = vst [vmem:[%s7950_s12 + $0x10] sm:$0xff] %v4142_v44  ;;  %v4143_v37 = vmax.f32 %v4111_v50, 0.0  ;;  %v5811_v39 = vadd.f32 %v7823_v3, %v5755_v27  ;;  %v3894_v26 = vpop.f32.mrb[153].mxu1  ;;  %v4083_v3 = vld [vmem:[%s7929_s7 + $0x38] sm:$0xff]  ;;  %v4085_v27 = vld [vmem:[%s7929_s7 + $0x48] sm:$0xff] }
 0x4c7   : > { %4172 = vst [vmem:[%s7950_s12] sm:$0xff] %v4140_v43  ;;  %v4141_v41 = vmax.f32 %v4109_v24, 0.0  ;;  %v5814_v49 = vadd.f32 %v7813_v35, %v3894_v26  ;;  %v5756_v30 = vpop.f32.mrb[154].mxu1 }
 0x4c8   : > { %4175 = vst [vmem:[%s7950_s12 + $0x18] sm:$0xff] %v4143_v37  ;;  %v4050_v63 = vadd.f32 %v5811_v39, %v7934_v14  ;;  %v5817_v36 = vadd.f32 %v7826_v61, %v5756_v30  ;;  %v3897_v32 = vpop.f32.mrb[155].mxu1 }
 0x4c9   : > { %4173 = vst [vmem:[%s7950_s12 + $0x8] sm:$0xff] %v4141_v41  ;;  %v4048_v16 = vadd.f32 %v5814_v49, %v7934_v14  ;;  %v5820_v31 = vadd.f32 %v7816_v51, %v3897_v32 }
 0x4ca   : > { %v4114_v15 = vadd.f32 %v4082_v0, %v4050_v63  ;;  %v4051_v35 = vadd.f32 %v5817_v36, %v7934_v14  ;;  %v4090_v36 = vld [vmem:[%s7929_s7 + $0x70] sm:$0xff] }
 0x4cb   : > { %v4112_v38 = vadd.f32 %v4080_v29, %v4048_v16  ;;  %v4049_v25 = vadd.f32 %v5820_v31, %v7934_v14  ;;  %v4088_v31 = vld [vmem:[%s7929_s7 + $0x60] sm:$0xff] }
 0x4cc   : > { %v4146_v42 = vmax.f32 %v4114_v15, 0.0  ;;  %v4115_v61 = vadd.f32 %v4083_v3, %v4051_v35 }
 0x4cd   : > { %v4144_v52 = vmax.f32 %v4112_v38, 0.0  ;;  %v4113_v18 = vadd.f32 %v4081_v19, %v4049_v25  ;;  %v5759_v58 = vpop.f32.mrb[156].mxu1 }
 0x4ce   : > { %4178 = vst [vmem:[%s7950_s12 + $0x30] sm:$0xff] %v4146_v42  ;;  %v4147_v7 = vmax.f32 %v4115_v61, 0.0  ;;  %v5823_v51 = vadd.f32 %v7840_v33, %v5759_v58  ;;  %v3910_v8 = vpop.f32.mrb[157].mxu1  ;;  %v4087_v33 = vld [vmem:[%s7929_s7 + $0x58] sm:$0xff]  ;;  %v4089_v42 = vld [vmem:[%s7929_s7 + $0x68] sm:$0xff] }
 0x4cf   : > { %4176 = vst [vmem:[%s7950_s12 + $0x20] sm:$0xff] %v4144_v52  ;;  %v4145_v6 = vmax.f32 %v4113_v18, 0.0  ;;  %v5826_v2 = vadd.f32 %v7832_v60, %v3910_v8  ;;  %v5760_v1 = vpop.f32.mrb[158].mxu1 }
 0x4d0   : > { %4179 = vst [vmem:[%s7950_s12 + $0x38] sm:$0xff] %v4147_v7  ;;  %v4054_v17 = vadd.f32 %v5823_v51, %v7934_v14  ;;  %v5829_v56 = vadd.f32 %v7843_v62, %v5760_v1  ;;  %v3913_v44 = vpop.f32.mrb[159].mxu1 }
 0x4d1   : > { %4177 = vst [vmem:[%s7950_s12 + $0x28] sm:$0xff] %v4145_v6  ;;  %v4052_v50 = vadd.f32 %v5826_v2, %v7934_v14  ;;  %v5832_v43 = vadd.f32 %v7835_v45, %v3913_v44  ;;  %v4094_v2 = vld [vmem:[%s7929_s7 + $0x90] sm:$0xff] }
 0x4d2   : > { %v4118_v24 = vadd.f32 %v4086_v59, %v4054_v17  ;;  %v4055_v60 = vadd.f32 %v5829_v56, %v7934_v14  ;;  %v4092_v56 = vld [vmem:[%s7929_s7 + $0x80] sm:$0xff] }
 0x4d3   : > { %v4116_v37 = vadd.f32 %v4084_v57, %v4052_v50  ;;  %v4053_v39 = vadd.f32 %v5832_v43, %v7934_v14 }
 0x4d4   : > { %v4150_v26 = vmax.f32 %v4118_v24, 0.0  ;;  %v4119_v62 = vadd.f32 %v4087_v33, %v4055_v60  ;;  %v4093_v60 = vld [vmem:[%s7929_s7 + $0x88] sm:$0xff] }
 0x4d5   : > { %v4148_v41 = vmax.f32 %v4116_v37, 0.0  ;;  %v4117_v0 = vadd.f32 %v4085_v27, %v4053_v39  ;;  %v5763_v49 = vpop.f32.mrb[160].mxu1 }
 0x4d6   : > { %4182 = vst [vmem:[%s7950_s12 + $0x50] sm:$0xff] %v4150_v26  ;;  %v4151_v30 = vmax.f32 %v4119_v62, 0.0  ;;  %v5835_v45 = vadd.f32 %v7856_v9, %v5763_v49  ;;  %v3926_v63 = vpop.f32.mrb[161].mxu1  ;;  %v4091_v9 = vld [vmem:[%s7929_s7 + $0x78] sm:$0xff] }
 0x4d7   : > { %4180 = vst [vmem:[%s7950_s12 + $0x40] sm:$0xff] %v4148_v41  ;;  %v4149_v29 = vmax.f32 %v4117_v0, 0.0  ;;  %v5838_v32 = vadd.f32 %v7848_v34, %v3926_v63  ;;  %v5764_v16 = vpop.f32.mrb[162].mxu1 }
 0x4d8   : > { %4183 = vst [vmem:[%s7950_s12 + $0x58] sm:$0xff] %v4151_v30  ;;  %v4058_v3 = vadd.f32 %v5835_v45, %v7934_v14  ;;  %v5841_v15 = vadd.f32 %v7859_v54, %v5764_v16  ;;  %v3929_v35 = vpop.f32.mrb[163].mxu1  ;;  %v4098_v45 = vld [vmem:[%s7929_s7 + $0xb0] sm:$0xff] }
 0x4d9   : > { %4181 = vst [vmem:[%s7950_s12 + $0x48] sm:$0xff] %v4149_v29  ;;  %v4056_v19 = vadd.f32 %v5838_v32, %v7934_v14  ;;  %v5844_v38 = vadd.f32 %v7851_v47, %v3929_v35  ;;  %v4096_v32 = vld [vmem:[%s7929_s7 + $0xa0] sm:$0xff] }
 0x4da   : > { %v4122_v25 = vadd.f32 %v4090_v36, %v4058_v3  ;;  %v4059_v34 = vadd.f32 %v5841_v15, %v7934_v14 }
 0x4db   : > { %v4120_v61 = vadd.f32 %v4088_v31, %v4056_v19  ;;  %v4057_v52 = vadd.f32 %v5844_v38, %v7934_v14  ;;  %v4097_v19 = vld [vmem:[%s7929_s7 + $0xa8] sm:$0xff] }
 0x4dc   : > { %v4154_v18 = vmax.f32 %v4122_v25, 0.0  ;;  %v4123_v54 = vadd.f32 %v4091_v9, %v4059_v34 }
 0x4dd   : > { %v4152_v58 = vmax.f32 %v4120_v61, 0.0  ;;  %v4121_v7 = vadd.f32 %v4089_v42, %v4057_v52  ;;  %v5767_v51 = vpop.f32.mrb[164].mxu1 }
 0x4de   : > { %4186 = vst [vmem:[%s7950_s12 + $0x70] sm:$0xff] %v4154_v18  ;;  %v4155_v8 = vmax.f32 %v4123_v54, 0.0  ;;  %v5847_v47 = vadd.f32 %v7872_v20, %v5767_v51  ;;  %v3942_v6 = vpop.f32.mrb[165].mxu1  ;;  %v4095_v20 = vld [vmem:[%s7929_s7 + $0x98] sm:$0xff] }
 0x4df   : > { %4184 = vst [vmem:[%s7950_s12 + $0x60] sm:$0xff] %v4152_v58  ;;  %v4153_v59 = vmax.f32 %v4121_v7, 0.0  ;;  %v5850_v1 = vadd.f32 %v7864_v46, %v3942_v6  ;;  %v5768_v17 = vpop.f32.mrb[166].mxu1  ;;  %v4102_v58 = vld [vmem:[%s7929_s7 + $0xd0] sm:$0xff] }
 0x4e0   : > { %4187 = vst [vmem:[%s7950_s12 + $0x78] sm:$0xff] %v4155_v8  ;;  %v4062_v57 = vadd.f32 %v5847_v47, %v7934_v14  ;;  %v5853_v44 = vadd.f32 %v7875_v13, %v5768_v17  ;;  %v3945_v50 = vpop.f32.mrb[167].mxu1  ;;  %v4100_v47 = vld [vmem:[%s7929_s7 + $0xc0] sm:$0xff] }
 0x4e1   : > { %4185 = vst [vmem:[%s7950_s12 + $0x68] sm:$0xff] %v4153_v59  ;;  %v4060_v33 = vadd.f32 %v5850_v1, %v7934_v14  ;;  %v5856_v43 = vadd.f32 %v7867_v48, %v3945_v50 }
 0x4e2   : > { %v4126_v24 = vadd.f32 %v4094_v2, %v4062_v57  ;;  %v4063_v46 = vadd.f32 %v5853_v44, %v7934_v14  ;;  %v4101_v57 = vld [vmem:[%s7929_s7 + $0xc8] sm:$0xff] }
 0x4e3   : > { %v4124_v27 = vadd.f32 %v4092_v56, %v4060_v33  ;;  %v4061_v37 = vadd.f32 %v5856_v43, %v7934_v14 }
 0x4e4   : > { %v4158_v39 = vmax.f32 %v4126_v24, 0.0  ;;  %v4127_v13 = vadd.f32 %v4095_v20, %v4063_v46 }
 0x4e5   : > { %v4156_v26 = vmax.f32 %v4124_v27, 0.0  ;;  %v4125_v62 = vadd.f32 %v4093_v60, %v4061_v37  ;;  %v5771_v41 = vpop.f32.mrb[168].mxu1  ;;  %v4106_v27 = vld [vmem:[%s7929_s7 + $0xf0] sm:$0xff] }
 0x4e6   : > { %4190 = vst [vmem:[%s7950_s12 + $0x90] sm:$0xff] %v4158_v39  ;;  %v4159_v0 = vmax.f32 %v4127_v13, 0.0  ;;  %v5859_v48 = vadd.f32 %v7888_v40, %v5771_v41  ;;  %v3958_v49 = vpop.f32.mrb[169].mxu1  ;;  %v4099_v40 = vld [vmem:[%s7929_s7 + $0xb8] sm:$0xff] }
 0x4e7   : > { %4188 = vst [vmem:[%s7950_s12 + $0x80] sm:$0xff] %v4156_v26  ;;  %v4157_v30 = vmax.f32 %v4125_v62, 0.0  ;;  %v5862_v63 = vadd.f32 %v7880_v53, %v3958_v49  ;;  %v5772_v29 = vpop.f32.mrb[170].mxu1  ;;  %v4104_v26 = vld [vmem:[%s7929_s7 + $0xe0] sm:$0xff] }
 0x4e8   : > { %4191 = vst [vmem:[%s7950_s12 + $0x98] sm:$0xff] %v4159_v0  ;;  %v4066_v36 = vadd.f32 %v5859_v48, %v7934_v14  ;;  %v5865_v16 = vadd.f32 %v7891_v11, %v5772_v29  ;;  %v3961_v3 = vpop.f32.mrb[171].mxu1  ;;  %v4107_v0 = vld [vmem:[%s7929_s7 + $0xf8] sm:$0xff] }
 0x4e9   : > { %4189 = vst [vmem:[%s7950_s12 + $0x88] sm:$0xff] %v4157_v30  ;;  %v4064_v31 = vadd.f32 %v5862_v63, %v7934_v14  ;;  %v5868_v15 = vadd.f32 %v7883_v10, %v3961_v3  ;;  %v4105_v30 = vld [vmem:[%s7929_s7 + $0xe8] sm:$0xff] }
 0x4ea   : > { %v4130_v35 = vadd.f32 %v4098_v45, %v4066_v36  ;;  %v4067_v53 = vadd.f32 %v5865_v16, %v7934_v14 }
 0x4eb   : > { %v4128_v9 = vadd.f32 %v4096_v32, %v4064_v31  ;;  %v4065_v38 = vadd.f32 %v5868_v15, %v7934_v14 }
 0x4ec   : > { %v4162_v25 = vmax.f32 %v4130_v35, 0.0  ;;  %v4131_v11 = vadd.f32 %v4099_v40, %v4067_v53 }
 0x4ed   : > { %v4160_v34 = vmax.f32 %v4128_v9, 0.0  ;;  %v4129_v42 = vadd.f32 %v4097_v19, %v4065_v38  ;;  %v5775_v61 = vpop.f32.mrb[172].mxu1 }
 0x4ee   : > { %4194 = vst [vmem:[%s7950_s12 + $0xb0] sm:$0xff] %v4162_v25  ;;  %v4163_v52 = vmax.f32 %v4131_v11, 0.0  ;;  %v5871_v10 = vadd.f32 %v7904_v28, %v5775_v61  ;;  %v3974_v18 = vpop.f32.mrb[173].mxu1  ;;  %v4103_v28 = vld [vmem:[%s7929_s7 + $0xd8] sm:$0xff] }
 0x4ef   : > { %4192 = vst [vmem:[%s7950_s12 + $0xa0] sm:$0xff] %v4160_v34  ;;  %v4161_v54 = vmax.f32 %v4129_v42, 0.0  ;;  %v5874_v7 = vadd.f32 %v7896_v55, %v3974_v18  ;;  %v5776_v51 = vpop.f32.mrb[174].mxu1 }
 0x4f0   : > { %4195 = vst [vmem:[%s7950_s12 + $0xb8] sm:$0xff] %v4163_v52  ;;  %v4070_v8 = vadd.f32 %v5871_v10, %v7934_v14  ;;  %v5877_v6 = vadd.f32 %v7907_v23, %v5776_v51  ;;  %v3977_v59 = vpop.f32.mrb[175].mxu1 }
 0x4f1   : > { %4193 = vst [vmem:[%s7950_s12 + $0xa8] sm:$0xff] %v4161_v54  ;;  %v4068_v2 = vadd.f32 %v5874_v7, %v7934_v14  ;;  %v5880_v1 = vadd.f32 %v7899_v12, %v3977_v59 }
 0x4f2   : > { %v4134_v17 = vadd.f32 %v4102_v58, %v4070_v8  ;;  %v4071_v55 = vadd.f32 %v5877_v6, %v7934_v14 }
 0x4f3   : > { %v4132_v56 = vadd.f32 %v4100_v47, %v4068_v2  ;;  %v4069_v44 = vadd.f32 %v5880_v1, %v7934_v14 }
 0x4f4   : > { %v4166_v50 = vmax.f32 %v4134_v17, 0.0  ;;  %v4135_v23 = vadd.f32 %v4103_v28, %v4071_v55 }
 0x4f5   : > { %v4164_v33 = vmax.f32 %v4132_v56, 0.0  ;;  %v4133_v20 = vadd.f32 %v4101_v57, %v4069_v44  ;;  %v5779_v43 = vpop.f32.mrb[176].mxu1 }
 0x4f6   : > { %4198 = vst [vmem:[%s7950_s12 + $0xd0] sm:$0xff] %v4166_v50  ;;  %v4167_v24 = vmax.f32 %v4135_v23, 0.0  ;;  %v5883_v12 = vadd.f32 %v7920_v4, %v5779_v43  ;;  %v3990_v46 = vpop.f32.mrb[177].mxu1 }
 0x4f7   : > { %4196 = vst [vmem:[%s7950_s12 + $0xc0] sm:$0xff] %v4164_v33  ;;  %v4165_v60 = vmax.f32 %v4133_v20, 0.0  ;;  %v5886_v37 = vadd.f32 %v7912_v5, %v3990_v46  ;;  %v5780_v39 = vpop.f32.mrb[178].mxu1 }
 0x4f8   : > { %4199 = vst [vmem:[%s7950_s12 + $0xd8] sm:$0xff] %v4167_v24  ;;  %v4074_v13 = vadd.f32 %v5883_v12, %v7934_v14  ;;  %v5889_v62 = vadd.f32 %v7923_v21, %v5780_v39  ;;  %v3993_v41 = vpop.f32.mrb[179].mxu1 }
 0x4f9   : > { %4197 = vst [vmem:[%s7950_s12 + $0xc8] sm:$0xff] %v4165_v60  ;;  %v4072_v4 = vadd.f32 %v5886_v37, %v7934_v14  ;;  %v5892_v48 = vadd.f32 %v7915_v22, %v3993_v41 }
 0x4fa   : > { %v4138_v49 = vadd.f32 %v4106_v27, %v4074_v13  ;;  %v4075_v5 = vadd.f32 %v5889_v62, %v7934_v14 }
 0x4fb   : > { %v4136_v45 = vadd.f32 %v4104_v26, %v4072_v4  ;;  %v4073_v63 = vadd.f32 %v5892_v48, %v7934_v14 }
 0x4fc   : > { %v4170_v29 = vmax.f32 %v4138_v49, 0.0  ;;  %v4139_v36 = vadd.f32 %v4107_v0, %v4075_v5 }
 0x4fd   : > { %v4168_v21 = vmax.f32 %v4136_v45, 0.0  ;;  %v4137_v32 = vadd.f32 %v4105_v30, %v4073_v63 }
 0x4fe   : > { %4202 = vst [vmem:[%s7950_s12 + $0xf0] sm:$0xff] %v4170_v29  ;;  %v4171_v16 = vmax.f32 %v4139_v36, 0.0 }
 0x4ff   : > { %4200 = vst [vmem:[%s7950_s12 + $0xe0] sm:$0xff] %v4168_v21  ;;  %v4169_v3 = vmax.f32 %v4137_v32, 0.0 }
 0x500   : > { %4203 = vst [vmem:[%s7950_s12 + $0xf8] sm:$0xff] %v4171_v16 }
 0x501   : > { %4201 = vst [vmem:[%s7950_s12 + $0xe8] sm:$0xff] %v4169_v3 }
 0x502 PF: > { %s16_s23 = sadd.s32 1, %s6163_s23   ;;  %s8181_s21 = smov %s6159_s22 }
 0x503   : > { %p13_p5 = scmp.ge.s32.totalorder %s16_s23, 4   ;;  %s8182_s22 = smov %s8184_s24 }
 0x505   :  { %15 = sbr.rel (!%p13_p5) target bundleno = 2 (0x2), region = 82 }

</bundles_post_ra>
